<compile_context>
chip_gen: v7x
topology: tpu7x:2x2x1
jax: 0.10.0
libtpu: 0.0.40
codegen_flags: <defaults>
</compile_context>

<pallas_src>
import functools

import numpy as np
import jax
import jax.numpy as jnp
from jax.experimental import pallas as pl
from jax.experimental.pallas import tpu as pltpu

PAD = 0          # Constants.PAD
LN_EPS = 1e-5    # nn.LayerNorm default
NEG_BIG = -1e30  # finite "minus infinity" for masking (avoids NaN rows)


# ----------------------------------------------------------------------------
# helpers (plain JAX glue)
# ----------------------------------------------------------------------------
def get_sinusoid_encoding_table(n_position, d_hid, padding_idx=None):
    position = np.arange(n_position, dtype=np.float64)[:, None]
    hid = np.arange(d_hid, dtype=np.float64)[None, :]
    table = position / np.power(10000.0, 2.0 * np.floor(hid / 2.0) / d_hid)
    table[:, 0::2] = np.sin(table[:, 0::2])
    table[:, 1::2] = np.cos(table[:, 1::2])
    if padding_idx is not None:
        table[padding_idx] = 0.0
    return jnp.asarray(table, dtype=jnp.float32)


def _layer_norm(x, g, b):
    # single-pass statistics: var = E[x^2] - E[x]^2 (both reductions independent)
    m = jnp.mean(x, axis=-1, keepdims=True)
    m2 = jnp.mean(x * x, axis=-1, keepdims=True)
    var = m2 - m * m
    return (x - m) * jax.lax.rsqrt(var + LN_EPS) * g + b


# fixed ordering of the stacked per-layer weight arrays (kernel arg order)
WEIGHT_ORDER = (
    "s_wq", "s_bq", "s_wk", "s_bk", "s_wv", "s_bv", "s_wo", "s_bo", "s_lng", "s_lnb",
    "e_wq", "e_bq", "e_wk", "e_bk", "e_wv", "e_bv", "e_wo", "e_bo", "e_lng", "e_lnb",
    "f_w1", "f_b1", "f_w2", "f_b2", "f_lng", "f_lnb",
)


# ----------------------------------------------------------------------------
# fused decoder kernel: grid = (batch blocks, layers); one layer per step,
# residual stream resident in VMEM scratch across the layer axis.
# ----------------------------------------------------------------------------
def decoder_layer_kernel(
        dec_ref, enc_ref, npm_ref, keypad_ref,
        s_wq, s_bq, s_wk, s_bk, s_wv, s_bv, s_wo, s_bo, s_lng, s_lnb,
        e_wq, e_bq, e_wk, e_bk, e_wv, e_bv, e_wo, e_bo, e_lng, e_lnb,
        f_w1, f_b1, f_w2, f_b2, f_lng, f_lnb,
        out_ref, x_scr,
        *, n_head, d_k, d_v, bt, len_q, len_kv):
    f32, bf16 = jnp.float32, jnp.bfloat16
    H, Bt, L, Ls = n_head, bt, len_q, len_kv
    lay = pl.program_id(1)

    @pl.when(lay == 0)
    def _():
        x_scr[...] = dec_ref[...].astype(f32)      # init residual stream

    x = x_scr[...]                                 # (Bt*L, D) f32
    D = x.shape[-1]
    npm = npm_ref[...]                             # (Bt*L, 1) f32, 1.0 = real token
    keypad = keypad_ref[...]                       # (Bt, 1, L) f32, 1.0 = PAD key

    # --- self-attention additive mask bias (subsequent OR key-pad), in-kernel ---
    row = jax.lax.broadcasted_iota(jnp.int32, (Bt, L, L), 1)   # query index
    col = jax.lax.broadcasted_iota(jnp.int32, (Bt, L, L), 2)   # key index
    masked = jnp.logical_or(col > row, keypad > 0.5)
    slf_bias = jnp.where(masked, f32(NEG_BIG), f32(0.0))       # (Bt, L, L)

    def mha(q_in_bf, kv_in_bf, lk, wq, bq, wk, bk, wv, bv, wo, bo, lng, lnb,
            residual, bias):
        """Multi-head attention: dense lane-wide projections, per-head scores,
        head-sum folded into the output-projection contraction."""
        q = jnp.dot(q_in_bf, wq[0], preferred_element_type=f32) + bq[0]   # (Bt*L,  H*dk)
        k = jnp.dot(kv_in_bf, wk[0], preferred_element_type=f32) + bk[0]  # (Bt*lk, H*dk)
        v = jnp.dot(kv_in_bf, wv[0], preferred_element_type=f32) + bv[0]  # (Bt*lk, H*dv)
        q3 = q.reshape(Bt, L, H * d_k).astype(bf16)
        k3 = k.reshape(Bt, lk, H * d_k).astype(bf16)
        v3 = v.reshape(Bt, lk, H * d_v).astype(bf16)

        ctx_heads = []
        for h in range(H):                      # static unroll; scores are per-head
            qh = q3[:, :, h * d_k:(h + 1) * d_k]
            kh = k3[:, :, h * d_k:(h + 1) * d_k]
            vh = v3[:, :, h * d_v:(h + 1) * d_v]
            s = jnp.einsum('bqd,bkd->bqk', qh, kh,
                           preferred_element_type=f32)          # (Bt, L, lk)
            if bias is not None:
                s = s + bias
            s = s - jnp.max(s, axis=-1, keepdims=True)
            p = jnp.exp(s)
            p = p * pl.reciprocal(jnp.sum(p, axis=-1, keepdims=True), approx=True)
            ctx_heads.append(
                jnp.einsum('bqk,bkd->bqd', p.astype(bf16), vh,
                           preferred_element_type=f32))         # (Bt, L, dv)

        ctx = jnp.concatenate(ctx_heads, axis=-1).reshape(Bt * L, H * d_v)
        # output projection: head reduction folded into the K = H*d_v contraction
        o = jnp.dot(ctx.astype(bf16), wo[0], preferred_element_type=f32) + bo[0]
        o = _layer_norm(o + residual, lng[0], lnb[0])
        return o * npm

    # ----- self attention (1/sqrt(d_k) folded into wq/bq at init) -----
    x_bf = x.astype(bf16)
    x = mha(x_bf, x_bf, L,
            s_wq, s_bq, s_wk, s_bk, s_wv, s_bv, s_wo, s_bo, s_lng, s_lnb,
            x, slf_bias)

    # ----- enc-dec attention (dec_enc_attn_mask is None in the reference) -----
    x_bf = x.astype(bf16)
    enc_flat = enc_ref[...]                         # (Bt*Ls, D) bf16 (pre-flattened)
    x = mha(x_bf, enc_flat, Ls,
            e_wq, e_bq, e_wk, e_bk, e_wv, e_bv, e_wo, e_bo, e_lng, e_lnb,
            x, None)

    # ----- position-wise FFN (Conv1d k=1 == per-token linear) -----
    h1 = jnp.dot(x.astype(bf16), f_w1[0], preferred_element_type=f32) + f_b1[0]
    h1 = jnp.maximum(h1, 0.0)
    y = jnp.dot(h1.astype(bf16), f_w2[0], preferred_element_type=f32) + f_b2[0]
    x = _layer_norm(y + x, f_lng[0], f_lnb[0]) * npm

    x_scr[...] = x

    @pl.when(lay == pl.num_programs(1) - 1)
    def _():
        out_ref[...] = x.astype(out_ref.dtype)


# ----------------------------------------------------------------------------
# pallas_call wrapper
# ----------------------------------------------------------------------------
def decoder_forward(params, tgt_seq, tgt_pos, src_seq, enc_output, *, batch_tile=None):
    B, L = tgt_seq.shape
    D = params["emb"].shape[1]
    cfg = params["cfg"]
    NL, H, d_k, d_v = cfg["n_layers"], cfg["n_head"], cfg["d_k"], cfg["d_v"]
    Ls = enc_output.shape[1]
    Bt = batch_tile or B          # fold the whole (toy) batch into one M slab
    assert B % Bt == 0

    # O(B*L) mask ingredients only; the (L, L) mask itself is built in-kernel.
    non_pad = (tgt_seq != PAD).astype(jnp.float32).reshape(B * L, 1)     # (B*L, 1)
    keypad = (tgt_seq == PAD).astype(jnp.float32)[:, None, :]            # (B, 1, L)

    # embeddings (glue) — word emb + frozen sinusoid position emb, flattened to
    # (B*L, D) so the kernel matmuls see M = Bt*L dense rows.
    dec_in = (params["emb"][tgt_seq] + params["pos"][tgt_pos]).astype(jnp.bfloat16)
    dec_in = dec_in.reshape(B * L, D)
    enc = enc_output.astype(jnp.bfloat16).reshape(B * Ls, D)

    weights = [params["stacked"][n] for n in WEIGHT_ORDER]

    kernel = functools.partial(
        decoder_layer_kernel, n_head=H, d_k=d_k, d_v=d_v,
        bt=Bt, len_q=L, len_kv=Ls)

    in_specs = [
        pl.BlockSpec((Bt * L, D), lambda b, l: (b, 0)),        # dec_in (read @ l==0)
        pl.BlockSpec((Bt * Ls, D), lambda b, l: (b, 0)),       # enc (layer-invariant)
        pl.BlockSpec((Bt * L, 1), lambda b, l: (b, 0)),        # non-pad mask
        pl.BlockSpec((Bt, 1, L), lambda b, l: (b, 0, 0)),      # key-pad vector
    ] + [
        # one layer of weights per grid step → double-buffered weight pipelining
        pl.BlockSpec((1,) + tuple(w.shape[1:]), lambda b, l: (l, 0, 0))
        for w in weights
    ]

    out = pl.pallas_call(
        kernel,
        out_shape=jax.ShapeDtypeStruct((B * L, D), jnp.float32),
        grid=(B // Bt, NL),
        in_specs=in_specs,
        out_specs=pl.BlockSpec((Bt * L, D), lambda b, l: (b, 0)),
        scratch_shapes=[pltpu.VMEM((Bt * L, D), jnp.float32)],   # residual stream
        compiler_params=pltpu.CompilerParams(
            dimension_semantics=("parallel", "arbitrary")),
    )(dec_in, enc, non_pad, keypad, *weights)
    return (out.reshape(B, L, D),)


# ----------------------------------------------------------------------------
# parameter init (deterministic, synthetic) — weights stored lane-dense
# (D, H*d_k) etc., stacked over layers for the per-layer-pipelined kernel.
# ----------------------------------------------------------------------------
def init_decoder_params(key, *, n_tgt_vocab, len_max_seq, d_word_vec, n_layers,
                        n_head, d_k, d_v, d_model, d_inner):
    n_position = len_max_seq + 1
    keys = iter(jax.random.split(key, 24))

    def nrm(shape, scale=0.05):
        return scale * jax.random.normal(next(keys), shape, dtype=jnp.float32)

    emb = nrm((n_tgt_vocab, d_word_vec), 0.1).at[PAD].set(0.0)   # padding_idx=PAD
    pos = get_sinusoid_encoding_table(n_position, d_word_vec, padding_idx=0)

    NL, H, D, DI = n_layers, n_head, d_model, d_inner
    HK, HV = H * d_k, H * d_v
    bf, f32 = jnp.bfloat16, jnp.float32
    inv_temp = 1.0 / np.sqrt(d_k)     # folded into Wq/bq (q/temperature in reference)

    stacked = dict(
        # self-attention
        s_wq=(nrm((NL, D, HK)) * inv_temp).astype(bf),
        s_bq=jnp.zeros((NL, 1, HK), f32),
        s_wk=nrm((NL, D, HK)).astype(bf),
        s_bk=jnp.zeros((NL, 1, HK), f32),
        s_wv=nrm((NL, D, HV)).astype(bf),
        s_bv=jnp.zeros((NL, 1, HV), f32),
        s_wo=nrm((NL, HV, D)).astype(bf),
        s_bo=jnp.zeros((NL, 1, D), f32),
        s_lng=jnp.ones((NL, 1, D), f32),
        s_lnb=jnp.zeros((NL, 1, D), f32),
        # enc-dec attention
        e_wq=(nrm((NL, D, HK)) * inv_temp).astype(bf),
        e_bq=jnp.zeros((NL, 1, HK), f32),
        e_wk=nrm((NL, D, HK)).astype(bf),
        e_bk=jnp.zeros((NL, 1, HK), f32),
        e_wv=nrm((NL, D, HV)).astype(bf),
        e_bv=jnp.zeros((NL, 1, HV), f32),
        e_wo=nrm((NL, HV, D)).astype(bf),
        e_bo=jnp.zeros((NL, 1, D), f32),
        e_lng=jnp.ones((NL, 1, D), f32),
        e_lnb=jnp.zeros((NL, 1, D), f32),
        # position-wise FFN
        f_w1=nrm((NL, D, DI)).astype(bf),
        f_b1=jnp.zeros((NL, 1, DI), f32),
        f_w2=nrm((NL, DI, D)).astype(bf),
        f_b2=jnp.zeros((NL, 1, D), f32),
        f_lng=jnp.ones((NL, 1, D), f32),
        f_lnb=jnp.zeros((NL, 1, D), f32),
    )
    cfg = dict(n_layers=NL, n_head=H, d_k=d_k, d_v=d_v)
    return dict(emb=emb, pos=pos, stacked=stacked, cfg=cfg)


# ----------------------------------------------------------------------------
# main
# ----------------------------------------------------------------------------
if __name__ == "__main__":
    B, L, Ls = 2, 8, 8
    n_tgt_vocab, len_max_seq = 16, 16
    d_model = d_word_vec = 32
    n_layers, n_head, d_k, d_v, d_inner = 2, 4, 8, 8, 64

    key = jax.random.PRNGKey(0)
    k_seq, k_src, k_enc, k_par = jax.random.split(key, 4)

    tgt_seq = jax.random.randint(k_seq, (B, L), 1, n_tgt_vocab, dtype=jnp.int32)
    tgt_seq = tgt_seq.at[1, -2:].set(PAD)                       # some trailing padding
    positions = jnp.arange(1, L + 1, dtype=jnp.int32)[None, :]
    tgt_pos = jnp.where(tgt_seq != PAD, positions, 0)

    src_seq = jax.random.randint(k_src, (B, Ls), 1, n_tgt_vocab, dtype=jnp.int32)
    enc_output = jax.random.normal(k_enc, (B, Ls, d_model), dtype=jnp.float32)

    params = init_decoder_params(
        k_par, n_tgt_vocab=n_tgt_vocab, len_max_seq=len_max_seq,
        d_word_vec=d_word_vec, n_layers=n_layers, n_head=n_head,
        d_k=d_k, d_v=d_v, d_model=d_model, d_inner=d_inner)

    (dec_out,) = decoder_forward(params, tgt_seq, tgt_pos, src_seq, enc_output)
    dec_out = jax.block_until_ready(dec_out)

    assert dec_out.shape == (B, L, d_model)
    assert bool(jnp.all(jnp.isfinite(dec_out)))
    # TODO(synk): dropout layers are treated as identity (inference semantics).
    print("KERNEL_OK")
</pallas_src>

<mosaic_0001>
module attributes {stable_mosaic.version = 11 : i64} {
  func.func @decoder_layer_kernel(%arg0: i32, %arg1: i32, %arg2: memref<16x32xbf16, #tpu.memory_space<vmem>>, %arg3: memref<16x32xbf16, #tpu.memory_space<vmem>>, %arg4: memref<16x1xf32, #tpu.memory_space<vmem>>, %arg5: memref<2x1x8xf32, #tpu.memory_space<vmem>>, %arg6: memref<1x32x32xbf16, #tpu.memory_space<vmem>>, %arg7: memref<1x1x32xf32, #tpu.memory_space<vmem>>, %arg8: memref<1x32x32xbf16, #tpu.memory_space<vmem>>, %arg9: memref<1x1x32xf32, #tpu.memory_space<vmem>>, %arg10: memref<1x32x32xbf16, #tpu.memory_space<vmem>>, %arg11: memref<1x1x32xf32, #tpu.memory_space<vmem>>, %arg12: memref<1x32x32xbf16, #tpu.memory_space<vmem>>, %arg13: memref<1x1x32xf32, #tpu.memory_space<vmem>>, %arg14: memref<1x1x32xf32, #tpu.memory_space<vmem>>, %arg15: memref<1x1x32xf32, #tpu.memory_space<vmem>>, %arg16: memref<1x32x32xbf16, #tpu.memory_space<vmem>>, %arg17: memref<1x1x32xf32, #tpu.memory_space<vmem>>, %arg18: memref<1x32x32xbf16, #tpu.memory_space<vmem>>, %arg19: memref<1x1x32xf32, #tpu.memory_space<vmem>>, %arg20: memref<1x32x32xbf16, #tpu.memory_space<vmem>>, %arg21: memref<1x1x32xf32, #tpu.memory_space<vmem>>, %arg22: memref<1x32x32xbf16, #tpu.memory_space<vmem>>, %arg23: memref<1x1x32xf32, #tpu.memory_space<vmem>>, %arg24: memref<1x1x32xf32, #tpu.memory_space<vmem>>, %arg25: memref<1x1x32xf32, #tpu.memory_space<vmem>>, %arg26: memref<1x32x64xbf16, #tpu.memory_space<vmem>>, %arg27: memref<1x1x64xf32, #tpu.memory_space<vmem>>, %arg28: memref<1x64x32xbf16, #tpu.memory_space<vmem>>, %arg29: memref<1x1x32xf32, #tpu.memory_space<vmem>>, %arg30: memref<1x1x32xf32, #tpu.memory_space<vmem>>, %arg31: memref<1x1x32xf32, #tpu.memory_space<vmem>>, %arg32: memref<16x32xf32, #tpu.memory_space<vmem>>, %arg33: memref<16x32xf32, #tpu.memory_space<vmem>>) attributes {dimension_semantics = [#tpu.dimension_semantics<parallel>, #tpu.dimension_semantics<arbitrary>], iteration_bounds = array<i64: 1, 2>, scalar_prefetch = 0 : i64, scratch_operands = 1 : i64, tpu.core_type = #tpu.core_type<tc>, window_params = [{transform_indices = @transform_0, window_bounds = array<i64: 16, 32>}, {transform_indices = @transform_1, window_bounds = array<i64: 16, 32>}, {transform_indices = @transform_2, window_bounds = array<i64: 16, 1>}, {transform_indices = @transform_3, window_bounds = array<i64: 2, 1, 8>}, {transform_indices = @transform_4, window_bounds = array<i64: 1, 32, 32>}, {transform_indices = @transform_5, window_bounds = array<i64: 1, 1, 32>}, {transform_indices = @transform_6, window_bounds = array<i64: 1, 32, 32>}, {transform_indices = @transform_7, window_bounds = array<i64: 1, 1, 32>}, {transform_indices = @transform_8, window_bounds = array<i64: 1, 32, 32>}, {transform_indices = @transform_9, window_bounds = array<i64: 1, 1, 32>}, {transform_indices = @transform_10, window_bounds = array<i64: 1, 32, 32>}, {transform_indices = @transform_11, window_bounds = array<i64: 1, 1, 32>}, {transform_indices = @transform_12, window_bounds = array<i64: 1, 1, 32>}, {transform_indices = @transform_13, window_bounds = array<i64: 1, 1, 32>}, {transform_indices = @transform_14, window_bounds = array<i64: 1, 32, 32>}, {transform_indices = @transform_15, window_bounds = array<i64: 1, 1, 32>}, {transform_indices = @transform_16, window_bounds = array<i64: 1, 32, 32>}, {transform_indices = @transform_17, window_bounds = array<i64: 1, 1, 32>}, {transform_indices = @transform_18, window_bounds = array<i64: 1, 32, 32>}, {transform_indices = @transform_19, window_bounds = array<i64: 1, 1, 32>}, {transform_indices = @transform_20, window_bounds = array<i64: 1, 32, 32>}, {transform_indices = @transform_21, window_bounds = array<i64: 1, 1, 32>}, {transform_indices = @transform_22, window_bounds = array<i64: 1, 1, 32>}, {transform_indices = @transform_23, window_bounds = array<i64: 1, 1, 32>}, {transform_indices = @transform_24, window_bounds = array<i64: 1, 32, 64>}, {transform_indices = @transform_25, window_bounds = array<i64: 1, 1, 64>}, {transform_indices = @transform_26, window_bounds = array<i64: 1, 64, 32>}, {transform_indices = @transform_27, window_bounds = array<i64: 1, 1, 32>}, {transform_indices = @transform_28, window_bounds = array<i64: 1, 1, 32>}, {transform_indices = @transform_29, window_bounds = array<i64: 1, 1, 32>}, {transform_indices = @transform_30, window_bounds = array<i64: 16, 32>}]} {
    %c0_i32 = arith.constant 0 : i32
    %0 = arith.cmpi eq, %arg1, %c0_i32 : i32
    %1 = arith.extui %0 : i1 to i32
    %c0_i32_0 = arith.constant 0 : i32
    %2 = arith.cmpi ne, %1, %c0_i32_0 : i32
    scf.if %2 {
      %c0_150 = arith.constant 0 : index
      %c0_151 = arith.constant 0 : index
      %334 = vector.load %arg2[%c0_150, %c0_151] : memref<16x32xbf16, #tpu.memory_space<vmem>>, vector<16x32xbf16>
      %335 = arith.extf %334 : vector<16x32xbf16> to vector<16x32xf32>
      %c0_152 = arith.constant 0 : index
      %c0_153 = arith.constant 0 : index
      %336 = vector.load %arg33[%c0_152, %c0_153] : memref<16x32xf32, #tpu.memory_space<vmem>>, vector<16x32xf32>
      tpu.vector_store %arg33[%c0_152, %c0_153], %335 {strides = array<i32>} : memref<16x32xf32, #tpu.memory_space<vmem>>, vector<16x32xf32>,
    } else {
    }
    %c0 = arith.constant 0 : index
    %c0_1 = arith.constant 0 : index
    %3 = vector.load %arg33[%c0, %c0_1] : memref<16x32xf32, #tpu.memory_space<vmem>>, vector<16x32xf32>
    %c0_2 = arith.constant 0 : index
    %c0_3 = arith.constant 0 : index
    %4 = vector.load %arg4[%c0_2, %c0_3] : memref<16x1xf32, #tpu.memory_space<vmem>>, vector<16x1xf32>
    %c0_4 = arith.constant 0 : index
    %c0_5 = arith.constant 0 : index
    %c0_6 = arith.constant 0 : index
    %5 = vector.load %arg5[%c0_4, %c0_5, %c0_6] : memref<2x1x8xf32, #tpu.memory_space<vmem>>, vector<2x1x8xf32>
    %6 = tpu.iota {dimensions = array<i32: 1>} : vector<2x8x8xi32>
    %7 = tpu.iota {dimensions = array<i32: 2>} : vector<2x8x8xi32>
    %8 = arith.cmpi sgt, %7, %6 : vector<2x8x8xi32>
    %cst = arith.constant 5.000000e-01 : f32
    %9 = vector.broadcast %cst : f32 to vector<2x1x8xf32>
    %10 = arith.cmpf ogt, %5, %9 : vector<2x1x8xf32>
    %11 = vector.broadcast %10 : vector<2x1x8xi1> to vector<2x8x8xi1>
    %12 = arith.ori %8, %11 : vector<2x8x8xi1>
    %cst_7 = arith.constant -1.000000e+30 : f32
    %cst_8 = arith.constant 0.000000e+00 : f32
    %13 = vector.broadcast %cst_7 : f32 to vector<2x8x8xf32>
    %14 = vector.broadcast %cst_8 : f32 to vector<2x8x8xf32>
    %15 = arith.select %12, %13, %14 : vector<2x8x8xi1>, vector<2x8x8xf32>
    %16 = arith.truncf %3 : vector<16x32xf32> to vector<16x32xbf16>
    %c0_9 = arith.constant 0 : index
    %c0_10 = arith.constant 0 : index
    %c0_11 = arith.constant 0 : index
    %17 = vector.load %arg6[%c0_9, %c0_10, %c0_11] : memref<1x32x32xbf16, #tpu.memory_space<vmem>>, vector<1x32x32xbf16>
    %18 = vector.shape_cast %17 : vector<1x32x32xbf16> to vector<32x32xbf16>
    %cst_12 = arith.constant dense<0.000000e+00> : vector<16x32xf32>
    %19 = tpu.matmul %16, %18, %cst_12 {dimension_numbers = #tpu.dot_dimension_numbers<[1], [0], [0], [1], [0, 0, 1, 1], [], []>} : vector<16x32xbf16>, vector<32x32xbf16>, vector<16x32xf32> -> vector<16x32xf32>
    %c0_13 = arith.constant 0 : index
    %c0_14 = arith.constant 0 : index
    %c0_15 = arith.constant 0 : index
    %20 = vector.load %arg7[%c0_13, %c0_14, %c0_15] : memref<1x1x32xf32, #tpu.memory_space<vmem>>, vector<1x1x32xf32>
    %21 = vector.shape_cast %20 : vector<1x1x32xf32> to vector<1x32xf32>
    %22 = vector.broadcast %21 : vector<1x32xf32> to vector<16x32xf32>
    %23 = arith.addf %19, %22 : vector<16x32xf32>
    %c0_16 = arith.constant 0 : index
    %c0_17 = arith.constant 0 : index
    %c0_18 = arith.constant 0 : index
    %24 = vector.load %arg8[%c0_16, %c0_17, %c0_18] : memref<1x32x32xbf16, #tpu.memory_space<vmem>>, vector<1x32x32xbf16>
    %25 = vector.shape_cast %24 : vector<1x32x32xbf16> to vector<32x32xbf16>
    %cst_19 = arith.constant dense<0.000000e+00> : vector<16x32xf32>
    %26 = tpu.matmul %16, %25, %cst_19 {dimension_numbers = #tpu.dot_dimension_numbers<[1], [0], [0], [1], [0, 0, 1, 1], [], []>} : vector<16x32xbf16>, vector<32x32xbf16>, vector<16x32xf32> -> vector<16x32xf32>
    %c0_20 = arith.constant 0 : index
    %c0_21 = arith.constant 0 : index
    %c0_22 = arith.constant 0 : index
    %27 = vector.load %arg9[%c0_20, %c0_21, %c0_22] : memref<1x1x32xf32, #tpu.memory_space<vmem>>, vector<1x1x32xf32>
    %28 = vector.shape_cast %27 : vector<1x1x32xf32> to vector<1x32xf32>
    %29 = vector.broadcast %28 : vector<1x32xf32> to vector<16x32xf32>
    %30 = arith.addf %26, %29 : vector<16x32xf32>
    %c0_23 = arith.constant 0 : index
    %c0_24 = arith.constant 0 : index
    %c0_25 = arith.constant 0 : index
    %31 = vector.load %arg10[%c0_23, %c0_24, %c0_25] : memref<1x32x32xbf16, #tpu.memory_space<vmem>>, vector<1x32x32xbf16>
    %32 = vector.shape_cast %31 : vector<1x32x32xbf16> to vector<32x32xbf16>
    %cst_26 = arith.constant dense<0.000000e+00> : vector<16x32xf32>
    %33 = tpu.matmul %16, %32, %cst_26 {dimension_numbers = #tpu.dot_dimension_numbers<[1], [0], [0], [1], [0, 0, 1, 1], [], []>} : vector<16x32xbf16>, vector<32x32xbf16>, vector<16x32xf32> -> vector<16x32xf32>
    %c0_27 = arith.constant 0 : index
    %c0_28 = arith.constant 0 : index
    %c0_29 = arith.constant 0 : index
    %34 = vector.load %arg11[%c0_27, %c0_28, %c0_29] : memref<1x1x32xf32, #tpu.memory_space<vmem>>, vector<1x1x32xf32>
    %35 = vector.shape_cast %34 : vector<1x1x32xf32> to vector<1x32xf32>
    %36 = vector.broadcast %35 : vector<1x32xf32> to vector<16x32xf32>
    %37 = arith.addf %33, %36 : vector<16x32xf32>
    %38 = vector.shape_cast %23 : vector<16x32xf32> to vector<2x8x32xf32>
    %39 = arith.truncf %38 : vector<2x8x32xf32> to vector<2x8x32xbf16>
    %40 = vector.shape_cast %30 : vector<16x32xf32> to vector<2x8x32xf32>
    %41 = arith.truncf %40 : vector<2x8x32xf32> to vector<2x8x32xbf16>
    %42 = vector.shape_cast %37 : vector<16x32xf32> to vector<2x8x32xf32>
    %43 = arith.truncf %42 : vector<2x8x32xf32> to vector<2x8x32xbf16>
    %44 = vector.extract_strided_slice %39 {offsets = [0, 0, 0], sizes = [2, 8, 8], strides = [1, 1, 1]} : vector<2x8x32xbf16> to vector<2x8x8xbf16>
    %45 = vector.extract_strided_slice %41 {offsets = [0, 0, 0], sizes = [2, 8, 8], strides = [1, 1, 1]} : vector<2x8x32xbf16> to vector<2x8x8xbf16>
    %46 = vector.extract_strided_slice %43 {offsets = [0, 0, 0], sizes = [2, 8, 8], strides = [1, 1, 1]} : vector<2x8x32xbf16> to vector<2x8x8xbf16>
    "tpu.trace_start"() <{level = 10 : i32, message = "bqd,bkd->bqk"}> : () -> ()
    %cst_30 = arith.constant dense<0.000000e+00> : vector<2x8x8xf32>
    %47 = tpu.matmul %44, %45, %cst_30 {dimension_numbers = #tpu.dot_dimension_numbers<[2], [2], [1], [1], [0, 0, 0, 1, 1, 1], [0], [0]>} : vector<2x8x8xbf16>, vector<2x8x8xbf16>, vector<2x8x8xf32> -> vector<2x8x8xf32>
    "tpu.trace_stop"() : () -> ()
    %48 = arith.addf %47, %15 : vector<2x8x8xf32>
    %cst_31 = arith.constant dense<0xFF800000> : vector<2x8xf32>
    %49 = vector.multi_reduction <maximumf>, %48, %cst_31 [2] : vector<2x8x8xf32> to vector<2x8xf32>
    %50 = vector.shape_cast %49 : vector<2x8xf32> to vector<2x8x1xf32>
    %51 = vector.broadcast %50 : vector<2x8x1xf32> to vector<2x8x8xf32>
    %52 = arith.subf %48, %51 : vector<2x8x8xf32>
    %53 = math.exp %52 : vector<2x8x8xf32>
    %cst_32 = arith.constant dense<0.000000e+00> : vector<2x8xf32>
    %54 = vector.multi_reduction <add>, %53, %cst_32 [2] : vector<2x8x8xf32> to vector<2x8xf32>
    %55 = vector.shape_cast %54 : vector<2x8xf32> to vector<2x8x1xf32>
    %56 = tpu.reciprocal %55 {approx = true} : vector<2x8x1xf32> -> vector<2x8x1xf32>
    %57 = vector.broadcast %56 : vector<2x8x1xf32> to vector<2x8x8xf32>
    %58 = arith.mulf %53, %57 : vector<2x8x8xf32>
    %59 = arith.truncf %58 : vector<2x8x8xf32> to vector<2x8x8xbf16>
    "tpu.trace_start"() <{level = 10 : i32, message = "bqk,bkd->bqd"}> : () -> ()
    %cst_33 = arith.constant dense<0.000000e+00> : vector<2x8x8xf32>
    %60 = tpu.matmul %59, %46, %cst_33 {dimension_numbers = #tpu.dot_dimension_numbers<[2], [1], [1], [2], [0, 0, 0, 1, 1, 2], [0], [0]>} : vector<2x8x8xbf16>, vector<2x8x8xbf16>, vector<2x8x8xf32> -> vector<2x8x8xf32>
    "tpu.trace_stop"() : () -> ()
    %61 = vector.extract_strided_slice %39 {offsets = [0, 0, 8], sizes = [2, 8, 8], strides = [1, 1, 1]} : vector<2x8x32xbf16> to vector<2x8x8xbf16>
    %62 = vector.extract_strided_slice %41 {offsets = [0, 0, 8], sizes = [2, 8, 8], strides = [1, 1, 1]} : vector<2x8x32xbf16> to vector<2x8x8xbf16>
    %63 = vector.extract_strided_slice %43 {offsets = [0, 0, 8], sizes = [2, 8, 8], strides = [1, 1, 1]} : vector<2x8x32xbf16> to vector<2x8x8xbf16>
    "tpu.trace_start"() <{level = 10 : i32, message = "bqd,bkd->bqk"}> : () -> ()
    %cst_34 = arith.constant dense<0.000000e+00> : vector<2x8x8xf32>
    %64 = tpu.matmul %61, %62, %cst_34 {dimension_numbers = #tpu.dot_dimension_numbers<[2], [2], [1], [1], [0, 0, 0, 1, 1, 1], [0], [0]>} : vector<2x8x8xbf16>, vector<2x8x8xbf16>, vector<2x8x8xf32> -> vector<2x8x8xf32>
    "tpu.trace_stop"() : () -> ()
    %65 = arith.addf %64, %15 : vector<2x8x8xf32>
    %cst_35 = arith.constant dense<0xFF800000> : vector<2x8xf32>
    %66 = vector.multi_reduction <maximumf>, %65, %cst_35 [2] : vector<2x8x8xf32> to vector<2x8xf32>
    %67 = vector.shape_cast %66 : vector<2x8xf32> to vector<2x8x1xf32>
    %68 = vector.broadcast %67 : vector<2x8x1xf32> to vector<2x8x8xf32>
    %69 = arith.subf %65, %68 : vector<2x8x8xf32>
    %70 = math.exp %69 : vector<2x8x8xf32>
    %cst_36 = arith.constant dense<0.000000e+00> : vector<2x8xf32>
    %71 = vector.multi_reduction <add>, %70, %cst_36 [2] : vector<2x8x8xf32> to vector<2x8xf32>
    %72 = vector.shape_cast %71 : vector<2x8xf32> to vector<2x8x1xf32>
    %73 = tpu.reciprocal %72 {approx = true} : vector<2x8x1xf32> -> vector<2x8x1xf32>
    %74 = vector.broadcast %73 : vector<2x8x1xf32> to vector<2x8x8xf32>
    %75 = arith.mulf %70, %74 : vector<2x8x8xf32>
    %76 = arith.truncf %75 : vector<2x8x8xf32> to vector<2x8x8xbf16>
    "tpu.trace_start"() <{level = 10 : i32, message = "bqk,bkd->bqd"}> : () -> ()
    %cst_37 = arith.constant dense<0.000000e+00> : vector<2x8x8xf32>
    %77 = tpu.matmul %76, %63, %cst_37 {dimension_numbers = #tpu.dot_dimension_numbers<[2], [1], [1], [2], [0, 0, 0, 1, 1, 2], [0], [0]>} : vector<2x8x8xbf16>, vector<2x8x8xbf16>, vector<2x8x8xf32> -> vector<2x8x8xf32>
    "tpu.trace_stop"() : () -> ()
    %78 = vector.extract_strided_slice %39 {offsets = [0, 0, 16], sizes = [2, 8, 8], strides = [1, 1, 1]} : vector<2x8x32xbf16> to vector<2x8x8xbf16>
    %79 = vector.extract_strided_slice %41 {offsets = [0, 0, 16], sizes = [2, 8, 8], strides = [1, 1, 1]} : vector<2x8x32xbf16> to vector<2x8x8xbf16>
    %80 = vector.extract_strided_slice %43 {offsets = [0, 0, 16], sizes = [2, 8, 8], strides = [1, 1, 1]} : vector<2x8x32xbf16> to vector<2x8x8xbf16>
    "tpu.trace_start"() <{level = 10 : i32, message = "bqd,bkd->bqk"}> : () -> ()
    %cst_38 = arith.constant dense<0.000000e+00> : vector<2x8x8xf32>
    %81 = tpu.matmul %78, %79, %cst_38 {dimension_numbers = #tpu.dot_dimension_numbers<[2], [2], [1], [1], [0, 0, 0, 1, 1, 1], [0], [0]>} : vector<2x8x8xbf16>, vector<2x8x8xbf16>, vector<2x8x8xf32> -> vector<2x8x8xf32>
    "tpu.trace_stop"() : () -> ()
    %82 = arith.addf %81, %15 : vector<2x8x8xf32>
    %cst_39 = arith.constant dense<0xFF800000> : vector<2x8xf32>
    %83 = vector.multi_reduction <maximumf>, %82, %cst_39 [2] : vector<2x8x8xf32> to vector<2x8xf32>
    %84 = vector.shape_cast %83 : vector<2x8xf32> to vector<2x8x1xf32>
    %85 = vector.broadcast %84 : vector<2x8x1xf32> to vector<2x8x8xf32>
    %86 = arith.subf %82, %85 : vector<2x8x8xf32>
    %87 = math.exp %86 : vector<2x8x8xf32>
    %cst_40 = arith.constant dense<0.000000e+00> : vector<2x8xf32>
    %88 = vector.multi_reduction <add>, %87, %cst_40 [2] : vector<2x8x8xf32> to vector<2x8xf32>
    %89 = vector.shape_cast %88 : vector<2x8xf32> to vector<2x8x1xf32>
    %90 = tpu.reciprocal %89 {approx = true} : vector<2x8x1xf32> -> vector<2x8x1xf32>
    %91 = vector.broadcast %90 : vector<2x8x1xf32> to vector<2x8x8xf32>
    %92 = arith.mulf %87, %91 : vector<2x8x8xf32>
    %93 = arith.truncf %92 : vector<2x8x8xf32> to vector<2x8x8xbf16>
    "tpu.trace_start"() <{level = 10 : i32, message = "bqk,bkd->bqd"}> : () -> ()
    %cst_41 = arith.constant dense<0.000000e+00> : vector<2x8x8xf32>
    %94 = tpu.matmul %93, %80, %cst_41 {dimension_numbers = #tpu.dot_dimension_numbers<[2], [1], [1], [2], [0, 0, 0, 1, 1, 2], [0], [0]>} : vector<2x8x8xbf16>, vector<2x8x8xbf16>, vector<2x8x8xf32> -> vector<2x8x8xf32>
    "tpu.trace_stop"() : () -> ()
    %95 = vector.extract_strided_slice %39 {offsets = [0, 0, 24], sizes = [2, 8, 8], strides = [1, 1, 1]} : vector<2x8x32xbf16> to vector<2x8x8xbf16>
    %96 = vector.extract_strided_slice %41 {offsets = [0, 0, 24], sizes = [2, 8, 8], strides = [1, 1, 1]} : vector<2x8x32xbf16> to vector<2x8x8xbf16>
    %97 = vector.extract_strided_slice %43 {offsets = [0, 0, 24], sizes = [2, 8, 8], strides = [1, 1, 1]} : vector<2x8x32xbf16> to vector<2x8x8xbf16>
    "tpu.trace_start"() <{level = 10 : i32, message = "bqd,bkd->bqk"}> : () -> ()
    %cst_42 = arith.constant dense<0.000000e+00> : vector<2x8x8xf32>
    %98 = tpu.matmul %95, %96, %cst_42 {dimension_numbers = #tpu.dot_dimension_numbers<[2], [2], [1], [1], [0, 0, 0, 1, 1, 1], [0], [0]>} : vector<2x8x8xbf16>, vector<2x8x8xbf16>, vector<2x8x8xf32> -> vector<2x8x8xf32>
    "tpu.trace_stop"() : () -> ()
    %99 = arith.addf %98, %15 : vector<2x8x8xf32>
    %cst_43 = arith.constant dense<0xFF800000> : vector<2x8xf32>
    %100 = vector.multi_reduction <maximumf>, %99, %cst_43 [2] : vector<2x8x8xf32> to vector<2x8xf32>
    %101 = vector.shape_cast %100 : vector<2x8xf32> to vector<2x8x1xf32>
    %102 = vector.broadcast %101 : vector<2x8x1xf32> to vector<2x8x8xf32>
    %103 = arith.subf %99, %102 : vector<2x8x8xf32>
    %104 = math.exp %103 : vector<2x8x8xf32>
    %cst_44 = arith.constant dense<0.000000e+00> : vector<2x8xf32>
    %105 = vector.multi_reduction <add>, %104, %cst_44 [2] : vector<2x8x8xf32> to vector<2x8xf32>
    %106 = vector.shape_cast %105 : vector<2x8xf32> to vector<2x8x1xf32>
    %107 = tpu.reciprocal %106 {approx = true} : vector<2x8x1xf32> -> vector<2x8x1xf32>
    %108 = vector.broadcast %107 : vector<2x8x1xf32> to vector<2x8x8xf32>
    %109 = arith.mulf %104, %108 : vector<2x8x8xf32>
    %110 = arith.truncf %109 : vector<2x8x8xf32> to vector<2x8x8xbf16>
    "tpu.trace_start"() <{level = 10 : i32, message = "bqk,bkd->bqd"}> : () -> ()
    %cst_45 = arith.constant dense<0.000000e+00> : vector<2x8x8xf32>
    %111 = tpu.matmul %110, %97, %cst_45 {dimension_numbers = #tpu.dot_dimension_numbers<[2], [1], [1], [2], [0, 0, 0, 1, 1, 2], [0], [0]>} : vector<2x8x8xbf16>, vector<2x8x8xbf16>, vector<2x8x8xf32> -> vector<2x8x8xf32>
    "tpu.trace_stop"() : () -> ()
    %112 = tpu.concatenate %60, %77, %94, %111 in 2 : vector<2x8x8xf32>, vector<2x8x8xf32>, vector<2x8x8xf32>, vector<2x8x8xf32> -> vector<2x8x32xf32>
    %113 = vector.shape_cast %112 : vector<2x8x32xf32> to vector<16x32xf32>
    %114 = arith.truncf %113 : vector<16x32xf32> to vector<16x32xbf16>
    %c0_46 = arith.constant 0 : index
    %c0_47 = arith.constant 0 : index
    %c0_48 = arith.constant 0 : index
    %115 = vector.load %arg12[%c0_46, %c0_47, %c0_48] : memref<1x32x32xbf16, #tpu.memory_space<vmem>>, vector<1x32x32xbf16>
    %116 = vector.shape_cast %115 : vector<1x32x32xbf16> to vector<32x32xbf16>
    %cst_49 = arith.constant dense<0.000000e+00> : vector<16x32xf32>
    %117 = tpu.matmul %114, %116, %cst_49 {dimension_numbers = #tpu.dot_dimension_numbers<[1], [0], [0], [1], [0, 0, 1, 1], [], []>} : vector<16x32xbf16>, vector<32x32xbf16>, vector<16x32xf32> -> vector<16x32xf32>
    %c0_50 = arith.constant 0 : index
    %c0_51 = arith.constant 0 : index
    %c0_52 = arith.constant 0 : index
    %118 = vector.load %arg13[%c0_50, %c0_51, %c0_52] : memref<1x1x32xf32, #tpu.memory_space<vmem>>, vector<1x1x32xf32>
    %119 = vector.shape_cast %118 : vector<1x1x32xf32> to vector<1x32xf32>
    %120 = vector.broadcast %119 : vector<1x32xf32> to vector<16x32xf32>
    %121 = arith.addf %117, %120 : vector<16x32xf32>
    %122 = arith.addf %121, %3 : vector<16x32xf32>
    %c0_53 = arith.constant 0 : index
    %c0_54 = arith.constant 0 : index
    %c0_55 = arith.constant 0 : index
    %123 = vector.load %arg14[%c0_53, %c0_54, %c0_55] : memref<1x1x32xf32, #tpu.memory_space<vmem>>, vector<1x1x32xf32>
    %124 = vector.shape_cast %123 : vector<1x1x32xf32> to vector<1x32xf32>
    %c0_56 = arith.constant 0 : index
    %c0_57 = arith.constant 0 : index
    %c0_58 = arith.constant 0 : index
    %125 = vector.load %arg15[%c0_56, %c0_57, %c0_58] : memref<1x1x32xf32, #tpu.memory_space<vmem>>, vector<1x1x32xf32>
    %126 = vector.shape_cast %125 : vector<1x1x32xf32> to vector<1x32xf32>
    %cst_59 = arith.constant dense<0.000000e+00> : vector<16xf32>
    %127 = vector.multi_reduction <add>, %122, %cst_59 [1] : vector<16x32xf32> to vector<16xf32>
    %128 = vector.shape_cast %127 : vector<16xf32> to vector<16x1xf32>
    %cst_60 = arith.constant 3.200000e+01 : f32
    %129 = vector.broadcast %cst_60 : f32 to vector<16x1xf32>
    %130 = arith.divf %128, %129 : vector<16x1xf32>
    %131 = arith.mulf %122, %122 : vector<16x32xf32>
    %cst_61 = arith.constant dense<0.000000e+00> : vector<16xf32>
    %132 = vector.multi_reduction <add>, %131, %cst_61 [1] : vector<16x32xf32> to vector<16xf32>
    %133 = vector.shape_cast %132 : vector<16xf32> to vector<16x1xf32>
    %cst_62 = arith.constant 3.200000e+01 : f32
    %134 = vector.broadcast %cst_62 : f32 to vector<16x1xf32>
    %135 = arith.divf %133, %134 : vector<16x1xf32>
    %136 = arith.mulf %130, %130 : vector<16x1xf32>
    %137 = arith.subf %135, %136 : vector<16x1xf32>
    %138 = vector.broadcast %130 : vector<16x1xf32> to vector<16x32xf32>
    %139 = arith.subf %122, %138 : vector<16x32xf32>
    %cst_63 = arith.constant 9.99999974E-6 : f32
    %140 = vector.broadcast %cst_63 : f32 to vector<16x1xf32>
    %141 = arith.addf %137, %140 : vector<16x1xf32>
    %142 = math.rsqrt %141 : vector<16x1xf32>
    %143 = vector.broadcast %142 : vector<16x1xf32> to vector<16x32xf32>
    %144 = arith.mulf %139, %143 : vector<16x32xf32>
    %145 = vector.broadcast %124 : vector<1x32xf32> to vector<16x32xf32>
    %146 = arith.mulf %144, %145 : vector<16x32xf32>
    %147 = vector.broadcast %126 : vector<1x32xf32> to vector<16x32xf32>
    %148 = arith.addf %146, %147 : vector<16x32xf32>
    %149 = vector.broadcast %4 : vector<16x1xf32> to vector<16x32xf32>
    %150 = arith.mulf %148, %149 : vector<16x32xf32>
    %151 = arith.truncf %150 : vector<16x32xf32> to vector<16x32xbf16>
    %c0_64 = arith.constant 0 : index
    %c0_65 = arith.constant 0 : index
    %152 = vector.load %arg3[%c0_64, %c0_65] : memref<16x32xbf16, #tpu.memory_space<vmem>>, vector<16x32xbf16>
    %c0_66 = arith.constant 0 : index
    %c0_67 = arith.constant 0 : index
    %c0_68 = arith.constant 0 : index
    %153 = vector.load %arg16[%c0_66, %c0_67, %c0_68] : memref<1x32x32xbf16, #tpu.memory_space<vmem>>, vector<1x32x32xbf16>
    %154 = vector.shape_cast %153 : vector<1x32x32xbf16> to vector<32x32xbf16>
    %cst_69 = arith.constant dense<0.000000e+00> : vector<16x32xf32>
    %155 = tpu.matmul %151, %154, %cst_69 {dimension_numbers = #tpu.dot_dimension_numbers<[1], [0], [0], [1], [0, 0, 1, 1], [], []>} : vector<16x32xbf16>, vector<32x32xbf16>, vector<16x32xf32> -> vector<16x32xf32>
    %c0_70 = arith.constant 0 : index
    %c0_71 = arith.constant 0 : index
    %c0_72 = arith.constant 0 : index
    %156 = vector.load %arg17[%c0_70, %c0_71, %c0_72] : memref<1x1x32xf32, #tpu.memory_space<vmem>>, vector<1x1x32xf32>
    %157 = vector.shape_cast %156 : vector<1x1x32xf32> to vector<1x32xf32>
    %158 = vector.broadcast %157 : vector<1x32xf32> to vector<16x32xf32>
    %159 = arith.addf %155, %158 : vector<16x32xf32>
    %c0_73 = arith.constant 0 : index
    %c0_74 = arith.constant 0 : index
    %c0_75 = arith.constant 0 : index
    %160 = vector.load %arg18[%c0_73, %c0_74, %c0_75] : memref<1x32x32xbf16, #tpu.memory_space<vmem>>, vector<1x32x32xbf16>
    %161 = vector.shape_cast %160 : vector<1x32x32xbf16> to vector<32x32xbf16>
    %cst_76 = arith.constant dense<0.000000e+00> : vector<16x32xf32>
    %162 = tpu.matmul %152, %161, %cst_76 {dimension_numbers = #tpu.dot_dimension_numbers<[1], [0], [0], [1], [0, 0, 1, 1], [], []>} : vector<16x32xbf16>, vector<32x32xbf16>, vector<16x32xf32> -> vector<16x32xf32>
    %c0_77 = arith.constant 0 : index
    %c0_78 = arith.constant 0 : index
    %c0_79 = arith.constant 0 : index
    %163 = vector.load %arg19[%c0_77, %c0_78, %c0_79] : memref<1x1x32xf32, #tpu.memory_space<vmem>>, vector<1x1x32xf32>
    %164 = vector.shape_cast %163 : vector<1x1x32xf32> to vector<1x32xf32>
    %165 = vector.broadcast %164 : vector<1x32xf32> to vector<16x32xf32>
    %166 = arith.addf %162, %165 : vector<16x32xf32>
    %c0_80 = arith.constant 0 : index
    %c0_81 = arith.constant 0 : index
    %c0_82 = arith.constant 0 : index
    %167 = vector.load %arg20[%c0_80, %c0_81, %c0_82] : memref<1x32x32xbf16, #tpu.memory_space<vmem>>, vector<1x32x32xbf16>
    %168 = vector.shape_cast %167 : vector<1x32x32xbf16> to vector<32x32xbf16>
    %cst_83 = arith.constant dense<0.000000e+00> : vector<16x32xf32>
    %169 = tpu.matmul %152, %168, %cst_83 {dimension_numbers = #tpu.dot_dimension_numbers<[1], [0], [0], [1], [0, 0, 1, 1], [], []>} : vector<16x32xbf16>, vector<32x32xbf16>, vector<16x32xf32> -> vector<16x32xf32>
    %c0_84 = arith.constant 0 : index
    %c0_85 = arith.constant 0 : index
    %c0_86 = arith.constant 0 : index
    %170 = vector.load %arg21[%c0_84, %c0_85, %c0_86] : memref<1x1x32xf32, #tpu.memory_space<vmem>>, vector<1x1x32xf32>
    %171 = vector.shape_cast %170 : vector<1x1x32xf32> to vector<1x32xf32>
    %172 = vector.broadcast %171 : vector<1x32xf32> to vector<16x32xf32>
    %173 = arith.addf %169, %172 : vector<16x32xf32>
    %174 = vector.shape_cast %159 : vector<16x32xf32> to vector<2x8x32xf32>
    %175 = arith.truncf %174 : vector<2x8x32xf32> to vector<2x8x32xbf16>
    %176 = vector.shape_cast %166 : vector<16x32xf32> to vector<2x8x32xf32>
    %177 = arith.truncf %176 : vector<2x8x32xf32> to vector<2x8x32xbf16>
    %178 = vector.shape_cast %173 : vector<16x32xf32> to vector<2x8x32xf32>
    %179 = arith.truncf %178 : vector<2x8x32xf32> to vector<2x8x32xbf16>
    %180 = vector.extract_strided_slice %175 {offsets = [0, 0, 0], sizes = [2, 8, 8], strides = [1, 1, 1]} : vector<2x8x32xbf16> to vector<2x8x8xbf16>
    %181 = vector.extract_strided_slice %177 {offsets = [0, 0, 0], sizes = [2, 8, 8], strides = [1, 1, 1]} : vector<2x8x32xbf16> to vector<2x8x8xbf16>
    %182 = vector.extract_strided_slice %179 {offsets = [0, 0, 0], sizes = [2, 8, 8], strides = [1, 1, 1]} : vector<2x8x32xbf16> to vector<2x8x8xbf16>
    "tpu.trace_start"() <{level = 10 : i32, message = "bqd,bkd->bqk"}> : () -> ()
    %cst_87 = arith.constant dense<0.000000e+00> : vector<2x8x8xf32>
    %183 = tpu.matmul %180, %181, %cst_87 {dimension_numbers = #tpu.dot_dimension_numbers<[2], [2], [1], [1], [0, 0, 0, 1, 1, 1], [0], [0]>} : vector<2x8x8xbf16>, vector<2x8x8xbf16>, vector<2x8x8xf32> -> vector<2x8x8xf32>
    "tpu.trace_stop"() : () -> ()
    %cst_88 = arith.constant dense<0xFF800000> : vector<2x8xf32>
    %184 = vector.multi_reduction <maximumf>, %183, %cst_88 [2] : vector<2x8x8xf32> to vector<2x8xf32>
    %185 = vector.shape_cast %184 : vector<2x8xf32> to vector<2x8x1xf32>
    %186 = vector.broadcast %185 : vector<2x8x1xf32> to vector<2x8x8xf32>
    %187 = arith.subf %183, %186 : vector<2x8x8xf32>
    %188 = math.exp %187 : vector<2x8x8xf32>
    %cst_89 = arith.constant dense<0.000000e+00> : vector<2x8xf32>
    %189 = vector.multi_reduction <add>, %188, %cst_89 [2] : vector<2x8x8xf32> to vector<2x8xf32>
    %190 = vector.shape_cast %189 : vector<2x8xf32> to vector<2x8x1xf32>
    %191 = tpu.reciprocal %190 {approx = true} : vector<2x8x1xf32> -> vector<2x8x1xf32>
    %192 = vector.broadcast %191 : vector<2x8x1xf32> to vector<2x8x8xf32>
    %193 = arith.mulf %188, %192 : vector<2x8x8xf32>
    %194 = arith.truncf %193 : vector<2x8x8xf32> to vector<2x8x8xbf16>
    "tpu.trace_start"() <{level = 10 : i32, message = "bqk,bkd->bqd"}> : () -> ()
    %cst_90 = arith.constant dense<0.000000e+00> : vector<2x8x8xf32>
    %195 = tpu.matmul %194, %182, %cst_90 {dimension_numbers = #tpu.dot_dimension_numbers<[2], [1], [1], [2], [0, 0, 0, 1, 1, 2], [0], [0]>} : vector<2x8x8xbf16>, vector<2x8x8xbf16>, vector<2x8x8xf32> -> vector<2x8x8xf32>
    "tpu.trace_stop"() : () -> ()
    %196 = vector.extract_strided_slice %175 {offsets = [0, 0, 8], sizes = [2, 8, 8], strides = [1, 1, 1]} : vector<2x8x32xbf16> to vector<2x8x8xbf16>
    %197 = vector.extract_strided_slice %177 {offsets = [0, 0, 8], sizes = [2, 8, 8], strides = [1, 1, 1]} : vector<2x8x32xbf16> to vector<2x8x8xbf16>
    %198 = vector.extract_strided_slice %179 {offsets = [0, 0, 8], sizes = [2, 8, 8], strides = [1, 1, 1]} : vector<2x8x32xbf16> to vector<2x8x8xbf16>
    "tpu.trace_start"() <{level = 10 : i32, message = "bqd,bkd->bqk"}> : () -> ()
    %cst_91 = arith.constant dense<0.000000e+00> : vector<2x8x8xf32>
    %199 = tpu.matmul %196, %197, %cst_91 {dimension_numbers = #tpu.dot_dimension_numbers<[2], [2], [1], [1], [0, 0, 0, 1, 1, 1], [0], [0]>} : vector<2x8x8xbf16>, vector<2x8x8xbf16>, vector<2x8x8xf32> -> vector<2x8x8xf32>
    "tpu.trace_stop"() : () -> ()
    %cst_92 = arith.constant dense<0xFF800000> : vector<2x8xf32>
    %200 = vector.multi_reduction <maximumf>, %199, %cst_92 [2] : vector<2x8x8xf32> to vector<2x8xf32>
    %201 = vector.shape_cast %200 : vector<2x8xf32> to vector<2x8x1xf32>
    %202 = vector.broadcast %201 : vector<2x8x1xf32> to vector<2x8x8xf32>
    %203 = arith.subf %199, %202 : vector<2x8x8xf32>
    %204 = math.exp %203 : vector<2x8x8xf32>
    %cst_93 = arith.constant dense<0.000000e+00> : vector<2x8xf32>
    %205 = vector.multi_reduction <add>, %204, %cst_93 [2] : vector<2x8x8xf32> to vector<2x8xf32>
    %206 = vector.shape_cast %205 : vector<2x8xf32> to vector<2x8x1xf32>
    %207 = tpu.reciprocal %206 {approx = true} : vector<2x8x1xf32> -> vector<2x8x1xf32>
    %208 = vector.broadcast %207 : vector<2x8x1xf32> to vector<2x8x8xf32>
    %209 = arith.mulf %204, %208 : vector<2x8x8xf32>
    %210 = arith.truncf %209 : vector<2x8x8xf32> to vector<2x8x8xbf16>
    "tpu.trace_start"() <{level = 10 : i32, message = "bqk,bkd->bqd"}> : () -> ()
    %cst_94 = arith.constant dense<0.000000e+00> : vector<2x8x8xf32>
    %211 = tpu.matmul %210, %198, %cst_94 {dimension_numbers = #tpu.dot_dimension_numbers<[2], [1], [1], [2], [0, 0, 0, 1, 1, 2], [0], [0]>} : vector<2x8x8xbf16>, vector<2x8x8xbf16>, vector<2x8x8xf32> -> vector<2x8x8xf32>
    "tpu.trace_stop"() : () -> ()
    %212 = vector.extract_strided_slice %175 {offsets = [0, 0, 16], sizes = [2, 8, 8], strides = [1, 1, 1]} : vector<2x8x32xbf16> to vector<2x8x8xbf16>
    %213 = vector.extract_strided_slice %177 {offsets = [0, 0, 16], sizes = [2, 8, 8], strides = [1, 1, 1]} : vector<2x8x32xbf16> to vector<2x8x8xbf16>
    %214 = vector.extract_strided_slice %179 {offsets = [0, 0, 16], sizes = [2, 8, 8], strides = [1, 1, 1]} : vector<2x8x32xbf16> to vector<2x8x8xbf16>
    "tpu.trace_start"() <{level = 10 : i32, message = "bqd,bkd->bqk"}> : () -> ()
    %cst_95 = arith.constant dense<0.000000e+00> : vector<2x8x8xf32>
    %215 = tpu.matmul %212, %213, %cst_95 {dimension_numbers = #tpu.dot_dimension_numbers<[2], [2], [1], [1], [0, 0, 0, 1, 1, 1], [0], [0]>} : vector<2x8x8xbf16>, vector<2x8x8xbf16>, vector<2x8x8xf32> -> vector<2x8x8xf32>
    "tpu.trace_stop"() : () -> ()
    %cst_96 = arith.constant dense<0xFF800000> : vector<2x8xf32>
    %216 = vector.multi_reduction <maximumf>, %215, %cst_96 [2] : vector<2x8x8xf32> to vector<2x8xf32>
    %217 = vector.shape_cast %216 : vector<2x8xf32> to vector<2x8x1xf32>
    %218 = vector.broadcast %217 : vector<2x8x1xf32> to vector<2x8x8xf32>
    %219 = arith.subf %215, %218 : vector<2x8x8xf32>
    %220 = math.exp %219 : vector<2x8x8xf32>
    %cst_97 = arith.constant dense<0.000000e+00> : vector<2x8xf32>
    %221 = vector.multi_reduction <add>, %220, %cst_97 [2] : vector<2x8x8xf32> to vector<2x8xf32>
    %222 = vector.shape_cast %221 : vector<2x8xf32> to vector<2x8x1xf32>
    %223 = tpu.reciprocal %222 {approx = true} : vector<2x8x1xf32> -> vector<2x8x1xf32>
    %224 = vector.broadcast %223 : vector<2x8x1xf32> to vector<2x8x8xf32>
    %225 = arith.mulf %220, %224 : vector<2x8x8xf32>
    %226 = arith.truncf %225 : vector<2x8x8xf32> to vector<2x8x8xbf16>
    "tpu.trace_start"() <{level = 10 : i32, message = "bqk,bkd->bqd"}> : () -> ()
    %cst_98 = arith.constant dense<0.000000e+00> : vector<2x8x8xf32>
    %227 = tpu.matmul %226, %214, %cst_98 {dimension_numbers = #tpu.dot_dimension_numbers<[2], [1], [1], [2], [0, 0, 0, 1, 1, 2], [0], [0]>} : vector<2x8x8xbf16>, vector<2x8x8xbf16>, vector<2x8x8xf32> -> vector<2x8x8xf32>
    "tpu.trace_stop"() : () -> ()
    %228 = vector.extract_strided_slice %175 {offsets = [0, 0, 24], sizes = [2, 8, 8], strides = [1, 1, 1]} : vector<2x8x32xbf16> to vector<2x8x8xbf16>
    %229 = vector.extract_strided_slice %177 {offsets = [0, 0, 24], sizes = [2, 8, 8], strides = [1, 1, 1]} : vector<2x8x32xbf16> to vector<2x8x8xbf16>
    %230 = vector.extract_strided_slice %179 {offsets = [0, 0, 24], sizes = [2, 8, 8], strides = [1, 1, 1]} : vector<2x8x32xbf16> to vector<2x8x8xbf16>
    "tpu.trace_start"() <{level = 10 : i32, message = "bqd,bkd->bqk"}> : () -> ()
    %cst_99 = arith.constant dense<0.000000e+00> : vector<2x8x8xf32>
    %231 = tpu.matmul %228, %229, %cst_99 {dimension_numbers = #tpu.dot_dimension_numbers<[2], [2], [1], [1], [0, 0, 0, 1, 1, 1], [0], [0]>} : vector<2x8x8xbf16>, vector<2x8x8xbf16>, vector<2x8x8xf32> -> vector<2x8x8xf32>
    "tpu.trace_stop"() : () -> ()
    %cst_100 = arith.constant dense<0xFF800000> : vector<2x8xf32>
    %232 = vector.multi_reduction <maximumf>, %231, %cst_100 [2] : vector<2x8x8xf32> to vector<2x8xf32>
    %233 = vector.shape_cast %232 : vector<2x8xf32> to vector<2x8x1xf32>
    %234 = vector.broadcast %233 : vector<2x8x1xf32> to vector<2x8x8xf32>
    %235 = arith.subf %231, %234 : vector<2x8x8xf32>
    %236 = math.exp %235 : vector<2x8x8xf32>
    %cst_101 = arith.constant dense<0.000000e+00> : vector<2x8xf32>
    %237 = vector.multi_reduction <add>, %236, %cst_101 [2] : vector<2x8x8xf32> to vector<2x8xf32>
    %238 = vector.shape_cast %237 : vector<2x8xf32> to vector<2x8x1xf32>
    %239 = tpu.reciprocal %238 {approx = true} : vector<2x8x1xf32> -> vector<2x8x1xf32>
    %240 = vector.broadcast %239 : vector<2x8x1xf32> to vector<2x8x8xf32>
    %241 = arith.mulf %236, %240 : vector<2x8x8xf32>
    %242 = arith.truncf %241 : vector<2x8x8xf32> to vector<2x8x8xbf16>
    "tpu.trace_start"() <{level = 10 : i32, message = "bqk,bkd->bqd"}> : () -> ()
    %cst_102 = arith.constant dense<0.000000e+00> : vector<2x8x8xf32>
    %243 = tpu.matmul %242, %230, %cst_102 {dimension_numbers = #tpu.dot_dimension_numbers<[2], [1], [1], [2], [0, 0, 0, 1, 1, 2], [0], [0]>} : vector<2x8x8xbf16>, vector<2x8x8xbf16>, vector<2x8x8xf32> -> vector<2x8x8xf32>
    "tpu.trace_stop"() : () -> ()
    %244 = tpu.concatenate %195, %211, %227, %243 in 2 : vector<2x8x8xf32>, vector<2x8x8xf32>, vector<2x8x8xf32>, vector<2x8x8xf32> -> vector<2x8x32xf32>
    %245 = vector.shape_cast %244 : vector<2x8x32xf32> to vector<16x32xf32>
    %246 = arith.truncf %245 : vector<16x32xf32> to vector<16x32xbf16>
    %c0_103 = arith.constant 0 : index
    %c0_104 = arith.constant 0 : index
    %c0_105 = arith.constant 0 : index
    %247 = vector.load %arg22[%c0_103, %c0_104, %c0_105] : memref<1x32x32xbf16, #tpu.memory_space<vmem>>, vector<1x32x32xbf16>
    %248 = vector.shape_cast %247 : vector<1x32x32xbf16> to vector<32x32xbf16>
    %cst_106 = arith.constant dense<0.000000e+00> : vector<16x32xf32>
    %249 = tpu.matmul %246, %248, %cst_106 {dimension_numbers = #tpu.dot_dimension_numbers<[1], [0], [0], [1], [0, 0, 1, 1], [], []>} : vector<16x32xbf16>, vector<32x32xbf16>, vector<16x32xf32> -> vector<16x32xf32>
    %c0_107 = arith.constant 0 : index
    %c0_108 = arith.constant 0 : index
    %c0_109 = arith.constant 0 : index
    %250 = vector.load %arg23[%c0_107, %c0_108, %c0_109] : memref<1x1x32xf32, #tpu.memory_space<vmem>>, vector<1x1x32xf32>
    %251 = vector.shape_cast %250 : vector<1x1x32xf32> to vector<1x32xf32>
    %252 = vector.broadcast %251 : vector<1x32xf32> to vector<16x32xf32>
    %253 = arith.addf %249, %252 : vector<16x32xf32>
    %254 = arith.addf %253, %150 : vector<16x32xf32>
    %c0_110 = arith.constant 0 : index
    %c0_111 = arith.constant 0 : index
    %c0_112 = arith.constant 0 : index
    %255 = vector.load %arg24[%c0_110, %c0_111, %c0_112] : memref<1x1x32xf32, #tpu.memory_space<vmem>>, vector<1x1x32xf32>
    %256 = vector.shape_cast %255 : vector<1x1x32xf32> to vector<1x32xf32>
    %c0_113 = arith.constant 0 : index
    %c0_114 = arith.constant 0 : index
    %c0_115 = arith.constant 0 : index
    %257 = vector.load %arg25[%c0_113, %c0_114, %c0_115] : memref<1x1x32xf32, #tpu.memory_space<vmem>>, vector<1x1x32xf32>
    %258 = vector.shape_cast %257 : vector<1x1x32xf32> to vector<1x32xf32>
    %cst_116 = arith.constant dense<0.000000e+00> : vector<16xf32>
    %259 = vector.multi_reduction <add>, %254, %cst_116 [1] : vector<16x32xf32> to vector<16xf32>
    %260 = vector.shape_cast %259 : vector<16xf32> to vector<16x1xf32>
    %cst_117 = arith.constant 3.200000e+01 : f32
    %261 = vector.broadcast %cst_117 : f32 to vector<16x1xf32>
    %262 = arith.divf %260, %261 : vector<16x1xf32>
    %263 = arith.mulf %254, %254 : vector<16x32xf32>
    %cst_118 = arith.constant dense<0.000000e+00> : vector<16xf32>
    %264 = vector.multi_reduction <add>, %263, %cst_118 [1] : vector<16x32xf32> to vector<16xf32>
    %265 = vector.shape_cast %264 : vector<16xf32> to vector<16x1xf32>
    %cst_119 = arith.constant 3.200000e+01 : f32
    %266 = vector.broadcast %cst_119 : f32 to vector<16x1xf32>
    %267 = arith.divf %265, %266 : vector<16x1xf32>
    %268 = arith.mulf %262, %262 : vector<16x1xf32>
    %269 = arith.subf %267, %268 : vector<16x1xf32>
    %270 = vector.broadcast %262 : vector<16x1xf32> to vector<16x32xf32>
    %271 = arith.subf %254, %270 : vector<16x32xf32>
    %cst_120 = arith.constant 9.99999974E-6 : f32
    %272 = vector.broadcast %cst_120 : f32 to vector<16x1xf32>
    %273 = arith.addf %269, %272 : vector<16x1xf32>
    %274 = math.rsqrt %273 : vector<16x1xf32>
    %275 = vector.broadcast %274 : vector<16x1xf32> to vector<16x32xf32>
    %276 = arith.mulf %271, %275 : vector<16x32xf32>
    %277 = vector.broadcast %256 : vector<1x32xf32> to vector<16x32xf32>
    %278 = arith.mulf %276, %277 : vector<16x32xf32>
    %279 = vector.broadcast %258 : vector<1x32xf32> to vector<16x32xf32>
    %280 = arith.addf %278, %279 : vector<16x32xf32>
    %281 = vector.broadcast %4 : vector<16x1xf32> to vector<16x32xf32>
    %282 = arith.mulf %280, %281 : vector<16x32xf32>
    %283 = arith.truncf %282 : vector<16x32xf32> to vector<16x32xbf16>
    %c0_121 = arith.constant 0 : index
    %c0_122 = arith.constant 0 : index
    %c0_123 = arith.constant 0 : index
    %284 = vector.load %arg26[%c0_121, %c0_122, %c0_123] : memref<1x32x64xbf16, #tpu.memory_space<vmem>>, vector<1x32x64xbf16>
    %285 = vector.shape_cast %284 : vector<1x32x64xbf16> to vector<32x64xbf16>
    %cst_124 = arith.constant dense<0.000000e+00> : vector<16x64xf32>
    %286 = tpu.matmul %283, %285, %cst_124 {dimension_numbers = #tpu.dot_dimension_numbers<[1], [0], [0], [1], [0, 0, 1, 1], [], []>} : vector<16x32xbf16>, vector<32x64xbf16>, vector<16x64xf32> -> vector<16x64xf32>
    %c0_125 = arith.constant 0 : index
    %c0_126 = arith.constant 0 : index
    %c0_127 = arith.constant 0 : index
    %287 = vector.load %arg27[%c0_125, %c0_126, %c0_127] : memref<1x1x64xf32, #tpu.memory_space<vmem>>, vector<1x1x64xf32>
    %288 = vector.shape_cast %287 : vector<1x1x64xf32> to vector<1x64xf32>
    %289 = vector.broadcast %288 : vector<1x64xf32> to vector<16x64xf32>
    %290 = arith.addf %286, %289 : vector<16x64xf32>
    %cst_128 = arith.constant 0.000000e+00 : f32
    %291 = vector.broadcast %cst_128 : f32 to vector<16x64xf32>
    %292 = arith.maximumf %290, %291 : vector<16x64xf32>
    %293 = arith.truncf %292 : vector<16x64xf32> to vector<16x64xbf16>
    %c0_129 = arith.constant 0 : index
    %c0_130 = arith.constant 0 : index
    %c0_131 = arith.constant 0 : index
    %294 = vector.load %arg28[%c0_129, %c0_130, %c0_131] : memref<1x64x32xbf16, #tpu.memory_space<vmem>>, vector<1x64x32xbf16>
    %295 = vector.shape_cast %294 : vector<1x64x32xbf16> to vector<64x32xbf16>
    %cst_132 = arith.constant dense<0.000000e+00> : vector<16x32xf32>
    %296 = tpu.matmul %293, %295, %cst_132 {dimension_numbers = #tpu.dot_dimension_numbers<[1], [0], [0], [1], [0, 0, 1, 1], [], []>} : vector<16x64xbf16>, vector<64x32xbf16>, vector<16x32xf32> -> vector<16x32xf32>
    %c0_133 = arith.constant 0 : index
    %c0_134 = arith.constant 0 : index
    %c0_135 = arith.constant 0 : index
    %297 = vector.load %arg29[%c0_133, %c0_134, %c0_135] : memref<1x1x32xf32, #tpu.memory_space<vmem>>, vector<1x1x32xf32>
    %298 = vector.shape_cast %297 : vector<1x1x32xf32> to vector<1x32xf32>
    %299 = vector.broadcast %298 : vector<1x32xf32> to vector<16x32xf32>
    %300 = arith.addf %296, %299 : vector<16x32xf32>
    %301 = arith.addf %300, %282 : vector<16x32xf32>
    %c0_136 = arith.constant 0 : index
    %c0_137 = arith.constant 0 : index
    %c0_138 = arith.constant 0 : index
    %302 = vector.load %arg30[%c0_136, %c0_137, %c0_138] : memref<1x1x32xf32, #tpu.memory_space<vmem>>, vector<1x1x32xf32>
    %303 = vector.shape_cast %302 : vector<1x1x32xf32> to vector<1x32xf32>
    %c0_139 = arith.constant 0 : index
    %c0_140 = arith.constant 0 : index
    %c0_141 = arith.constant 0 : index
    %304 = vector.load %arg31[%c0_139, %c0_140, %c0_141] : memref<1x1x32xf32, #tpu.memory_space<vmem>>, vector<1x1x32xf32>
    %305 = vector.shape_cast %304 : vector<1x1x32xf32> to vector<1x32xf32>
    %cst_142 = arith.constant dense<0.000000e+00> : vector<16xf32>
    %306 = vector.multi_reduction <add>, %301, %cst_142 [1] : vector<16x32xf32> to vector<16xf32>
    %307 = vector.shape_cast %306 : vector<16xf32> to vector<16x1xf32>
    %cst_143 = arith.constant 3.200000e+01 : f32
    %308 = vector.broadcast %cst_143 : f32 to vector<16x1xf32>
    %309 = arith.divf %307, %308 : vector<16x1xf32>
    %310 = arith.mulf %301, %301 : vector<16x32xf32>
    %cst_144 = arith.constant dense<0.000000e+00> : vector<16xf32>
    %311 = vector.multi_reduction <add>, %310, %cst_144 [1] : vector<16x32xf32> to vector<16xf32>
    %312 = vector.shape_cast %311 : vector<16xf32> to vector<16x1xf32>
    %cst_145 = arith.constant 3.200000e+01 : f32
    %313 = vector.broadcast %cst_145 : f32 to vector<16x1xf32>
    %314 = arith.divf %312, %313 : vector<16x1xf32>
    %315 = arith.mulf %309, %309 : vector<16x1xf32>
    %316 = arith.subf %314, %315 : vector<16x1xf32>
    %317 = vector.broadcast %309 : vector<16x1xf32> to vector<16x32xf32>
    %318 = arith.subf %301, %317 : vector<16x32xf32>
    %cst_146 = arith.constant 9.99999974E-6 : f32
    %319 = vector.broadcast %cst_146 : f32 to vector<16x1xf32>
    %320 = arith.addf %316, %319 : vector<16x1xf32>
    %321 = math.rsqrt %320 : vector<16x1xf32>
    %322 = vector.broadcast %321 : vector<16x1xf32> to vector<16x32xf32>
    %323 = arith.mulf %318, %322 : vector<16x32xf32>
    %324 = vector.broadcast %303 : vector<1x32xf32> to vector<16x32xf32>
    %325 = arith.mulf %323, %324 : vector<16x32xf32>
    %326 = vector.broadcast %305 : vector<1x32xf32> to vector<16x32xf32>
    %327 = arith.addf %325, %326 : vector<16x32xf32>
    %328 = vector.broadcast %4 : vector<16x1xf32> to vector<16x32xf32>
    %329 = arith.mulf %327, %328 : vector<16x32xf32>
    %c0_147 = arith.constant 0 : index
    %c0_148 = arith.constant 0 : index
    %330 = vector.load %arg33[%c0_147, %c0_148] : memref<16x32xf32, #tpu.memory_space<vmem>>, vector<16x32xf32>
    tpu.vector_store %arg33[%c0_147, %c0_148], %329 {strides = array<i32>} : memref<16x32xf32, #tpu.memory_space<vmem>>, vector<16x32xf32>,
    %c1_i32 = arith.constant 1 : i32
    %331 = arith.cmpi eq, %arg1, %c1_i32 : i32
    %332 = arith.extui %331 : i1 to i32
    %c0_i32_149 = arith.constant 0 : i32
    %333 = arith.cmpi ne, %332, %c0_i32_149 : i32
    scf.if %333 {
      %c0_150 = arith.constant 0 : index
      %c0_151 = arith.constant 0 : index
      %334 = vector.load %arg32[%c0_150, %c0_151] : memref<16x32xf32, #tpu.memory_space<vmem>>, vector<16x32xf32>
      tpu.vector_store %arg32[%c0_150, %c0_151], %329 {strides = array<i32>} : memref<16x32xf32, #tpu.memory_space<vmem>>, vector<16x32xf32>,
    } else {
    }
    return
  }
  func.func @transform_0(%arg0: i32, %arg1: i32) -> (i32, i32) {
    %c0_i32 = arith.constant 0 : i32
    %c0_i32_0 = arith.constant 0 : i32
    return %arg0, %c0_i32 : i32, i32
  }
  func.func @transform_1(%arg0: i32, %arg1: i32) -> (i32, i32) {
    %c0_i32 = arith.constant 0 : i32
    %c0_i32_0 = arith.constant 0 : i32
    return %arg0, %c0_i32 : i32, i32
  }
  func.func @transform_2(%arg0: i32, %arg1: i32) -> (i32, i32) {
    %c0_i32 = arith.constant 0 : i32
    %c0_i32_0 = arith.constant 0 : i32
    return %arg0, %c0_i32 : i32, i32
  }
  func.func @transform_3(%arg0: i32, %arg1: i32) -> (i32, i32, i32) {
    %c0_i32 = arith.constant 0 : i32
    %c0_i32_0 = arith.constant 0 : i32
    %c0_i32_1 = arith.constant 0 : i32
    return %arg0, %c0_i32, %c0_i32_0 : i32, i32, i32
  }
  func.func @transform_4(%arg0: i32, %arg1: i32) -> (i32, i32, i32) {
    %c0_i32 = arith.constant 0 : i32
    %c0_i32_0 = arith.constant 0 : i32
    %c0_i32_1 = arith.constant 0 : i32
    return %arg1, %c0_i32, %c0_i32_0 : i32, i32, i32
  }
  func.func @transform_5(%arg0: i32, %arg1: i32) -> (i32, i32, i32) {
    %c0_i32 = arith.constant 0 : i32
    %c0_i32_0 = arith.constant 0 : i32
    %c0_i32_1 = arith.constant 0 : i32
    return %arg1, %c0_i32, %c0_i32_0 : i32, i32, i32
  }
  func.func @transform_6(%arg0: i32, %arg1: i32) -> (i32, i32, i32) {
    %c0_i32 = arith.constant 0 : i32
    %c0_i32_0 = arith.constant 0 : i32
    %c0_i32_1 = arith.constant 0 : i32
    return %arg1, %c0_i32, %c0_i32_0 : i32, i32, i32
  }
  func.func @transform_7(%arg0: i32, %arg1: i32) -> (i32, i32, i32) {
    %c0_i32 = arith.constant 0 : i32
    %c0_i32_0 = arith.constant 0 : i32
    %c0_i32_1 = arith.constant 0 : i32
    return %arg1, %c0_i32, %c0_i32_0 : i32, i32, i32
  }
  func.func @transform_8(%arg0: i32, %arg1: i32) -> (i32, i32, i32) {
    %c0_i32 = arith.constant 0 : i32
    %c0_i32_0 = arith.constant 0 : i32
    %c0_i32_1 = arith.constant 0 : i32
    return %arg1, %c0_i32, %c0_i32_0 : i32, i32, i32
  }
  func.func @transform_9(%arg0: i32, %arg1: i32) -> (i32, i32, i32) {
    %c0_i32 = arith.constant 0 : i32
    %c0_i32_0 = arith.constant 0 : i32
    %c0_i32_1 = arith.constant 0 : i32
    return %arg1, %c0_i32, %c0_i32_0 : i32, i32, i32
  }
  func.func @transform_10(%arg0: i32, %arg1: i32) -> (i32, i32, i32) {
    %c0_i32 = arith.constant 0 : i32
    %c0_i32_0 = arith.constant 0 : i32
    %c0_i32_1 = arith.constant 0 : i32
    return %arg1, %c0_i32, %c0_i32_0 : i32, i32, i32
  }
  func.func @transform_11(%arg0: i32, %arg1: i32) -> (i32, i32, i32) {
    %c0_i32 = arith.constant 0 : i32
    %c0_i32_0 = arith.constant 0 : i32
    %c0_i32_1 = arith.constant 0 : i32
    return %arg1, %c0_i32, %c0_i32_0 : i32, i32, i32
  }
  func.func @transform_12(%arg0: i32, %arg1: i32) -> (i32, i32, i32) {
    %c0_i32 = arith.constant 0 : i32
    %c0_i32_0 = arith.constant 0 : i32
    %c0_i32_1 = arith.constant 0 : i32
    return %arg1, %c0_i32, %c0_i32_0 : i32, i32, i32
  }
  func.func @transform_13(%arg0: i32, %arg1: i32) -> (i32, i32, i32) {
    %c0_i32 = arith.constant 0 : i32
    %c0_i32_0 = arith.constant 0 : i32
    %c0_i32_1 = arith.constant 0 : i32
    return %arg1, %c0_i32, %c0_i32_0 : i32, i32, i32
  }
  func.func @transform_14(%arg0: i32, %arg1: i32) -> (i32, i32, i32) {
    %c0_i32 = arith.constant 0 : i32
    %c0_i32_0 = arith.constant 0 : i32
    %c0_i32_1 = arith.constant 0 : i32
    return %arg1, %c0_i32, %c0_i32_0 : i32, i32, i32
  }
  func.func @transform_15(%arg0: i32, %arg1: i32) -> (i32, i32, i32) {
    %c0_i32 = arith.constant 0 : i32
    %c0_i32_0 = arith.constant 0 : i32
    %c0_i32_1 = arith.constant 0 : i32
    return %arg1, %c0_i32, %c0_i32_0 : i32, i32, i32
  }
  func.func @transform_16(%arg0: i32, %arg1: i32) -> (i32, i32, i32) {
    %c0_i32 = arith.constant 0 : i32
    %c0_i32_0 = arith.constant 0 : i32
    %c0_i32_1 = arith.constant 0 : i32
    return %arg1, %c0_i32, %c0_i32_0 : i32, i32, i32
  }
  func.func @transform_17(%arg0: i32, %arg1: i32) -> (i32, i32, i32) {
    %c0_i32 = arith.constant 0 : i32
    %c0_i32_0 = arith.constant 0 : i32
    %c0_i32_1 = arith.constant 0 : i32
    return %arg1, %c0_i32, %c0_i32_0 : i32, i32, i32
  }
  func.func @transform_18(%arg0: i32, %arg1: i32) -> (i32, i32, i32) {
    %c0_i32 = arith.constant 0 : i32
    %c0_i32_0 = arith.constant 0 : i32
    %c0_i32_1 = arith.constant 0 : i32
    return %arg1, %c0_i32, %c0_i32_0 : i32, i32, i32
  }
  func.func @transform_19(%arg0: i32, %arg1: i32) -> (i32, i32, i32) {
    %c0_i32 = arith.constant 0 : i32
    %c0_i32_0 = arith.constant 0 : i32
    %c0_i32_1 = arith.constant 0 : i32
    return %arg1, %c0_i32, %c0_i32_0 : i32, i32, i32
  }
  func.func @transform_20(%arg0: i32, %arg1: i32) -> (i32, i32, i32) {
    %c0_i32 = arith.constant 0 : i32
    %c0_i32_0 = arith.constant 0 : i32
    %c0_i32_1 = arith.constant 0 : i32
    return %arg1, %c0_i32, %c0_i32_0 : i32, i32, i32
  }
  func.func @transform_21(%arg0: i32, %arg1: i32) -> (i32, i32, i32) {
    %c0_i32 = arith.constant 0 : i32
    %c0_i32_0 = arith.constant 0 : i32
    %c0_i32_1 = arith.constant 0 : i32
    return %arg1, %c0_i32, %c0_i32_0 : i32, i32, i32
  }
  func.func @transform_22(%arg0: i32, %arg1: i32) -> (i32, i32, i32) {
    %c0_i32 = arith.constant 0 : i32
    %c0_i32_0 = arith.constant 0 : i32
    %c0_i32_1 = arith.constant 0 : i32
    return %arg1, %c0_i32, %c0_i32_0 : i32, i32, i32
  }
  func.func @transform_23(%arg0: i32, %arg1: i32) -> (i32, i32, i32) {
    %c0_i32 = arith.constant 0 : i32
    %c0_i32_0 = arith.constant 0 : i32
    %c0_i32_1 = arith.constant 0 : i32
    return %arg1, %c0_i32, %c0_i32_0 : i32, i32, i32
  }
  func.func @transform_24(%arg0: i32, %arg1: i32) -> (i32, i32, i32) {
    %c0_i32 = arith.constant 0 : i32
    %c0_i32_0 = arith.constant 0 : i32
    %c0_i32_1 = arith.constant 0 : i32
    return %arg1, %c0_i32, %c0_i32_0 : i32, i32, i32
  }
  func.func @transform_25(%arg0: i32, %arg1: i32) -> (i32, i32, i32) {
    %c0_i32 = arith.constant 0 : i32
    %c0_i32_0 = arith.constant 0 : i32
    %c0_i32_1 = arith.constant 0 : i32
    return %arg1, %c0_i32, %c0_i32_0 : i32, i32, i32
  }
  func.func @transform_26(%arg0: i32, %arg1: i32) -> (i32, i32, i32) {
    %c0_i32 = arith.constant 0 : i32
    %c0_i32_0 = arith.constant 0 : i32
    %c0_i32_1 = arith.constant 0 : i32
    return %arg1, %c0_i32, %c0_i32_0 : i32, i32, i32
  }
  func.func @transform_27(%arg0: i32, %arg1: i32) -> (i32, i32, i32) {
    %c0_i32 = arith.constant 0 : i32
    %c0_i32_0 = arith.constant 0 : i32
    %c0_i32_1 = arith.constant 0 : i32
    return %arg1, %c0_i32, %c0_i32_0 : i32, i32, i32
  }
  func.func @transform_28(%arg0: i32, %arg1: i32) -> (i32, i32, i32) {
    %c0_i32 = arith.constant 0 : i32
    %c0_i32_0 = arith.constant 0 : i32
    %c0_i32_1 = arith.constant 0 : i32
    return %arg1, %c0_i32, %c0_i32_0 : i32, i32, i32
  }
  func.func @transform_29(%arg0: i32, %arg1: i32) -> (i32, i32, i32) {
    %c0_i32 = arith.constant 0 : i32
    %c0_i32_0 = arith.constant 0 : i32
    %c0_i32_1 = arith.constant 0 : i32
    return %arg1, %c0_i32, %c0_i32_0 : i32, i32, i32
  }
  func.func @transform_30(%arg0: i32, %arg1: i32) -> (i32, i32) {
    %c0_i32 = arith.constant 0 : i32
    %c0_i32_0 = arith.constant 0 : i32
    return %arg0, %c0_i32 : i32, i32
  }
}

</mosaic_0001>

<bundles_post_ra>
// kernel: tpu_custom_call.1
= control target key start
LH: loop header
LB: loop body
LE: loop exit
PB: predicated region body
PF: predicated region fallthrough
CT: control target
= control target key end

     0   :  { %s6357_s6 = smov 1   ;;  %s6358_s10 = smov 2   ;;  %s7692_s0 = inlined_call_operand.smem [shape: u32[31], index: -1, kind: input, shape index: {}] }
   0x1   :  { %s6429_s5 = sld [smem:[%s7692_s0]]   ;;  %s6359_s14 = smov 3  }
   0x2   :  { %s6434_s9 = sld [smem:[%s7692_s0 + %s6357_s6]]   ;;  %s6360_s18 = smov 4  }
   0x3   :  { %s6439_s13 = sld [smem:[%s7692_s0 + %s6358_s10]]   ;;  %s6361_s22 = smov 5  }
   0x4   :  { %s6444_s17 = sld [smem:[%s7692_s0 + %s6359_s14]]   ;;  %s6362_s26 = smov 6  }
   0x5   :  { %s6449_s21 = sld [smem:[%s7692_s0 + %s6360_s18]]   ;;  %s6363_s30 = smov 7  }
   0x6   :  { %s6454_s25 = sld [smem:[%s7692_s0 + %s6361_s22]]   ;;  %s6364_s4 = smov 8  }
   0x7   :  { %7730 = sst [smem:[#allocation41_spill]] %s6429_s5  ;;  %s6365_s10 = smov 9  }
   0x8   :  { %7731 = sst [smem:[#allocation42_spill]] %s6434_s9  ;;  %s6366_s15 = smov 10  }
   0x9   :  { %7732 = sst [smem:[#allocation43_spill]] %s6439_s13  ;;  %s6367_s20 = smov 11  }
   0xa   :  { %7733 = sst [smem:[#allocation44_spill]] %s6444_s17  ;;  %s6369_s1 = smov 13  }
   0xb   :  { %7734 = sst [smem:[#allocation45_spill]] %s6449_s21  ;;  %s6370_s7 = smov 14  }
   0xc   :  { %7735 = sst [smem:[#allocation46_spill]] %s6454_s25  ;;  %s6372_s22 = smov 16  }
   0xd   :  { %s6459_s29 = sld [smem:[%s7692_s0 + %s6362_s26]]   ;;  %s6368_s26 = smov 12  }
   0xe   :  { %s6464_s3 = sld [smem:[%s7692_s0 + %s6363_s30]]   ;;  %s6373_s28 = smov 17  }
   0xf   :  { %s6469_s8 = sld [smem:[%s7692_s0 + %s6364_s4]]  }
  0x10   :  { %s6474_s14 = sld [smem:[%s7692_s0 + %s6365_s10]]  }
  0x11   :  { %s6479_s19 = sld [smem:[%s7692_s0 + %s6366_s15]]   ;;  %s6371_s15 = smov 15  }
  0x12   :  { %s6484_s24 = sld [smem:[%s7692_s0 + %s6367_s20]]  }
  0x13   :  { %7736 = sst [smem:[#allocation47_spill]] %s6459_s29 }
  0x14   :  { %7737 = sst [smem:[#allocation48_spill]] %s6464_s3 }
  0x15   :  { %7738 = sst [smem:[#allocation49_spill]] %s6469_s8 }
  0x16   :  { %7739 = sst [smem:[#allocation50_spill]] %s6474_s14 }
  0x17   :  { %7740 = sst [smem:[#allocation51_spill]] %s6479_s19 }
  0x18   :  { %7741 = sst [smem:[#allocation52_spill]] %s6484_s24 }
  0x19   :  { %s6489_s30 = sld [smem:[%s7692_s0 + %s6368_s26]]  }
  0x1a   :  { %s6494_s6 = sld [smem:[%s7692_s0 + %s6369_s1]]  }
  0x1b   :  { %s6499_s12 = sld [smem:[%s7692_s0 + %s6370_s7]]   ;;  %s6374_s7 = smov 18  }
  0x1c   :  { %s6504_s20 = sld [smem:[%s7692_s0 + %s6371_s15]]   ;;  %s6375_s15 = smov 19  }
  0x1d   :  { %s6509_s27 = sld [smem:[%s7692_s0 + %s6372_s22]]   ;;  %s6376_s22 = smov 20  }
  0x1e   :  { %s6514_s4 = sld [smem:[%s7692_s0 + %s6373_s28]]   ;;  %s6377_s28 = smov 21  }
  0x1f   :  { %7742 = sst [smem:[#allocation53_spill]] %s6489_s30 }
  0x20   :  { %7743 = sst [smem:[#allocation54_spill]] %s6494_s6 }
  0x21   :  { %7744 = sst [smem:[#allocation55_spill]] %s6499_s12 }
  0x22   :  { %7745 = sst [smem:[#allocation56_spill]] %s6504_s20 }
  0x23   :  { %7746 = sst [smem:[#allocation57_spill]] %s6509_s27 }
  0x24   :  { %7747 = sst [smem:[#allocation58_spill]] %s6514_s4 }
  0x25   :  { %s6519_s13 = sld [smem:[%s7692_s0 + %s6374_s7]]   ;;  %s6378_s7 = smov 22  }
  0x26   :  { %s6524_s12 = sld [smem:[%s7692_s0 + %s6375_s15]]   ;;  %s6379_s15 = smov 23  }
  0x27   :  { %s6529_s8 = sld [smem:[%s7692_s0 + %s6376_s22]]   ;;  %s6380_s22 = smov 24  }
  0x28   :  { %s6534_s29 = sld [smem:[%s7692_s0 + %s6377_s28]]   ;;  %s6381_s28 = smov 25  }
  0x29   :  { %s6539_s21 = sld [smem:[%s7692_s0 + %s6378_s7]]   ;;  %s6382_s7 = smov 26  }
  0x2a   :  { %s6549_s4 = sld [smem:[%s7692_s0 + %s6380_s22]]   ;;  %s6384_s22 = smov 28  }
  0x2b   :  { %7748 = sst [smem:[#allocation59_spill]] %s6519_s13 }
  0x2c   :  { %7749 = sst [smem:[#allocation60_spill]] %s6524_s12 }
  0x2d   :  { %7750 = sst [smem:[#allocation61_spill]] %s6529_s8 }
  0x2e   :  { %7751 = sst [smem:[#allocation62_spill]] %s6534_s29 }
  0x2f   :  { %7752 = sst [smem:[#allocation63_spill]] %s6539_s21 }
  0x30   :  { %s6544_s12 = sld [smem:[%s7692_s0 + %s6379_s15]]   ;;  %s6383_s15 = smov 27  }
  0x31   :  { %7754 = sst [smem:[#allocation65_spill]] %s6549_s4 }
  0x32   :  { %s6554_s29 = sld [smem:[%s7692_s0 + %s6381_s28]]   ;;  %s6385_s28 = smov 29  }
  0x33   :  { %s6559_s21 = sld [smem:[%s7692_s0 + %s6382_s7]]   ;;  %s6386_s7 = smov 30  }
  0x34   :  { %s6569_s4 = sld [smem:[%s7692_s0 + %s6384_s22]]  }
  0x36   :  { %7753 = sst [smem:[#allocation64_spill]] %s6544_s12 }
  0x37   :  { %s6564_s12 = sld [smem:[%s7692_s0 + %s6383_s15]]  }
  0x38   :  { %7755 = sst [smem:[#allocation66_spill]] %s6554_s29 }
  0x39   :  { %7756 = sst [smem:[#allocation67_spill]] %s6559_s21 }
  0x3a   :  { %7758 = sst [smem:[#allocation69_spill]] %s6569_s4 }
  0x3b   :  { %s6574_s29 = sld [smem:[%s7692_s0 + %s6385_s28]]  }
  0x3c   :  { %s6579_s21 = sld [smem:[%s7692_s0 + %s6386_s7]]  }
  0x3d   :  { %7757 = sst [smem:[#allocation68_spill]] %s6564_s12 }
  0x41   :  { %7759 = sst [smem:[#allocation70_spill]] %s6574_s29 }
  0x42   :  { %7760 = sst [smem:[#allocation71_spill]] %s6579_s21 }
  0x43   :  { %66 = vsyncpa [#allocation4], 0 }
  0x44   :  { %67 = vsyncpa [#allocation7], 0 }
  0x45   :  { %68 = vsyncpa [#allocation10], 0 }
  0x46   :  { %70 = vsyncpa [#allocation10 + $0x1], 0 }
  0x47   :  { %71 = vsyncpa [#allocation13], 0 }
  0x48   :  { %73 = vsyncpa [#allocation13 + $0x1], 0 }
  0x49   :  { %74 = vsyncpa [#allocation16], 0 }
  0x4a   :  { %76 = vsyncpa [#allocation16 + $0x1], 0 }
  0x4b   :  { %77 = vsyncpa [#allocation19], 0 }
  0x4c   :  { %79 = vsyncpa [#allocation19 + $0x1], 0 }
  0x4d   :  { %80 = vsyncpa [#allocation22], 0 }
  0x4e   :  { %82 = vsyncpa [#allocation22 + $0x1], 0 }
  0x4f   :  { %83 = vsyncpa [#allocation25], 0 }
  0x50   :  { %85 = vsyncpa [#allocation25 + $0x1], 0 }
  0x51   :  { %86 = vsyncpa [#allocation28], 0 }
  0x52   :  { %88 = vsyncpa [#allocation28 + $0x1], 0 }
  0x53   :  { %89 = vsyncpa [#allocation5], 0  ;;  %s6581_s15 = smov 0   ;;  %s6583_s0 = smov 0  }
  0x54   :  { %s6585_s16 = smov 0   ;;  %s6587_s18 = smov 0  }
  0x55   :  { %s6589_s22 = smov 0   ;;  %s6591_s23 = smov 0  }
  0x56 LB: > { %s7761_s30 = sld [smem:[#allocation53_spill]]  ;;  %s7762_s20 = sld [smem:[#allocation56_spill]]  ;;  %s6339_s0 = sphi %s6583_s0, %s7846_s0   ;;  %s6335_s15 = sphi %s6581_s15, %s7845_s15   ;;  %s6355_s23 = sphi %s6591_s23, %s95_s23   ;;  %s6351_s22 = sphi %s6589_s22, %s7849_s22   ;;  %s6347_s18 = sphi %s6587_s18, %s7848_s18   ;;  %s6343_s16 = sphi %s6585_s16, %s7847_s16  }
  0x57   : > { %s7763_s19 = sld [smem:[#allocation51_spill]]  ;;  %s7764_s8 = sld [smem:[#allocation61_spill]] }
  0x58   : > { %s7765_s3 = sld [smem:[#allocation48_spill]]  ;;  %s7766_s13 = sld [smem:[#allocation59_spill]] }
  0x59   : > { %s7767_s27 = sld [smem:[#allocation57_spill]]  ;;  %s7768_s24 = sld [smem:[#allocation52_spill]] }
  0x5a   : > { %s7769_s6 = sld [smem:[#allocation54_spill]]  ;;  %s7770_s14 = sld [smem:[#allocation50_spill]] }
  0x5b   : > { %s7771_s25 = sld [smem:[#allocation46_spill]]  ;;  %s7772_s17 = sld [smem:[#allocation44_spill]] }
  0x5c   : > { %s7773_s5 = sld [smem:[#allocation41_spill]]  ;;  %s7774_s9 = sld [smem:[#allocation42_spill]] }
  0x5d   : > { %7775 = sst [smem:[#allocation72_spill]] %s6339_s0  ;;  %s6610_s26 = sadd.s32 4294967295, %s6355_s23  }
  0x5e   : > { %7776 = sst [smem:[#allocation73_spill]] %s6343_s16  ;;  %s104_s28 = sadd.s32 1, %s6351_s22 }
  0x5f   : > { %7777 = sst [smem:[#allocation74_spill]] %s6351_s22  ;;  %p105_p0 = scmp.ge.s32.totalorder %s104_s28, 2 }
  0x60   : > { %7778 = sst [smem:[#allocation75_spill]] %s6355_s23  ;;  %s244_s1 = sadd.s32 1, %s6343_s16 }
  0x61   : > { %7779 = sst [smem:[#allocation76_spill]] %s6610_s26  ;;  %p251_p1 = scmp.ne.s32.totalorder %s6343_s16, %s6339_s0 }
  0x62   : > { %p252_p2 = scmp.eq.s32.totalorder %s6355_s23, 0  ;;  %s7851_s28 = smov (%p105_p0, %s104_s28), 0 }
  0x63   : > { %7780 = sst [smem:[#allocation77_spill]] %s7851_s28  ;;  %p257_p4 = scmp.ne.s32.totalorder %s6339_s0, %s6335_s15 }
  0x64   : > { %p6619_p3 = por %p252_p2, %p251_p1  ;;  %s241_s7 = ssub.s32 %s6351_s22, %s7851_s28 }
  0x65   : > { %p7699_p5 = scmp.eq.s32.totalorder %s6610_s26, 0  ;;  %p242_p6 = scmp.eq.s32.totalorder %s241_s7, 0 }
  0x66   : > { %s7781_s2 = scalar_select %p6619_p3, 1, 0 }
  0x67   : > { %p4955_p7 = scmp.ge.s32.totalorder %s6355_s23, 1  ;;  %p6630_p8 = por %p7699_p5, %p257_p4 }
  0x68   : > { %p918_p9 = scmp.lt.s32.totalorder %s6355_s23, 3  ;;  %s6387_s15 = smov [#allocation6]  }
  0x69   : > { %s7782_s10 = scalar_select %p6630_p8, 1, 0 }
  0x6a   : > { %s6636_s11 = scalar_select %p242_p6, %s6343_s16, %s244_s1  }
  0x6b   : > { %p6638_p10 = pnand %p4955_p7, %p918_p9  ;;  %s949_s28 = sshll.u32 %s6387_s15, 4  ;;  %s950_s28 = int_to_ptr.vmem [resolvable:$true] %s949_s28 }
  0x6c   : > { %7783 = sst [smem:[#allocation78_spill]] %s6636_s11  ;;  %s6388_s29 = smov [#allocation3]  }
  0x6d   : > { %s7784_s21 = scalar_select %p6638_p10, 1, 0 }
  0x6e   : > { %p5520_p11 = pneg %p6638_p10  ;;  %s933_s4 = sshll.u32 %s6388_s29, 4  ;;  %s934_s4 = int_to_ptr.vmem [resolvable:$true] %s933_s4 }
  0x6f   : > { %s5767_s1 = scalar_lea.hbm %s7774_s9, 128 }
  0x70   : > { %p6646_p12 = pnand %p5520_p11, %p7699_p5  ;;  %p5768_p13 = scmp.ne.s32.totalorder %s7774_s9, %s5767_s1 }
  0x71   : > { %p5774_p4 = scmp.lt.u32.totalorder %s5767_s1, %s7774_s9 }
  0x72   : > { %p6654_p0 = pneg %p6646_p12 }
  0x74   : > { %p5770_p1 = pnand %p6654_p0, %p5768_p13 }
  0x76   : > { %p5771_p2 = pneg %p5770_p1 }
  0x78   : > { %p5776_p6 = pnand %p5774_p4, %p5771_p2 }
  0x7a   : > { %5779 = shalt.err (!%p5776_p6)
}
  0x7b   : > { %s5780_s15 = scalar_lea.vmem %s950_s28, 128  ;;  %p5788_p5 = scmp.lt.s32.totalorder %s950_s28, %s950_s28 }
  0x7c   : > { %p5781_p7 = scmp.ne.s32.totalorder %s950_s28, %s5780_s15  ;;  %p5789_p8 = scmp.lt.s32.totalorder %s5780_s15, %s5780_s15 }
  0x7e   : > { %p5783_p9 = pnand %p5781_p7, %p6654_p0  ;;  %p5790_p10 = por %p5789_p8, %p5788_p5 }
  0x80   : > { %p5784_p11 = pneg %p5783_p9 }
  0x82   : > { %p5791_p3 = pnand %p5790_p10, %p5784_p11 }
  0x84   : > { %5794 = shalt.err (!%p5791_p3)
}
  0x85   : > { %s6389_s29 = smov 64   ;;  %s6390_s1 = smov 4  }
  0x86   : > { %5526 = dma.hbm_to_vmem [thread:$0]  (!%p6646_p12), %s7774_s9, 128, %s950_s28, [#allocation7], %s6389_s29, %s6389_s29, %s6390_s1  }
  0x87   : > { %s5795_s12 = scalar_lea.hbm %s7773_s5, 128 }
  0x88   : > { %p5796_p13 = scmp.ne.s32.totalorder %s7773_s5, %s5795_s12  ;;  %p5802_p4 = scmp.lt.u32.totalorder %s5795_s12, %s7773_s5 }
  0x8a   : > { %p5798_p1 = pnand %p5796_p13, %p6654_p0 }
  0x8c   : > { %p5799_p2 = pneg %p5798_p1 }
  0x8e   : > { %p5804_p5 = pnand %p5802_p4, %p5799_p2 }
  0x90   : > { %5807 = shalt.err (!%p5804_p5)
}
  0x91   : > { %s5808_s15 = scalar_lea.vmem %s934_s4, 128  ;;  %p5816_p6 = scmp.lt.s32.totalorder %s934_s4, %s934_s4 }
  0x92   : > { %p5809_p3 = scmp.ne.s32.totalorder %s934_s4, %s5808_s15  ;;  %p5817_p7 = scmp.lt.s32.totalorder %s5808_s15, %s5808_s15 }
  0x94   : > { %p5811_p8 = pnand %p5809_p3, %p6654_p0  ;;  %p5818_p9 = por %p5817_p7, %p5816_p6 }
  0x96   : > { %p5812_p10 = pneg %p5811_p8 }
  0x98   : > { %p5819_p11 = pnand %p5818_p9, %p5812_p10 }
  0x9a   : > { %5822 = shalt.err (!%p5819_p11)
}
  0x9b   : > { %5523 = dma.hbm_to_vmem [thread:$0]  (!%p6646_p12), %s7773_s5, 128, %s934_s4, [#allocation4], %s6389_s29, %s6389_s29, %s6390_s1  }
  0x9c   : > { %s6391_s12 = smov [#allocation8]   ;;  %s5823_s9 = scalar_lea.hbm %s7772_s17, 32 }
  0x9d   : > { %s974_s28 = sshll.u32 %s6391_s12, 4  ;;  %p5824_p13 = scmp.ne.s32.totalorder %s7772_s17, %s5823_s9  ;;  %s975_s28 = int_to_ptr.vmem [resolvable:$true] %s974_s28 }
  0x9e   : > { %p5830_p4 = scmp.lt.u32.totalorder %s5823_s9, %s7772_s17 }
  0x9f   : > { %p5826_p1 = pnand %p5824_p13, %p6654_p0 }
  0xa1   : > { %p5827_p2 = pneg %p5826_p1 }
  0xa3   : > { %p5832_p5 = pnand %p5830_p4, %p5827_p2 }
  0xa5   : > { %5835 = shalt.err (!%p5832_p5)
}
  0xa6   : > { %s5836_s15 = scalar_lea.vmem %s975_s28, 32  ;;  %p5844_p6 = scmp.lt.s32.totalorder %s975_s28, %s975_s28 }
  0xa7   : > { %p5837_p3 = scmp.ne.s32.totalorder %s975_s28, %s5836_s15  ;;  %p5845_p7 = scmp.lt.s32.totalorder %s5836_s15, %s5836_s15 }
  0xa9   : > { %p5839_p8 = pnand %p5837_p3, %p6654_p0  ;;  %p5846_p9 = por %p5845_p7, %p5844_p6 }
  0xab   : > { %p5840_p10 = pneg %p5839_p8 }
  0xad   : > { %p5847_p11 = pnand %p5846_p9, %p5840_p10 }
  0xaf   : > { %5850 = shalt.err (!%p5847_p11)
}
  0xb0   : > { %s6392_s4 = smov 16   ;;  %s6393_s29 = smov 1  }
  0xb1   : > { %5529 = dma.hbm_to_vmem [thread:$0]  (!%p6646_p12), %s7772_s17, 32, %s975_s28, [#allocation7], %s6392_s4, %s6392_s4, %s6393_s29  }
  0xb2   : > { %p4960_p13 = scmp.ge.s32.totalorder %s6355_s23, 2 }
  0xb3   : > { %s6688_s9 = sand.u32 (!%p4960_p13), 1, %s6355_s23   ;;  %s6691_s11 = sand.u32 (!%p4960_p13), 1, %s6343_s16  }
  0xb4   : > { %984 = sbr.rel (%p4960_p13) target bundleno = 516 (0x204), region = 32  ;;  %s6694_s1 = sshll.u32 (!%p4960_p13), %s6351_s22, 4 }
  0xb5   : > { %s999_s7 = scalar_lea.vmem (!%p4960_p13), [#allocation9], %s6691_s11  ;;  %s6699_s28 = scalar_lea.hbm (!%p4960_p13), %s7771_s25, %s6694_s1 }
  0xb6   : > { %s1006_s12 = sshll.u32 (!%p4960_p13), %s999_s7, 4  ;;  %s5851_s4 = scalar_lea.hbm (!%p4960_p13), %s6699_s28, 16  ;;  %s1007_s12 = int_to_ptr.vmem [resolvable:$true] %s1006_s12 }
  0xb7   : > { %p5852_p12 = scmp.ne.s32.totalorder (!%p4960_p13), %s6699_s28, %s5851_s4  ;;  %p7787_p0 = scmp.ne.s32.totalorder (!%p4960_p13), %s7781_s2, 0 }
  0xb8   : > { %s5855_s29 = scalar_lea.hbm (!%p4960_p13), %s7771_s25, 32  ;;  %p5856_p4 = scmp.lt.u32.totalorder (!%p4960_p13), %s6699_s28, %s7771_s25 }
  0xb9   : > { %p5853_p1 = pnand (!%p4960_p13), %p5852_p12, %p7787_p0  ;;  %p5857_p5 = scmp.lt.u32.totalorder (!%p4960_p13), %s5855_s29, %s5851_s4 }
  0xba   : > { %p5859_p8 = scmp.lt.u32.totalorder (!%p4960_p13), %s5851_s4, %s6699_s28 }
  0xbb   : > { %p5854_p2 = pneg %p5853_p1  ;;  %p5858_p3 = por %p5857_p5, %p5856_p4 }
  0xbd   : > { %p5860_p10 = por %p5859_p8, %p5858_p3 }
  0xbf   : > { %p5861_p6 = pnand %p5860_p10, %p5854_p2 }
  0xc1   : > { %5864 = shalt.err (!%p5861_p6)
}
  0xc2   : > { %s5865_s7 = scalar_lea.vmem %s1007_s12, 16  ;;  %s6394_s15 = smov [#allocation9]  }
  0xc3   : > { %p5866_p7 = scmp.ne.s32.totalorder %s1007_s12, %s5865_s7  ;;  %s5869_s5 = sshll.u32 %s6394_s15, 4  ;;  %s5870_s5 = int_to_ptr.vmem [resolvable:$false] %s5869_s5 }
  0xc4   : > { %s5871_s17 = scalar_lea.vmem %s5870_s5, 32  ;;  %p5872_p13 = scmp.lt.s32.totalorder %s1007_s12, %s5870_s5 }
  0xc5   : > { %p5867_p9 = pnand %p5866_p7, %p7787_p0  ;;  %p5873_p12 = scmp.lt.s32.totalorder %s5871_s17, %s5865_s7 }
  0xc7   : > { %p5868_p11 = pneg %p5867_p9  ;;  %p5874_p1 = por %p5873_p12, %p5872_p13 }
  0xc9   : > { %p5875_p4 = pnand %p5874_p1, %p5868_p11 }
  0xcb   : > { %5878 = shalt.err (!%p5875_p4)
}
  0xcc   : > { %s7788_s4 = scalar_lea.sflag [#allocation10], %s6688_s9  ;;  %s6719_s15 = scalar_lea.hbm %s7770_s14, %s6694_s1 }
  0xcd   : > { %5482 = dma.hbm_to_vmem [thread:$0]  (%p7787_p0), %s6699_s28, 16, %s1007_s12, %s7788_s4  }
  0xce   : > { %s1049_s5 = scalar_lea.vmem [#allocation12], %s6691_s11  ;;  %s7707_s29 = scalar_lea.sflag [#allocation13], %s6688_s9 }
  0xcf   : > { %s1056_s17 = sshll.u32 %s1049_s5, 4  ;;  %s5879_s7 = scalar_lea.hbm %s6719_s15, 16  ;;  %s1057_s17 = int_to_ptr.vmem [resolvable:$true] %s1056_s17 }
  0xd0   : > { %p5880_p2 = scmp.ne.s32.totalorder %s6719_s15, %s5879_s7  ;;  %s5883_s25 = scalar_lea.hbm %s7770_s14, 32 }
  0xd1   : > { %p5884_p8 = scmp.lt.u32.totalorder %s6719_s15, %s7770_s14  ;;  %p5885_p10 = scmp.lt.u32.totalorder %s5883_s25, %s5879_s7 }
  0xd2   : > { %p5881_p5 = pnand %p5880_p2, %p7787_p0  ;;  %p5887_p7 = scmp.lt.u32.totalorder %s5879_s7, %s6719_s15 }
  0xd3   : > { %p5886_p6 = por %p5885_p10, %p5884_p8 }
  0xd4   : > { %p5882_p3 = pneg %p5881_p5 }
  0xd5   : > { %p5888_p9 = por %p5887_p7, %p5886_p6 }
  0xd7   : > { %p5889_p11 = pnand %p5888_p9, %p5882_p3 }
  0xd9   : > { %5892 = shalt.err (!%p5889_p11)
}
  0xda   : > { %s5893_s12 = scalar_lea.vmem %s1057_s17, 16  ;;  %s6395_s28 = smov [#allocation12]  }
  0xdb   : > { %p5894_p13 = scmp.ne.s32.totalorder %s1057_s17, %s5893_s12  ;;  %s5897_s4 = sshll.u32 %s6395_s28, 4  ;;  %s5898_s4 = int_to_ptr.vmem [resolvable:$false] %s5897_s4 }
  0xdc   : > { %s5899_s5 = scalar_lea.vmem %s5898_s4, 32  ;;  %p5900_p4 = scmp.lt.s32.totalorder %s1057_s17, %s5898_s4 }
  0xdd   : > { %p5895_p12 = pnand %p5894_p13, %p7787_p0  ;;  %p5901_p2 = scmp.lt.s32.totalorder %s5899_s5, %s5893_s12 }
  0xdf   : > { %p5896_p1 = pneg %p5895_p12  ;;  %p5902_p5 = por %p5901_p2, %p5900_p4 }
  0xe1   : > { %p5903_p8 = pnand %p5902_p5, %p5896_p1 }
  0xe3   : > { %5906 = shalt.err (!%p5903_p8)
}
  0xe4   : > { %5484 = dma.hbm_to_vmem [thread:$0]  (%p7787_p0), %s6719_s15, 16, %s1057_s17, %s7707_s29  }
  0xe5   : > { %s6740_s25 = scalar_lea.hbm %s7768_s24, %s6694_s1  ;;  %s1087_s7 = scalar_lea.vmem [#allocation15], %s6691_s11 }
  0xe6   : > { %s1094_s12 = sshll.u32 %s1087_s7, 4  ;;  %s7709_s28 = scalar_lea.sflag [#allocation16], %s6688_s9  ;;  %s1095_s12 = int_to_ptr.vmem [resolvable:$true] %s1094_s12 }
  0xe7   : > { %s5907_s4 = scalar_lea.hbm %s6740_s25, 16  ;;  %s5911_s5 = scalar_lea.hbm %s7768_s24, 32 }
  0xe8   : > { %p5908_p3 = scmp.ne.s32.totalorder %s6740_s25, %s5907_s4  ;;  %p5912_p7 = scmp.lt.u32.totalorder %s6740_s25, %s7768_s24 }
  0xe9   : > { %p5913_p9 = scmp.lt.u32.totalorder %s5911_s5, %s5907_s4  ;;  %p5915_p13 = scmp.lt.u32.totalorder %s5907_s4, %s6740_s25 }
  0xea   : > { %p5909_p10 = pnand %p5908_p3, %p7787_p0 }
  0xeb   : > { %p5914_p11 = por %p5913_p9, %p5912_p7 }
  0xec   : > { %p5910_p6 = pneg %p5909_p10 }
  0xed   : > { %p5916_p12 = por %p5915_p13, %p5914_p11 }
  0xef   : > { %p5917_p1 = pnand %p5916_p12, %p5910_p6 }
  0xf1   : > { %5920 = shalt.err (!%p5917_p1)
}
  0xf2   : > { %s5921_s15 = scalar_lea.vmem %s1095_s12, 16  ;;  %s6396_s17 = smov [#allocation15]  }
  0xf3   : > { %p5922_p4 = scmp.ne.s32.totalorder %s1095_s12, %s5921_s15  ;;  %s5925_s7 = sshll.u32 %s6396_s17, 4  ;;  %s5926_s7 = int_to_ptr.vmem [resolvable:$false] %s5925_s7 }
  0xf4   : > { %s5927_s29 = scalar_lea.vmem %s5926_s7, 32  ;;  %p5928_p8 = scmp.lt.s32.totalorder %s1095_s12, %s5926_s7 }
  0xf5   : > { %p5923_p2 = pnand %p5922_p4, %p7787_p0  ;;  %p5929_p3 = scmp.lt.s32.totalorder %s5927_s29, %s5921_s15 }
  0xf7   : > { %p5924_p5 = pneg %p5923_p2  ;;  %p5930_p10 = por %p5929_p3, %p5928_p8 }
  0xf9   : > { %p5931_p7 = pnand %p5930_p10, %p5924_p5 }
  0xfb   : > { %5934 = shalt.err (!%p5931_p7)
}
  0xfc   : > { %5486 = dma.hbm_to_vmem [thread:$0]  (%p7787_p0), %s6740_s25, 16, %s1095_s12, %s7709_s28  }
  0xfd   : > { %s6761_s4 = scalar_lea.hbm %s7769_s6, %s6694_s1  ;;  %s1121_s29 = scalar_lea.vmem [#allocation18], %s6691_s11 }
  0xfe   : > { %s1128_s5 = sshll.u32 %s1121_s29, 4  ;;  %s6767_s15 = sshll.u32 %s6691_s11, 4  ;;  %s6764_s5 = int_to_ptr.vmem [resolvable:$true] %s1128_s5 }
  0xff   : > { %s7710_s17 = scalar_lea.sflag [#allocation19], %s6688_s9  ;;  %s5935_s7 = scalar_lea.hbm %s6761_s4, 16 }
 0x100   : > { %p5936_p6 = scmp.ne.s32.totalorder %s6761_s4, %s5935_s7  ;;  %s5939_s14 = scalar_lea.hbm %s7769_s6, 32 }
 0x101   : > { %p5940_p13 = scmp.lt.u32.totalorder %s6761_s4, %s7769_s6  ;;  %p5941_p12 = scmp.lt.u32.totalorder %s5939_s14, %s5935_s7 }
 0x102   : > { %p5937_p9 = pnand %p5936_p6, %p7787_p0  ;;  %p5943_p4 = scmp.lt.u32.totalorder %s5935_s7, %s6761_s4 }
 0x103   : > { %p5942_p1 = por %p5941_p12, %p5940_p13 }
 0x104   : > { %p5938_p11 = pneg %p5937_p9 }
 0x105   : > { %p5944_p2 = por %p5943_p4, %p5942_p1 }
 0x107   : > { %p5945_p5 = pnand %p5944_p2, %p5938_p11 }
 0x109   : > { %5948 = shalt.err (!%p5945_p5)
}
 0x10a   : > { %s5949_s25 = scalar_lea.vmem %s6764_s5, 16  ;;  %s6397_s12 = smov [#allocation18]  }
 0x10b   : > { %p5950_p8 = scmp.ne.s32.totalorder %s6764_s5, %s5949_s25  ;;  %s5953_s29 = sshll.u32 %s6397_s12, 4  ;;  %s5954_s29 = int_to_ptr.vmem [resolvable:$false] %s5953_s29 }
 0x10c   : > { %s5955_s28 = scalar_lea.vmem %s5954_s29, 32  ;;  %p5956_p7 = scmp.lt.s32.totalorder %s6764_s5, %s5954_s29 }
 0x10d   : > { %p5951_p3 = pnand %p5950_p8, %p7787_p0  ;;  %p5957_p6 = scmp.lt.s32.totalorder %s5955_s28, %s5949_s25 }
 0x10f   : > { %p5952_p10 = pneg %p5951_p3  ;;  %p5958_p9 = por %p5957_p6, %p5956_p7 }
 0x111   : > { %p5959_p13 = pnand %p5958_p9, %p5952_p10 }
 0x113   : > { %5962 = shalt.err (!%p5959_p13)
}
 0x114   : > { %5488 = dma.hbm_to_vmem [thread:$0]  (%p7787_p0), %s6761_s4, 16, %s6764_s5, %s7710_s17  }
 0x115   : > { %s6790_s14 = sshll.u32 %s6351_s22, 8  ;;  %s1164_s7 = scalar_lea.vmem [#allocation21], %s6767_s15 }
 0x116   : > { %s6794_s28 = scalar_lea.hbm %s7767_s27, %s6790_s14  ;;  %s1171_s25 = sshll.u32 %s1164_s7, 4  ;;  %s6797_s25 = int_to_ptr.vmem [resolvable:$true] %s1171_s25 }
 0x117   : > { %s5963_s29 = scalar_lea.hbm %s6794_s28, 256  ;;  %s5967_s4 = scalar_lea.hbm %s7767_s27, 512 }
 0x118   : > { %p5964_p11 = scmp.ne.s32.totalorder %s6794_s28, %s5963_s29  ;;  %p5968_p4 = scmp.lt.u32.totalorder %s6794_s28, %s7767_s27 }
 0x119   : > { %p5969_p2 = scmp.lt.u32.totalorder %s5967_s4, %s5963_s29  ;;  %p5971_p8 = scmp.lt.u32.totalorder %s5963_s29, %s6794_s28 }
 0x11a   : > { %p5965_p12 = pnand %p5964_p11, %p7787_p0 }
 0x11b   : > { %p5970_p5 = por %p5969_p2, %p5968_p4 }
 0x11c   : > { %p5966_p1 = pneg %p5965_p12 }
 0x11d   : > { %p5972_p3 = por %p5971_p8, %p5970_p5 }
 0x11f   : > { %p5973_p10 = pnand %p5972_p3, %p5966_p1 }
 0x121   : > { %5976 = shalt.err (!%p5973_p10)
}
 0x122   : > { %s5977_s5 = scalar_lea.vmem %s6797_s25, 256  ;;  %s6398_s7 = smov [#allocation21]  }
 0x123   : > { %p5978_p7 = scmp.ne.s32.totalorder %s6797_s25, %s5977_s5  ;;  %s5981_s17 = sshll.u32 %s6398_s7, 4  ;;  %s5982_s17 = int_to_ptr.vmem [resolvable:$false] %s5981_s17 }
 0x124   : > { %s5983_s12 = scalar_lea.vmem %s5982_s17, 512  ;;  %p5984_p13 = scmp.lt.s32.totalorder %s6797_s25, %s5982_s17 }
 0x125   : > { %p5979_p6 = pnand %p5978_p7, %p7787_p0  ;;  %p5985_p11 = scmp.lt.s32.totalorder %s5983_s12, %s5977_s5 }
 0x127   : > { %p5980_p9 = pneg %p5979_p6  ;;  %p5986_p12 = por %p5985_p11, %p5984_p13 }
 0x129   : > { %p5987_p4 = pnand %p5986_p12, %p5980_p9 }
 0x12b   : > { %5990 = shalt.err (!%p5987_p4)
}
 0x12c   : > { %s6399_s29 = smov 64   ;;  %s6400_s4 = smov 4  }
 0x12d   : > { %s7789_s17 = scalar_lea.sflag [#allocation22], %s6688_s9  ;;  %s6824_s12 = scalar_lea.hbm %s7766_s13, %s6790_s14 }
 0x12e   : > { %5490 = dma.hbm_to_vmem [thread:$0]  (%p7787_p0), %s6794_s28, 256, %s6797_s25, %s7789_s17, %s6399_s29, %s6399_s29, %s6400_s4  }
 0x12f   : > { %s1202_s5 = scalar_lea.vmem [#allocation24], %s6767_s15  ;;  %s7715_s6 = scalar_lea.sflag [#allocation25], %s6688_s9 }
 0x130   : > { %s1209_s7 = sshll.u32 %s1202_s5, 4  ;;  %s5991_s24 = scalar_lea.hbm %s6824_s12, 256  ;;  %s6827_s7 = int_to_ptr.vmem [resolvable:$true] %s1209_s7 }
 0x131   : > { %p5992_p1 = scmp.ne.s32.totalorder %s6824_s12, %s5991_s24  ;;  %s5995_s27 = scalar_lea.hbm %s7766_s13, 512 }
 0x132   : > { %p5996_p8 = scmp.lt.u32.totalorder %s6824_s12, %s7766_s13  ;;  %p5997_p3 = scmp.lt.u32.totalorder %s5995_s27, %s5991_s24 }
 0x133   : > { %p5993_p2 = pnand %p5992_p1, %p7787_p0  ;;  %p5999_p7 = scmp.lt.u32.totalorder %s5991_s24, %s6824_s12 }
 0x134   : > { %p5998_p10 = por %p5997_p3, %p5996_p8 }
 0x135   : > { %p5994_p5 = pneg %p5993_p2 }
 0x136   : > { %p6000_p6 = por %p5999_p7, %p5998_p10 }
 0x138   : > { %p6001_p9 = pnand %p6000_p6, %p5994_p5 }
 0x13a   : > { %6004 = shalt.err (!%p6001_p9)
}
 0x13b   : > { %s6005_s28 = scalar_lea.vmem %s6827_s7, 256  ;;  %s6401_s25 = smov [#allocation24]  }
 0x13c   : > { %p6006_p13 = scmp.ne.s32.totalorder %s6827_s7, %s6005_s28  ;;  %s6009_s17 = sshll.u32 %s6401_s25, 4  ;;  %s6010_s17 = int_to_ptr.vmem [resolvable:$false] %s6009_s17 }
 0x13d   : > { %s6011_s5 = scalar_lea.vmem %s6010_s17, 512  ;;  %p6012_p4 = scmp.lt.s32.totalorder %s6827_s7, %s6010_s17 }
 0x13e   : > { %p6007_p11 = pnand %p6006_p13, %p7787_p0  ;;  %p6013_p1 = scmp.lt.s32.totalorder %s6011_s5, %s6005_s28 }
 0x140   : > { %p6008_p12 = pneg %p6007_p11  ;;  %p6014_p2 = por %p6013_p1, %p6012_p4 }
 0x142   : > { %p6015_p8 = pnand %p6014_p2, %p6008_p12 }
 0x144   : > { %6018 = shalt.err (!%p6015_p8)
}
 0x145   : > { %5492 = dma.hbm_to_vmem [thread:$0]  (%p7787_p0), %s6824_s12, 256, %s6827_s7, %s7715_s6, %s6399_s29, %s6399_s29, %s6400_s4  }
 0x146   : > { %s6854_s24 = scalar_lea.hbm %s7764_s8, %s6790_s14  ;;  %s1240_s27 = scalar_lea.vmem [#allocation27], %s6767_s15 }
 0x147   : > { %s1247_s28 = sshll.u32 %s1240_s27, 4  ;;  %s6861_s25 = scalar_lea.hbm %s7765_s3, %s6694_s1  ;;  %s6857_s28 = int_to_ptr.vmem [resolvable:$true] %s1247_s28 }
 0x148   : > { %s1237_s17 = scalar_lea.sflag [#allocation28], %s6688_s9  ;;  %s6019_s5 = scalar_lea.hbm %s6854_s24, 256 }
 0x149   : > { %p6020_p5 = scmp.ne.s32.totalorder %s6854_s24, %s6019_s5  ;;  %s6023_s13 = scalar_lea.hbm %s7764_s8, 512 }
 0x14a   : > { %p6024_p7 = scmp.lt.u32.totalorder %s6854_s24, %s7764_s8  ;;  %p6025_p6 = scmp.lt.u32.totalorder %s6023_s13, %s6019_s5 }
 0x14b   : > { %p6021_p3 = pnand %p6020_p5, %p7787_p0  ;;  %p6027_p13 = scmp.lt.u32.totalorder %s6019_s5, %s6854_s24 }
 0x14c   : > { %p6026_p9 = por %p6025_p6, %p6024_p7 }
 0x14d   : > { %p6022_p10 = pneg %p6021_p3 }
 0x14e   : > { %p6028_p11 = por %p6027_p13, %p6026_p9 }
 0x150   : > { %p6029_p12 = pnand %p6028_p11, %p6022_p10 }
 0x152   : > { %6032 = shalt.err (!%p6029_p12)
}
 0x153   : > { %s6033_s12 = scalar_lea.vmem %s6857_s28, 256  ;;  %s6402_s7 = smov [#allocation27]  }
 0x154   : > { %p6034_p4 = scmp.ne.s32.totalorder %s6857_s28, %s6033_s12  ;;  %s6037_s27 = sshll.u32 %s6402_s7, 4  ;;  %s6038_s27 = int_to_ptr.vmem [resolvable:$false] %s6037_s27 }
 0x155   : > { %s6039_s6 = scalar_lea.vmem %s6038_s27, 512  ;;  %p6040_p8 = scmp.lt.s32.totalorder %s6857_s28, %s6038_s27 }
 0x156   : > { %p6035_p1 = pnand %p6034_p4, %p7787_p0  ;;  %p6041_p5 = scmp.lt.s32.totalorder %s6039_s6, %s6033_s12 }
 0x158   : > { %p6036_p2 = pneg %p6035_p1  ;;  %p6042_p3 = por %p6041_p5, %p6040_p8 }
 0x15a   : > { %p6043_p7 = pnand %p6042_p3, %p6036_p2 }
 0x15c   : > { %6046 = shalt.err (!%p6043_p7)
}
 0x15d   : > { %5494 = dma.hbm_to_vmem [thread:$0]  (%p7787_p0), %s6854_s24, 256, %s6857_s28, %s1237_s17, %s6399_s29, %s6399_s29, %s6400_s4  }
 0x15e   : > { %s1024_s13 = scalar_lea.vmem [#allocation11], %s6691_s11  ;;  %s6889_s5 = scalar_lea.hbm %s7763_s19, %s6790_s14 }
 0x15f   : > { %s1031_s6 = sshll.u32 %s1024_s13, 4  ;;  %s6047_s12 = scalar_lea.hbm %s6861_s25, 16  ;;  %s1032_s6 = int_to_ptr.vmem [resolvable:$true] %s1031_s6 }
 0x160   : > { %p6048_p10 = scmp.ne.s32.totalorder %s6861_s25, %s6047_s12  ;;  %s6051_s7 = scalar_lea.hbm %s7765_s3, 32 }
 0x161   : > { %p6052_p13 = scmp.lt.u32.totalorder %s6861_s25, %s7765_s3  ;;  %p6053_p11 = scmp.lt.u32.totalorder %s6051_s7, %s6047_s12 }
 0x162   : > { %p6049_p6 = pnand %p6048_p10, %p7787_p0  ;;  %p6055_p4 = scmp.lt.u32.totalorder %s6047_s12, %s6861_s25 }
 0x163   : > { %p6054_p12 = por %p6053_p11, %p6052_p13 }
 0x164   : > { %p6050_p9 = pneg %p6049_p6 }
 0x165   : > { %p6056_p1 = por %p6055_p4, %p6054_p12 }
 0x167   : > { %p6057_p2 = pnand %p6056_p1, %p6050_p9 }
 0x169   : > { %6060 = shalt.err (!%p6057_p2)
}
 0x16a   : > { %s6061_s27 = scalar_lea.vmem %s1032_s6, 16  ;;  %s6403_s14 = smov [#allocation11]  }
 0x16b   : > { %p6062_p8 = scmp.ne.s32.totalorder %s1032_s6, %s6061_s27  ;;  %s6065_s24 = sshll.u32 %s6403_s14, 4  ;;  %s6066_s24 = int_to_ptr.vmem [resolvable:$false] %s6065_s24 }
 0x16c   : > { %s6067_s28 = scalar_lea.vmem %s6066_s24, 32  ;;  %p6068_p7 = scmp.lt.s32.totalorder %s1032_s6, %s6066_s24 }
 0x16d   : > { %p6063_p5 = pnand %p6062_p8, %p7787_p0  ;;  %p6069_p10 = scmp.lt.s32.totalorder %s6067_s28, %s6061_s27 }
 0x16f   : > { %p6064_p3 = pneg %p6063_p5  ;;  %p6070_p6 = por %p6069_p10, %p6068_p7 }
 0x171   : > { %p6071_p11 = pnand %p6070_p6, %p6064_p3 }
 0x173   : > { %6074 = shalt.err (!%p6071_p11)
}
 0x174   : > { %s7790_s13 = scalar_lea.sflag [#allocation10], %s6688_s9  ;;  %s1067_s12 = scalar_lea.vmem [#allocation14], %s6767_s15 }
 0x175   : > { %5483 = dma.hbm_to_vmem [thread:$0]  (%p7787_p0), %s6861_s25, 16, %s1032_s6, %s7790_s13  }
 0x176   : > { %s1074_s7 = sshll.u32 %s1067_s12, 4  ;;  %s6911_s27 = scalar_lea.hbm %s7761_s30, %s6694_s1  ;;  %s6907_s7 = int_to_ptr.vmem [resolvable:$true] %s1074_s7 }
 0x177   : > { %s6075_s14 = scalar_lea.hbm %s6889_s5, 256  ;;  %s6079_s24 = scalar_lea.hbm %s7763_s19, 512 }
 0x178   : > { %p6076_p9 = scmp.ne.s32.totalorder %s6889_s5, %s6075_s14  ;;  %p6080_p4 = scmp.lt.u32.totalorder %s6889_s5, %s7763_s19 }
 0x179   : > { %p6081_p1 = scmp.lt.u32.totalorder %s6079_s24, %s6075_s14  ;;  %p6083_p8 = scmp.lt.u32.totalorder %s6075_s14, %s6889_s5 }
 0x17a   : > { %p6077_p13 = pnand %p6076_p9, %p7787_p0 }
 0x17b   : > { %p6082_p2 = por %p6081_p1, %p6080_p4 }
 0x17c   : > { %p6078_p12 = pneg %p6077_p13 }
 0x17d   : > { %p6084_p5 = por %p6083_p8, %p6082_p2 }
 0x17f   : > { %p6085_p3 = pnand %p6084_p5, %p6078_p12 }
 0x181   : > { %6088 = shalt.err (!%p6085_p3)
}
 0x182   : > { %s6089_s15 = scalar_lea.vmem %s6907_s7, 256  ;;  %s6404_s25 = smov [#allocation14]  }
 0x183   : > { %p6090_p7 = scmp.ne.s32.totalorder %s6907_s7, %s6089_s15  ;;  %s6093_s6 = sshll.u32 %s6404_s25, 4  ;;  %s6094_s6 = int_to_ptr.vmem [resolvable:$false] %s6093_s6 }
 0x184   : > { %s6095_s28 = scalar_lea.vmem %s6094_s6, 512  ;;  %p6096_p11 = scmp.lt.s32.totalorder %s6907_s7, %s6094_s6 }
 0x185   : > { %p6091_p10 = pnand %p6090_p7, %p7787_p0  ;;  %p6097_p9 = scmp.lt.s32.totalorder %s6095_s28, %s6089_s15 }
 0x187   : > { %p6092_p6 = pneg %p6091_p10  ;;  %p6098_p13 = por %p6097_p9, %p6096_p11 }
 0x189   : > { %p6099_p4 = pnand %p6098_p13, %p6092_p6 }
 0x18b   : > { %6102 = shalt.err (!%p6099_p4)
}
 0x18c   : > { %s7791_s13 = scalar_lea.sflag [#allocation13], %s6688_s9  ;;  %s1104_s12 = scalar_lea.vmem [#allocation17], %s6691_s11 }
 0x18d   : > { %5485 = dma.hbm_to_vmem [thread:$0]  (%p7787_p0), %s6889_s5, 256, %s6907_s7, %s7791_s13, %s6399_s29, %s6399_s29, %s6400_s4  }
 0x18e   : > { %s1111_s14 = sshll.u32 %s1104_s12, 4  ;;  %s6938_s24 = scalar_lea.hbm %s7762_s20, %s6694_s1  ;;  %s1112_s14 = int_to_ptr.vmem [resolvable:$true] %s1111_s14 }
 0x18f   : > { %s6103_s15 = scalar_lea.hbm %s6911_s27, 16  ;;  %s6107_s25 = scalar_lea.hbm %s7761_s30, 32 }
 0x190   : > { %p6104_p12 = scmp.ne.s32.totalorder %s6911_s27, %s6103_s15  ;;  %p6108_p8 = scmp.lt.u32.totalorder %s6911_s27, %s7761_s30 }
 0x191   : > { %p6109_p5 = scmp.lt.u32.totalorder %s6107_s25, %s6103_s15  ;;  %p6111_p7 = scmp.lt.u32.totalorder %s6103_s15, %s6911_s27 }
 0x192   : > { %p6105_p1 = pnand %p6104_p12, %p7787_p0 }
 0x193   : > { %p6110_p3 = por %p6109_p5, %p6108_p8 }
 0x194   : > { %p6106_p2 = pneg %p6105_p1 }
 0x195   : > { %p6112_p10 = por %p6111_p7, %p6110_p3 }
 0x197   : > { %p6113_p6 = pnand %p6112_p10, %p6106_p2 }
 0x199   : > { %6116 = shalt.err (!%p6113_p6)
}
 0x19a   : > { %s6117_s6 = scalar_lea.vmem %s1112_s14, 16  ;;  %s6405_s29 = smov [#allocation17]  }
 0x19b   : > { %p6118_p11 = scmp.ne.s32.totalorder %s1112_s14, %s6117_s6  ;;  %s6121_s4 = sshll.u32 %s6405_s29, 4  ;;  %s6122_s4 = int_to_ptr.vmem [resolvable:$false] %s6121_s4 }
 0x19c   : > { %s6123_s5 = scalar_lea.vmem %s6122_s4, 32  ;;  %p6124_p4 = scmp.lt.s32.totalorder %s1112_s14, %s6122_s4 }
 0x19d   : > { %p6119_p9 = pnand %p6118_p11, %p7787_p0  ;;  %p6125_p12 = scmp.lt.s32.totalorder %s6123_s5, %s6117_s6 }
 0x19f   : > { %p6120_p13 = pneg %p6119_p9  ;;  %p6126_p1 = por %p6125_p12, %p6124_p4 }
 0x1a1   : > { %p6127_p5 = pnand %p6126_p1, %p6120_p13 }
 0x1a3   : > { %6130 = shalt.err (!%p6127_p5)
}
 0x1a4   : > { %s7792_s7 = scalar_lea.sflag [#allocation16], %s6688_s9  ;;  %s7793_s28 = sld [smem:[#allocation58_spill]] }
 0x1a5   : > { %5487 = dma.hbm_to_vmem [thread:$0]  (%p7787_p0), %s6911_s27, 16, %s1112_s14, %s7792_s7  }
 0x1a6   : > { %s1146_s13 = scalar_lea.vmem [#allocation20], %s6691_s11  ;;  %s6131_s25 = scalar_lea.hbm %s6938_s24, 16 }
 0x1a7   : > { %s1153_s12 = sshll.u32 %s1146_s13, 4  ;;  %p6132_p2 = scmp.ne.s32.totalorder %s6938_s24, %s6131_s25  ;;  %s1154_s12 = int_to_ptr.vmem [resolvable:$true] %s1153_s12 }
 0x1a8   : > { %s6135_s6 = scalar_lea.hbm %s7762_s20, 32  ;;  %p6136_p7 = scmp.lt.u32.totalorder %s6938_s24, %s7762_s20 }
 0x1a9   : > { %p6133_p8 = pnand %p6132_p2, %p7787_p0  ;;  %p6137_p10 = scmp.lt.u32.totalorder %s6135_s6, %s6131_s25 }
 0x1aa   : > { %s6958_s15 = scalar_lea.hbm %s7793_s28, %s6694_s1  ;;  %p6139_p11 = scmp.lt.u32.totalorder %s6131_s25, %s6938_s24 }
 0x1ab   : > { %p6134_p3 = pneg %p6133_p8  ;;  %p6138_p6 = por %p6137_p10, %p6136_p7 }
 0x1ad   : > { %p6140_p9 = por %p6139_p11, %p6138_p6 }
 0x1af   : > { %p6141_p13 = pnand %p6140_p9, %p6134_p3 }
 0x1b1   : > { %6144 = shalt.err (!%p6141_p13)
}
 0x1b2   : > { %s6145_s29 = scalar_lea.vmem %s1154_s12, 16  ;;  %s6406_s27 = smov [#allocation20]  }
 0x1b3   : > { %p6146_p4 = scmp.ne.s32.totalorder %s1154_s12, %s6145_s29  ;;  %s6149_s14 = sshll.u32 %s6406_s27, 4  ;;  %s6150_s14 = int_to_ptr.vmem [resolvable:$false] %s6149_s14 }
 0x1b4   : > { %s6151_s4 = scalar_lea.vmem %s6150_s14, 32  ;;  %p6152_p5 = scmp.lt.s32.totalorder %s1154_s12, %s6150_s14 }
 0x1b5   : > { %p6147_p12 = pnand %p6146_p4, %p7787_p0  ;;  %p6153_p2 = scmp.lt.s32.totalorder %s6151_s4, %s6145_s29 }
 0x1b7   : > { %p6148_p1 = pneg %p6147_p12  ;;  %p6154_p8 = por %p6153_p2, %p6152_p5 }
 0x1b9   : > { %p6155_p7 = pnand %p6154_p8, %p6148_p1 }
 0x1bb   : > { %6158 = shalt.err (!%p6155_p7)
}
 0x1bc   : > { %s7794_s5 = scalar_lea.sflag [#allocation19], %s6688_s9  ;;  %s7795_s7 = sld [smem:[#allocation60_spill]] }
 0x1bd   : > { %5489 = dma.hbm_to_vmem [thread:$0]  (%p7787_p0), %s6938_s24, 16, %s1154_s12, %s7794_s5  }
 0x1be   : > { %s1184_s13 = scalar_lea.vmem [#allocation23], %s6691_s11  ;;  %s6159_s29 = scalar_lea.hbm %s6958_s15, 16 }
 0x1bf   : > { %s1191_s25 = sshll.u32 %s1184_s13, 4  ;;  %p6160_p3 = scmp.ne.s32.totalorder %s6958_s15, %s6159_s29  ;;  %s1192_s25 = int_to_ptr.vmem [resolvable:$true] %s1191_s25 }
 0x1c0   : > { %s6163_s27 = scalar_lea.hbm %s7793_s28, 32  ;;  %p6164_p11 = scmp.lt.u32.totalorder %s6958_s15, %s7793_s28 }
 0x1c1   : > { %p6161_p10 = pnand %p6160_p3, %p7787_p0  ;;  %p6165_p9 = scmp.lt.u32.totalorder %s6163_s27, %s6159_s29 }
 0x1c2   : > { %s6978_s6 = scalar_lea.hbm %s7795_s7, %s6694_s1  ;;  %p6167_p4 = scmp.lt.u32.totalorder %s6159_s29, %s6958_s15 }
 0x1c3   : > { %p6162_p6 = pneg %p6161_p10  ;;  %p6166_p13 = por %p6165_p9, %p6164_p11 }
 0x1c5   : > { %p6168_p12 = por %p6167_p4, %p6166_p13 }
 0x1c7   : > { %p6169_p1 = pnand %p6168_p12, %p6162_p6 }
 0x1c9   : > { %6172 = shalt.err (!%p6169_p1)
}
 0x1ca   : > { %s6173_s14 = scalar_lea.vmem %s1192_s25, 16  ;;  %s6407_s24 = smov [#allocation23]  }
 0x1cb   : > { %p6174_p5 = scmp.ne.s32.totalorder %s1192_s25, %s6173_s14  ;;  %s6177_s12 = sshll.u32 %s6407_s24, 4  ;;  %s6178_s12 = int_to_ptr.vmem [resolvable:$false] %s6177_s12 }
 0x1cc   : > { %s6179_s4 = scalar_lea.vmem %s6178_s12, 32  ;;  %p6180_p7 = scmp.lt.s32.totalorder %s1192_s25, %s6178_s12 }
 0x1cd   : > { %p6175_p2 = pnand %p6174_p5, %p7787_p0  ;;  %p6181_p3 = scmp.lt.s32.totalorder %s6179_s4, %s6173_s14 }
 0x1cf   : > { %p6176_p8 = pneg %p6175_p2  ;;  %p6182_p10 = por %p6181_p3, %p6180_p7 }
 0x1d1   : > { %p6183_p9 = pnand %p6182_p10, %p6176_p8 }
 0x1d3   : > { %6186 = shalt.err (!%p6183_p9)
}
 0x1d4   : > { %s7796_s5 = scalar_lea.sflag [#allocation22], %s6688_s9  ;;  %s7797_s13 = sld [smem:[#allocation62_spill]] }
 0x1d5   : > { %5491 = dma.hbm_to_vmem [thread:$0]  (%p7787_p0), %s6958_s15, 16, %s1192_s25, %s7796_s5  }
 0x1d6   : > { %s1222_s29 = scalar_lea.vmem [#allocation26], %s6691_s11  ;;  %s6187_s24 = scalar_lea.hbm %s6978_s6, 16 }
 0x1d7   : > { %s1229_s27 = sshll.u32 %s1222_s29, 4  ;;  %p6188_p6 = scmp.ne.s32.totalorder %s6978_s6, %s6187_s24  ;;  %s1230_s27 = int_to_ptr.vmem [resolvable:$true] %s1229_s27 }
 0x1d8   : > { %s6191_s12 = scalar_lea.hbm %s7795_s7, 32  ;;  %p6192_p4 = scmp.lt.u32.totalorder %s6978_s6, %s7795_s7 }
 0x1d9   : > { %p6189_p11 = pnand %p6188_p6, %p7787_p0  ;;  %p6193_p12 = scmp.lt.u32.totalorder %s6191_s12, %s6187_s24 }
 0x1da   : > { %s6998_s14 = scalar_lea.hbm %s7797_s13, %s6694_s1  ;;  %p6195_p5 = scmp.lt.u32.totalorder %s6187_s24, %s6978_s6 }
 0x1db   : > { %p6190_p13 = pneg %p6189_p11  ;;  %p6194_p1 = por %p6193_p12, %p6192_p4 }
 0x1dd   : > { %p6196_p2 = por %p6195_p5, %p6194_p1 }
 0x1df   : > { %p6197_p8 = pnand %p6196_p2, %p6190_p13 }
 0x1e1   : > { %6200 = shalt.err (!%p6197_p8)
}
 0x1e2   : > { %s6201_s4 = scalar_lea.vmem %s1230_s27, 16  ;;  %s6408_s1 = smov [#allocation26]  }
 0x1e3   : > { %p6202_p7 = scmp.ne.s32.totalorder %s1230_s27, %s6201_s4  ;;  %s6205_s15 = sshll.u32 %s6408_s1, 4  ;;  %s6206_s15 = int_to_ptr.vmem [resolvable:$false] %s6205_s15 }
 0x1e4   : > { %s6207_s25 = scalar_lea.vmem %s6206_s15, 32  ;;  %p6208_p9 = scmp.lt.s32.totalorder %s1230_s27, %s6206_s15 }
 0x1e5   : > { %p6203_p3 = pnand %p6202_p7, %p7787_p0  ;;  %p6209_p6 = scmp.lt.s32.totalorder %s6207_s25, %s6201_s4 }
 0x1e7   : > { %p6204_p10 = pneg %p6203_p3  ;;  %p6210_p11 = por %p6209_p6, %p6208_p9 }
 0x1e9   : > { %p6211_p4 = pnand %p6210_p11, %p6204_p10 }
 0x1eb   : > { %6214 = shalt.err (!%p6211_p4)
}
 0x1ec   : > { %s7798_s5 = scalar_lea.sflag [#allocation25], %s6688_s9  ;;  %s1260_s29 = scalar_lea.vmem [#allocation29], %s6691_s11 }
 0x1ed   : > { %5493 = dma.hbm_to_vmem [thread:$0]  (%p7787_p0), %s6978_s6, 16, %s1230_s27, %s7798_s5  }
 0x1ee   : > { %s1267_s24 = sshll.u32 %s1260_s29, 4  ;;  %s6215_s12 = scalar_lea.hbm %s6998_s14, 16  ;;  %s1268_s24 = int_to_ptr.vmem [resolvable:$true] %s1267_s24 }
 0x1ef   : > { %p6216_p13 = scmp.ne.s32.totalorder %s6998_s14, %s6215_s12  ;;  %s6219_s4 = scalar_lea.hbm %s7797_s13, 32 }
 0x1f0   : > { %p6220_p5 = scmp.lt.u32.totalorder %s6998_s14, %s7797_s13  ;;  %p6221_p2 = scmp.lt.u32.totalorder %s6219_s4, %s6215_s12 }
 0x1f1   : > { %p6217_p12 = pnand %p6216_p13, %p7787_p0  ;;  %p6223_p7 = scmp.lt.u32.totalorder %s6215_s12, %s6998_s14 }
 0x1f2   : > { %p6222_p8 = por %p6221_p2, %p6220_p5 }
 0x1f3   : > { %p6218_p1 = pneg %p6217_p12 }
 0x1f4   : > { %p6224_p3 = por %p6223_p7, %p6222_p8 }
 0x1f6   : > { %p6225_p10 = pnand %p6224_p3, %p6218_p1 }
 0x1f8   : > { %6228 = shalt.err (!%p6225_p10)
}
 0x1f9   : > { %s6229_s1 = scalar_lea.vmem %s1268_s24, 16  ;;  %s6409_s11 = smov [#allocation29]  }
 0x1fa   : > { %p6230_p9 = scmp.ne.s32.totalorder %s1268_s24, %s6229_s1  ;;  %s6233_s6 = sshll.u32 %s6409_s11, 4  ;;  %s6234_s6 = int_to_ptr.vmem [resolvable:$false] %s6233_s6 }
 0x1fb   : > { %s6235_s27 = scalar_lea.vmem %s6234_s6, 32  ;;  %p6236_p4 = scmp.lt.s32.totalorder %s1268_s24, %s6234_s6 }
 0x1fc   : > { %p6231_p6 = pnand %p6230_p9, %p7787_p0  ;;  %p6237_p13 = scmp.lt.s32.totalorder %s6235_s27, %s6229_s1 }
 0x1fe   : > { %p6232_p11 = pneg %p6231_p6  ;;  %p6238_p12 = por %p6237_p13, %p6236_p4 }
 0x200   : > { %p6239_p2 = pnand %p6238_p12, %p6232_p11 }
 0x202   : > { %6242 = shalt.err (!%p6239_p2)
}
 0x203   : > { %5495 = dma.hbm_to_vmem [thread:$0]  (%p7787_p0), %s6998_s14, 16, %s1268_s24, %s1237_s17  }
 0x204 PF: > { %p7799_p1 = scmp.ne.s32.totalorder %s7784_s21, 0 }
 0x205   : > { %p7800_p5 = scmp.eq.s32.totalorder (!%p7799_p1), %s6610_s26, 0 }
 0x206   : > { %1328 = sbr.rel (%p7799_p1) target bundleno = 7412 (0x1cf4), region = 140 }
 0x20d   : > { %6294 = dma.done.wait (%p7800_p5), [#allocation4], 128   ;;  %p7801_p8 = pmov %p7800_p5 }
 0x20e   : > { %p7802_p7 = pmov %p7800_p5 }
 0x20f   : > { %6296 = vsyncadd (%p7801_p8), [#allocation4], 4294967168 }
 0x210   : > { %6298 = dma.done.wait (%p7802_p7), [#allocation7], 160   ;;  %p7803_p3 = pmov %p7800_p5 }
 0x211   : > { %s7042_s2 = sand.u32 1, %s6610_s26   ;;  %s7045_s21 = sand.u32 1, %s6339_s0  }
 0x212   : > { %6300 = vsyncadd (%p7803_p3), [#allocation7], 4294967136  ;;  %s1343_s9 = scalar_lea.sflag [#allocation10], %s7042_s2  ;;  %p7804_p0 = scmp.ne.s32.totalorder %s7782_s10, 0 }
 0x214   : > { %6302 = dma.done.wait (%p7804_p0), %s1343_s9, 32  }
 0x215   : > { %6304 = vsyncadd (%p7804_p0), %s1343_s9, 4294967264  ;;  %s1359_s15 = scalar_lea.sflag [#allocation13], %s7042_s2 }
 0x216   : > { %6306 = dma.done.wait (%p7804_p0), %s1359_s15, 272  }
 0x217   : > { %6308 = vsyncadd (%p7804_p0), %s1359_s15, 4294967024  ;;  %s7061_s5 = sshll.u32 %s7045_s21, 4  ;;  %s1376_s24 = scalar_lea.sflag [#allocation16], %s7042_s2 }
 0x218   : > { %6310 = dma.done.wait (%p7804_p0), %s1376_s24, 32  }
 0x219   : > { %6312 = vsyncadd (%p7804_p0), %s1376_s24, 4294967264  ;;  %s1392_s1 = scalar_lea.sflag [#allocation19], %s7042_s2 }
 0x21a   : > { %6314 = dma.done.wait (%p7804_p0), %s1392_s1, 32  }
 0x21b   : > { %6316 = vsyncadd (%p7804_p0), %s1392_s1, 4294967264  ;;  %s1408_s27 = scalar_lea.sflag [#allocation22], %s7042_s2 }
 0x21c   : > { %6318 = dma.done.wait (%p7804_p0), %s1408_s27, 272  }
 0x21d   : > { %6320 = vsyncadd (%p7804_p0), %s1408_s27, 4294967024  ;;  %s1425_s24 = scalar_lea.sflag [#allocation25], %s7042_s2 }
 0x21e   : > { %6322 = dma.done.wait (%p7804_p0), %s1425_s24, 272  }
 0x21f   : > { %6324 = vsyncadd (%p7804_p0), %s1425_s24, 4294967024  ;;  %s1442_s6 = scalar_lea.sflag [#allocation28], %s7042_s2 }
 0x220   : > { %6326 = dma.done.wait (%p7804_p0), %s1442_s6, 272  }
 0x221   : > { %6328 = vsyncadd (%p7804_p0), %s1442_s6, 4294967024  ;;  %s7805_s27 = sld [smem:[#allocation63_spill]]  ;;  %s7806_s15 = sld [smem:[#allocation45_spill]] }
 0x222   : > { %s7807_s11 = sld [smem:[#allocation47_spill]]  ;;  %s7808_s9 = sld [smem:[#allocation49_spill]] }
 0x223   : > { %s7809_s12 = sld [smem:[#allocation55_spill]]  ;;  %s7810_s24 = sld [smem:[#allocation64_spill]] }
 0x224   : > { %s7811_s29 = sld [smem:[#allocation65_spill]]  ;;  %s7812_s25 = sld [smem:[#allocation66_spill]] }
 0x225   : > { %s7813_s17 = sld [smem:[#allocation67_spill]]  ;;  %s7814_s14 = sld [smem:[#allocation68_spill]] }
 0x226   : > { %s7815_s1 = sld [smem:[#allocation69_spill]]  ;;  %s7816_s2 = sld [smem:[#allocation70_spill]] }
 0x227   : > { %p1642_p10 = scmp.lt.s32.totalorder %s6347_s18, 1  ;;  %s1453_s26 = scalar_lea.vmem [#allocation29], %s7045_s21 }
 0x228   : > { %p5003_p9 = scmp.ne.s32.totalorder %s6347_s18, 0 }
 0x229   : > { %s7100_s4 = scalar_select %p1642_p10, %s6347_s18, 1 }
 0x22a   : > { %v5101_v0 = vld [vmem:[#allocation3] sm:$0xff] (!%p5003_p9)   ;;  %vm1700_vm0 = vcmask (!%p5003_p9), 261120  }
 0x22b   : > { %s5094_s10 = sshll.u32 %s7100_s4, 4  ;;  %s1664_s6 = scalar_lea.vmem %s7805_s27, %s7100_s4  ;;  %v5102_v1 = vunpack.c.l.bf16 (!%p5003_p9), %v5101_v0  ;;  %v5103_v2 = vunpack.c.h.bf16 (!%p5003_p9), %v5101_v0 }
 0x22c   : > { %s7106_s3 = scalar_lea.vmem %s7806_s15, %s5094_s10  ;;  %s1651_s7 = scalar_lea.vmem %s7807_s11, %s5094_s10 }
 0x22d   : > { %s7110_s8 = scalar_lea.vmem %s7808_s9, %s5094_s10  ;;  %s7113_s13 = scalar_lea.vmem %s7809_s12, %s5094_s10  ;;  %1701 = vst.msk [vmem:[#allocation2] sm:$0xff] (!%p5003_p9), %vm1700_vm0, %v5102_v1  ;;  %1702 = vst.msk [vmem:[#allocation2 + $0x8] sm:$0xff] (!%p5003_p9), %vm1700_vm0, %v5103_v2 }
 0x22e   : > { %s1667_s19 = scalar_lea.vmem %s7810_s24, %s7100_s4  ;;  %s7118_s20 = scalar_lea.vmem %s7811_s29, %s5094_s10 }
 0x22f   : > { %s1675_s28 = scalar_lea.vmem %s7812_s25, %s7100_s4  ;;  %s5099_s30 = sshll.u32 %s7100_s4, 5 }
 0x230   : > { %s7124_s22 = scalar_lea.vmem %s7813_s17, %s5099_s30  ;;  %s1683_s16 = scalar_lea.vmem %s7814_s14, %s7100_s4 }
 0x231   : > { %s1686_s0 = scalar_lea.vmem %s7815_s1, %s7100_s4  ;;  %s1689_s23 = scalar_lea.vmem %s7816_s2, %s7100_s4 }
 0x232   : > { %1695 = sbr.rel (%p5003_p9) target bundleno = 569 (0x239), region = 212 }
 0x239 PF: > { %v5668_v3 = vld [vmem:[%s1651_s7] sm:$0xff]   ;;  %v6410_v4 = vmov 0.0   ;;  %v5669_v5 = vld [vmem:[%s1651_s7 + $0x8] sm:$0xff]   ;;  %vm6411_vm1 = vmmov 0   ;;  %vm1756_vm2 = vcmask 261120   ;;  %v6412_v13 = vmov 0  }
 0x23a   : > { %5208 = vmatprep.subr.bf16.mxu1 %v6410_v4  ;;  %5200 = vmatprep.subr.bf16.mxu0 %v6410_v4  ;;  %v5670_v6 = vld [vmem:[%s7106_s3] sm:$0xff]   ;;  %v7142_v8 = vld [vmem:[#allocation2 + $0x8] sm:$0xff]  ;;  %vm1935_vm3 = vcmask 64512   ;;  %s6413_s30 = smov 120   ;;  %s7819_s7 = scalar_lea.vmem [#allocation12], %s7045_s21  ;;  %vm2055_vm4 = vcmask 1043456   ;;  %v1709_v45 = vlaneseq }
 0x23b   : > { %5209 = vmatpush3.bf16.msra.mxu1 %v5668_v3  ;;  %5212 = vmatprep.mubr.msk.bf16.mxu1 %vm6411_vm1, %v6410_v4  ;;  %v7140_v7 = vld [vmem:[#allocation2] sm:$0xff]  ;;  %v5671_v9 = vld [vmem:[%s7106_s3 + $0x8] sm:$0xff]   ;;  %s7817_s3 = scalar_lea.vmem [#allocation11], %s7045_s21  ;;  %s6414_s17 = smov 112   ;;  %vm2837_vm12 = vcmask 130048   ;;  %vm2840_vm13 = vcmask 195584  }
 0x23c   : > { %5210 = vmatprep.subr.bf16.mxu1 %v6410_v4  ;;  %5204 = vmatprep.mubr.msk.bf16.mxu0 %vm6411_vm1, %v6410_v4  ;;  %v1732_v10 = vpack.c.bf16 %v7142_v8, %v7140_v7  ;;  %v5672_v11 = vld [vmem:[%s7110_s8] sm:$0xff]   ;;  %v5673_v12 = vld [vmem:[%s7110_s8 + $0x8] sm:$0xff]   ;;  %s7818_s8 = scalar_lea.vmem [#allocation9], %s7045_s21  ;;  %v1710_v47 = vshrl.u32 %v1709_v45, 7  ;;  %v1712_v52 = vand.u32 127, %v1709_v45  ;;  %s6415_s14 = smov 104  }
 0x23d   : > { %5201 = vmatpush3.bf16.msra.mxu0 %v5670_v6  ;;  %5651 = vset.pattern.permute.xlu1 %v6412_v13  ;;  %v5008_v14 = vld [vmem:[%s7817_s3] ss:$0 sm:$0xff]  ;;  %v1708_v48 = vld [vmem:[#allocation8 + $0x1] sm:$0x1]  ;;  %s6416_s25 = smov 8   ;;  %s6417_s29 = smov 16  }
 0x23e   : > { %5202 = vmatprep.subr.bf16.mxu0 %v6410_v4  ;;  %5652 = vset.pattern.permute.xlu0 %v6412_v13  ;;  %v5004_v19 = vld [vmem:[%s7818_s8] ss:$0 sm:$0xff]  ;;  %v1720_v49 = vsub.s32 0, %v1710_v47  ;;  %vm1715_vm6 = vcmp.gt.f32.partialorder %v1708_v48, 0.5  ;;  %vm1713_vm7 = vcmp.gt.s32.totalorder %v1712_v52, %v1710_v47  ;;  %s7820_s12 = scalar_lea.vmem [#allocation14], %s7061_s5  ;;  %s6418_s9 = smov 24  }
 0x23f   : > { %5211 = vmatpush3.bf16.msra.mxu1 %v5669_v5  ;;  %v5012_v38 = vld [vmem:[%s7819_s7] ss:$0 sm:$0xff]  ;;  %v1717_v51 = vsel %vm1715_vm6, 1, %v6412_v13  ;;  %s7821_s11 = smov %s7820_s12  ;;  %s7822_s15 = scalar_lea.vmem [#allocation15], %s7045_s21  ;;  %vm4320_vm14 = vcmask 523264  }
 0x240   : > { %5224 = vmatprep.subr.bf16.mxu1 %v6410_v4  ;;  %v1707_v46 = vld [vmem:[#allocation8] sm:$0x1]  ;;  %v1725_v54 = vrot.slane %v1717_v51, %v1720_v49  ;;  %s7823_s1 = sld [smem:[#allocation43_spill]]  ;;  %s7824_s27 = scalar_lea.vmem [#allocation21], %s7061_s5 }
 0x241   : > { %5203 = vmatpush3.bf16.msra.mxu0 %v5671_v9  ;;  %vm1714_vm5 = vcmp.gt.f32.partialorder %v1707_v46, 0.5  ;;  %s7825_s24 = smov %s7824_s27  ;;  %s7827_s2 = scalar_lea.vmem [#allocation18], %s7045_s21 }
 0x242   : > { %5213 = vmatmul.mubr.msk.bf16.vlgmr.msra.gmra.mrb[0].mxu1 %vm1756_vm2, %v1732_v10  ;;  %5216 = vmatprep.subr.bf16.mxu0 %v6410_v4  ;;  %v1716_v50 = vsel %vm1714_vm5, 1, %v6412_v13  ;;  %vm1727_vm9 = vcmp.eq.s32.totalorder %v1725_v54, 1  ;;  %s7828_s10 = scalar_lea.vmem [#allocation24], %s7061_s5  ;;  %s7830_s8 = scalar_lea.vmem [#allocation23], %s7045_s21 }
 0x243   : > { %5226 = vmatprep.mubr.msk.bf16.mxu1 %vm6411_vm1, %v6410_v4  ;;  %v1721_v53 = vrot.slane %v1716_v50, %v1720_v49  ;;  %vm1729_vm11 = vmor %vm1713_vm7, %vm1727_vm9  ;;  %s7829_s3 = smov %s7828_s10  ;;  %s7831_s7 = scalar_lea.vmem [#allocation20], %s7045_s21 }
 0x244   : > { %5205 = vmatmul.mubr.msk.bf16.vlgmr.msra.gmra.mrb[0].mxu0 %vm1756_vm2, %v1732_v10  ;;  %v7209_v57 = vsel %vm1729_vm11, -1e+30, %v6410_v4  ;;  %p5085_p6 = scmp.ne.s32.totalorder %s6347_s18, 1 }
 0x245   : > { %5217 = vmatpush3.bf16.msra.mxu0 %v5672_v11  ;;  %5220 = vmatprep.mubr.msk.bf16.mxu0 %vm6411_vm1, %v6410_v4  ;;  %vm1726_vm8 = vcmp.eq.s32.totalorder %v1721_v53, 1 }
 0x246   : > { %5218 = vmatprep.subr.bf16.mxu0 %v6410_v4  ;;  %vm1728_vm10 = vmor %vm1713_vm7, %vm1726_vm8 }
 0x247   : > { %v7206_v55 = vsel %vm1728_vm10, -1e+30, %v6410_v4 }
 0x249   : > { %5219 = vmatpush3.bf16.msra.mxu0 %v5673_v12 }
 0x24a   : > { %5230 = vmatprep.subr.bf16.mxu0 %v6410_v4 }
 0x24c   : > { %5221 = vmatmul.mubr.msk.bf16.vlgmr.msra.gmra.mrb[4].mxu0 %vm1756_vm2, %v1732_v10 }
 0x24d   : > { %5232 = vmatprep.mubr.msk.bf16.mxu0 %vm6411_vm1, %v6410_v4 }
 0x315   : > { %v1858_v15 = vpop.f32.mrb[0].mxu1 }
 0x316   : > { %v1859_v16 = vadd.f32 %v5008_v14, %v1858_v15  ;;  %v5214_v17 = vpop.f32.mrb[1].mxu1 }
 0x317   : > { %v1861_v18 = vpop.f32.mrb[2].mxu1  ;;  %v1794_v20 = vpop.f32.mrb[0].mxu0 }
 0x318   : > { %v7169_v21 = vpack.c.bf16 %v1859_v16, %v1859_v16  ;;  %v1862_v22 = vadd.f32 %v5008_v14, %v1861_v18  ;;  %v5215_v23 = vpop.f32.mrb[3].mxu1  ;;  %v5206_v24 = vpop.f32.mrb[1].mxu0  ;;  %v1795_v27 = vadd.f32 %v5004_v19, %v1794_v20 }
 0x319   : > { %v1797_v25 = vpop.f32.mrb[2].mxu0 }
 0x31a   : > { %v7171_v26 = vpack.c.bf16 %v1862_v22, %v1862_v22  ;;  %v1940_v28 = vsel %vm1935_vm3, %v7169_v21, 0  ;;  %v5207_v29 = vpop.f32.mrb[3].mxu0  ;;  %v7180_v31 = vpack.c.bf16 %v1795_v27, %v1795_v27  ;;  %v1798_v32 = vadd.f32 %v5004_v19, %v1797_v25 }
 0x31b   : > { %5225 = vmatpush3.bf16.xpose.msra.mxu1 %v1940_v28 }
 0x31c   : > { %2201 = vrot.lane.b32.xlu1 %v7171_v26, %s6413_s30  ;;  %v1986_v30 = vsel %vm1935_vm3, %v7171_v26, 0  ;;  %5236 = vmatprep.subr.bf16.mxu1 %v6410_v4  ;;  %v7183_v36 = vpack.c.bf16 %v1798_v32, %v1798_v32 }
 0x31d   : > { %5231 = vmatpush3.bf16.xpose.msra.mxu0 %v1986_v30 }
 0x31e   : > { %5242 = vmatprep.subr.bf16.mxu0 %v6410_v4 }
 0x31f   : > { %v1922_v33 = vpop.f32.mrb[4].mxu0 }
 0x320   : > { %v5222_v34 = vpop.f32.mrb[5].mxu0  ;;  %v1923_v39 = vadd.f32 %v5012_v38, %v1922_v33 }
 0x321   : > { %v1925_v35 = vpop.f32.mrb[6].mxu0 }
 0x322   : > { %5227 = vmatmul.mubr.msk.bf16.vlgmr.msra.gmra.mrb[4].mxu1 %vm1935_vm3, %v7180_v31  ;;  %v5223_v37 = vpop.f32.mrb[7].mxu0  ;;  %v1926_v40 = vadd.f32 %v5012_v38, %v1925_v35  ;;  %v7195_v41 = vpack.c.bf16 %v1923_v39, %v1923_v39 }
 0x323   : > { %5238 = vmatprep.mubr.msk.bf16.mxu1 %vm6411_vm1, %v6410_v4 }
 0x324   : > { %5233 = vmatmul.mubr.msk.bf16.vlgmr.msra.gmra.mrb[8].mxu0 %vm1935_vm3, %v7183_v36  ;;  %v7197_v42 = vpack.c.bf16 %v1926_v40, %v1926_v40  ;;  %v2057_v43 = vsel %vm2055_vm4, %v7195_v41, 0 }
 0x325   : > { %5244 = vmatprep.mubr.msk.bf16.mxu0 %vm6411_vm1, %v6410_v4  ;;  %5237 = vmatpush3.bf16.msra.mxu1 %v2057_v43 }
 0x326   : > { %v2103_v44 = vsel %vm2055_vm4, %v7197_v42, 0  ;;  %5248 = vmatprep.subr.bf16.mxu1 %v6410_v4 }
 0x327   : > { %5243 = vmatpush3.bf16.msra.mxu0 %v2103_v44 }
 0x328   : > { %5254 = vmatprep.subr.bf16.mxu0 %v6410_v4 }
 0x38e   : > { %v2202_v18 = vpop.permute.xlu1 %2201 }
 0x38f   : > { %v2207_v32 = vsel %vm1935_vm3, %v2202_v18, 0 }
 0x3f5   : > { %v1976_v56 = vpop.f32.mrb[4].mxu1 }
 0x3f6   : > { %v1977_v58 = vadd.f32 %v1976_v56, %v7206_v55  ;;  %v5228_v59 = vpop.f32.mrb[5].mxu1 }
 0x3f7   : > { %v1979_v60 = vpop.f32.mrb[6].mxu1  ;;  %v2022_v61 = vpop.f32.mrb[8].mxu0 }
 0x3f8   : > { %v2023_v62 = vadd.f32 %v2022_v61, %v7209_v57  ;;  %v5229_v63 = vpop.f32.mrb[7].mxu1  ;;  %v5234_v0 = vpop.f32.mrb[9].mxu0  ;;  %v2028_v1 = vsel %vm1935_vm3, %v1977_v58, -inf }
 0x3f9   : > { %2029 = vmax.xlane.f32.xlu0 %v2028_v1  ;;  %v2025_v2 = vpop.f32.mrb[10].mxu0 }
 0x3fa   : > { %v5235_v3 = vpop.f32.mrb[11].mxu0  ;;  %v2031_v5 = vsel %vm1935_vm3, %v2023_v62, -inf }
 0x3fd   : > { %2032 = vmax.xlane.f32.xlu0 %v2031_v5 }
 0x413   : > { %2149 = vrot.lane.b32.xlu0 %v7169_v21, %s6413_s30 }
 0x486   : > { %v2030_v6 = vpop.xlane.xlu0 %2029 }
 0x487   : > { %v2034_v9 = vsub.f32 %v1977_v58, %v2030_v6 }
 0x489   : > { %v2036_v10 = vmul.f32 1.442695, %v2034_v9 }
 0x48a   : > { %v2033_v11 = vpop.xlane.xlu0 %2032 }
 0x48b   : > { %5691 = vpow2.f32 %v2036_v10  ;;  %v2035_v12 = vsub.f32 %v2023_v62, %v2033_v11 }
 0x48d   : > { %v2038_v13 = vmul.f32 1.442695, %v2035_v12 }
 0x48e   : > { %v2150_v24 = vpop.permute.xlu0 %2149 }
 0x48f   : > { %5693 = vpow2.f32 %v2038_v13  ;;  %v2155_v28 = vsel %vm1935_vm3, %v2150_v24, 0 }
 0x495   : > { %v5692_v14 = vpop.eup %5691 }
 0x496   : > { %v2040_v15 = vsel %vm1935_vm3, %v5692_v14, 0.0 }
 0x497   : > { %2041 = vadd.xlane.f32.xlu1 %v2040_v15 }
 0x499   : > { %v5694_v16 = vpop.eup %5693 }
 0x49a   : > { %v2043_v17 = vsel %vm1935_vm3, %v5694_v16, 0.0 }
 0x49b   : > { %2044 = vadd.xlane.f32.xlu1 %v2043_v17 }
 0x4ac   : > { %2146 = vrot.lane.b32.xlu1 %v7180_v31, %s6413_s30 }
 0x4b0   : > { %2198 = vrot.lane.b32.xlu1 %v7183_v36, %s6413_s30 }
 0x524   : > { %v2042_v19 = vpop.xlane.xlu1 %2041 }
 0x525   : > { %5695 = vrcp.f32 %v2042_v19 }
 0x528   : > { %v2045_v20 = vpop.xlane.xlu1 %2044 }
 0x529   : > { %5697 = vrcp.f32 %v2045_v20 }
 0x52c   : > { %v2147_v33 = vpop.permute.xlu1 %2146 }
 0x52f   : > { %v5696_v22 = vpop.eup %5695 }
 0x530   : > { %v2048_v23 = vmul.f32 %v5696_v22, %v5692_v14  ;;  %v2199_v34 = vpop.permute.xlu1 %2198 }
 0x532   : > { %v2050_v25 = vpack.c.bf16 %v2048_v23, %v2048_v23 }
 0x533   : > { %v5698_v27 = vpop.eup %5697 }
 0x534   : > { %v2049_v29 = vmul.f32 %v5698_v27, %v5694_v16  ;;  %5239 = vmatmul.mubr.msk.bf16.vlgmr.msra.gmra.mrb[8].mxu1 %vm1935_vm3, %v2050_v25 }
 0x535   : > { %5249 = vmatpush3.bf16.xpose.msra.mxu1 %v2155_v28  ;;  %5250 = vmatprep.mubr.msk.bf16.mxu1 %vm6411_vm1, %v6410_v4 }
 0x536   : > { %v2051_v30 = vpack.c.bf16 %v2049_v29, %v2049_v29  ;;  %5260 = vmatprep.subr.bf16.mxu1 %v6410_v4 }
 0x538   : > { %5245 = vmatmul.mubr.msk.bf16.vlgmr.msra.gmra.mrb[12].mxu0 %vm1935_vm3, %v2051_v30 }
 0x539   : > { %5255 = vmatpush3.bf16.xpose.msra.mxu0 %v2207_v32  ;;  %5256 = vmatprep.mubr.msk.bf16.mxu0 %vm6411_vm1, %v6410_v4 }
 0x53a   : > { %5266 = vmatprep.subr.bf16.mxu0 %v6410_v4 }
 0x53c   : > { %5251 = vmatmul.mubr.msk.bf16.vlgmr.msra.gmra.mrb[12].mxu1 %vm1935_vm3, %v2147_v33 }
 0x53d   : > { %5262 = vmatprep.mubr.msk.bf16.mxu1 %vm6411_vm1, %v6410_v4 }
 0x540   : > { %5257 = vmatmul.mubr.msk.bf16.vlgmr.msra.gmra.mrb[16].mxu0 %vm1935_vm3, %v2199_v34 }
 0x541   : > { %5268 = vmatprep.mubr.msk.bf16.mxu0 %vm6411_vm1, %v6410_v4 }
 0x607   : > { %v7239_v35 = vpop.f32.mrb[8].mxu1 }
 0x608   : > { %v5240_v37 = vpop.f32.mrb[9].mxu1 }
 0x609   : > { %v2096_v38 = vpop.f32.mrb[10].mxu1 }
 0x60a   : > { %v5241_v39 = vpop.f32.mrb[11].mxu1 }
 0x60b   : > { %v7241_v40 = vpop.f32.mrb[12].mxu0 }
 0x60c   : > { %v5246_v43 = vpop.f32.mrb[13].mxu0 }
 0x60d   : > { %v2142_v44 = vpop.f32.mrb[14].mxu0 }
 0x60e   : > { %v5247_v45 = vpop.f32.mrb[15].mxu0 }
 0x60f   : > { %v2191_v46 = vpop.f32.mrb[12].mxu1 }
 0x610   : > { %v2192_v47 = vadd.f32 %v2191_v46, %v7206_v55  ;;  %v5252_v48 = vpop.f32.mrb[13].mxu1 }
 0x611   : > { %v2194_v49 = vpop.f32.mrb[14].mxu1 }
 0x612   : > { %v5253_v50 = vpop.f32.mrb[15].mxu1  ;;  %v2249_v51 = vsel %vm1935_vm3, %v2192_v47, -inf }
 0x613   : > { %2250 = vmax.xlane.f32.xlu0 %v2249_v51  ;;  %v2243_v52 = vpop.f32.mrb[16].mxu0 }
 0x614   : > { %v2244_v53 = vadd.f32 %v2243_v52, %v7209_v57  ;;  %v5258_v54 = vpop.f32.mrb[17].mxu0 }
 0x615   : > { %v2246_v56 = vpop.f32.mrb[18].mxu0 }
 0x616   : > { %v5259_v58 = vpop.f32.mrb[19].mxu0  ;;  %v2252_v59 = vsel %vm1935_vm3, %v2244_v53, -inf }
 0x617   : > { %2253 = vmax.xlane.f32.xlu1 %v2252_v59 }
 0x628   : > { %2323 = vrot.lane.b32.xlu1 %v7197_v42, %s6413_s30 }
 0x62c   : > { %2373 = vrot.lane.b32.xlu1 %v7169_v21, %s6414_s17 }
 0x630   : > { %2423 = vrot.lane.b32.xlu1 %v7171_v26, %s6414_s17 }
 0x634   : > { %2421 = vrot.lane.b32.xlu1 %v7183_v36, %s6414_s17 }
 0x6a0   : > { %v2251_v60 = vpop.xlane.xlu0 %2250 }
 0x6a1   : > { %v2255_v61 = vsub.f32 %v2192_v47, %v2251_v60 }
 0x6a3   : > { %v2257_v62 = vmul.f32 1.442695, %v2255_v61 }
 0x6a4   : > { %v2254_v63 = vpop.xlane.xlu1 %2253 }
 0x6a5   : > { %5699 = vpow2.f32 %v2257_v62  ;;  %v2256_v0 = vsub.f32 %v2244_v53, %v2254_v63 }
 0x6a7   : > { %v2259_v1 = vmul.f32 1.442695, %v2256_v0 }
 0x6a8   : > { %v2324_v2 = vpop.permute.xlu1 %2323 }
 0x6a9   : > { %5701 = vpow2.f32 %v2259_v1  ;;  %v2329_v3 = vsel %vm2055_vm4, %v2324_v2, 0 }
 0x6aa   : > { %5267 = vmatpush3.bf16.msra.mxu0 %v2329_v3 }
 0x6ab   : > { %5278 = vmatprep.subr.bf16.mxu0 %v6410_v4 }
 0x6ac   : > { %v2374_v16 = vpop.permute.xlu1 %2373 }
 0x6ad   : > { %v2379_v23 = vsel %vm1935_vm3, %v2374_v16, 0 }
 0x6af   : > { %v5700_v5 = vpop.eup %5699 }
 0x6b0   : > { %v2261_v6 = vsel %vm1935_vm3, %v5700_v5, 0.0  ;;  %v2424_v22 = vpop.permute.xlu1 %2423 }
 0x6b1   : > { %2262 = vadd.xlane.f32.xlu0 %v2261_v6  ;;  %v2429_v25 = vsel %vm1935_vm3, %v2424_v22, 0 }
 0x6b3   : > { %v5702_v9 = vpop.eup %5701 }
 0x6b4   : > { %v2264_v10 = vsel %vm1935_vm3, %v5702_v9, 0.0  ;;  %v2422_v28 = vpop.permute.xlu1 %2421 }
 0x6b5   : > { %2265 = vadd.xlane.f32.xlu0 %v2264_v10 }
 0x6cb   : > { %2274 = vrot.lane.b32.xlu0 %v7195_v41, %s6413_s30 }
 0x6cf   : > { %2371 = vrot.lane.b32.xlu0 %v7180_v31, %s6414_s17 }
 0x73e   : > { %v2263_v11 = vpop.xlane.xlu0 %2262 }
 0x73f   : > { %5703 = vrcp.f32 %v2263_v11 }
 0x742   : > { %v2266_v12 = vpop.xlane.xlu0 %2265 }
 0x743   : > { %5705 = vrcp.f32 %v2266_v12 }
 0x746   : > { %v2275_v13 = vpop.permute.xlu0 %2274 }
 0x747   : > { %v2280_v14 = vsel %vm2055_vm4, %v2275_v13, 0 }
 0x748   : > { %5261 = vmatpush3.bf16.msra.mxu1 %v2280_v14 }
 0x749   : > { %v5704_v15 = vpop.eup %5703  ;;  %5272 = vmatprep.subr.bf16.mxu1 %v6410_v4 }
 0x74a   : > { %v2269_v17 = vmul.f32 %v5704_v15, %v5700_v5  ;;  %v2372_v27 = vpop.permute.xlu0 %2371 }
 0x74c   : > { %v2271_v18 = vpack.c.bf16 %v2269_v17, %v2269_v17 }
 0x74d   : > { %v5706_v19 = vpop.eup %5705 }
 0x74e   : > { %v2270_v20 = vmul.f32 %v5706_v19, %v5702_v9  ;;  %5263 = vmatmul.mubr.msk.bf16.vlgmr.msra.gmra.mrb[16].mxu1 %vm1935_vm3, %v2271_v18 }
 0x74f   : > { %5274 = vmatprep.mubr.msk.bf16.mxu1 %vm6411_vm1, %v6410_v4 }
 0x750   : > { %v2272_v24 = vpack.c.bf16 %v2270_v20, %v2270_v20 }
 0x751   : > { %5273 = vmatpush3.bf16.xpose.msra.mxu1 %v2379_v23 }
 0x752   : > { %5269 = vmatmul.mubr.msk.bf16.vlgmr.msra.gmra.mrb[20].mxu0 %vm1935_vm3, %v2272_v24  ;;  %5284 = vmatprep.subr.bf16.mxu1 %v6410_v4 }
 0x753   : > { %5279 = vmatpush3.bf16.xpose.msra.mxu0 %v2429_v25  ;;  %5280 = vmatprep.mubr.msk.bf16.mxu0 %vm6411_vm1, %v6410_v4 }
 0x754   : > { %5290 = vmatprep.subr.bf16.mxu0 %v6410_v4 }
 0x758   : > { %5275 = vmatmul.mubr.msk.bf16.vlgmr.msra.gmra.mrb[20].mxu1 %vm1935_vm3, %v2372_v27 }
 0x759   : > { %5286 = vmatprep.mubr.msk.bf16.mxu1 %vm6411_vm1, %v6410_v4 }
 0x75a   : > { %5281 = vmatmul.mubr.msk.bf16.vlgmr.msra.gmra.mrb[24].mxu0 %vm1935_vm3, %v2422_v28 }
 0x75b   : > { %5292 = vmatprep.mubr.msk.bf16.mxu0 %vm6411_vm1, %v6410_v4 }
 0x821   : > { %v7281_v29 = vpop.f32.mrb[16].mxu1 }
 0x822   : > { %v5264_v30 = vpop.f32.mrb[17].mxu1 }
 0x823   : > { %v2319_v32 = vpop.f32.mrb[18].mxu1 }
 0x824   : > { %v5265_v33 = vpop.f32.mrb[19].mxu1 }
 0x825   : > { %v7283_v34 = vpop.f32.mrb[20].mxu0 }
 0x826   : > { %v5636_v37 = vpack.i.bf16 %v7283_v34, %v7281_v29  ;;  %v5270_v38 = vpop.f32.mrb[21].mxu0 }
 0x827   : > { %v2368_v39 = vpop.f32.mrb[22].mxu0 }
 0x828   : > { %v5271_v43 = vpop.f32.mrb[23].mxu0 }
 0x82b   : > { %v2415_v44 = vpop.f32.mrb[20].mxu1 }
 0x82c   : > { %v2416_v45 = vadd.f32 %v2415_v44, %v7206_v55  ;;  %v5276_v46 = vpop.f32.mrb[21].mxu1 }
 0x82d   : > { %v2418_v47 = vpop.f32.mrb[22].mxu1  ;;  %v2465_v48 = vpop.f32.mrb[24].mxu0 }
 0x82e   : > { %v2466_v49 = vadd.f32 %v2465_v48, %v7209_v57  ;;  %v5277_v50 = vpop.f32.mrb[23].mxu1  ;;  %v5282_v51 = vpop.f32.mrb[25].mxu0  ;;  %v2471_v52 = vsel %vm1935_vm3, %v2416_v45, -inf }
 0x82f   : > { %2472 = vmax.xlane.f32.xlu0 %v2471_v52  ;;  %v2468_v53 = vpop.f32.mrb[26].mxu0 }
 0x830   : > { %v5283_v54 = vpop.f32.mrb[27].mxu0  ;;  %v2474_v56 = vsel %vm1935_vm3, %v2466_v49, -inf }
 0x831   : > { %2475 = vmax.xlane.f32.xlu1 %v2474_v56 }
 0x842   : > { %2543 = vrot.lane.b32.xlu1 %v7197_v42, %s6414_s17 }
 0x846   : > { %2593 = vrot.lane.b32.xlu1 %v7169_v21, %s6415_s14 }
 0x84a   : > { %2643 = vrot.lane.b32.xlu1 %v7171_v26, %s6415_s14 }
 0x84e   : > { %2641 = vrot.lane.b32.xlu1 %v7183_v36, %s6415_s14 }
 0x8bc   : > { %v2473_v58 = vpop.xlane.xlu0 %2472 }
 0x8bd   : > { %v2477_v59 = vsub.f32 %v2416_v45, %v2473_v58 }
 0x8be   : > { %v2476_v60 = vpop.xlane.xlu1 %2475 }
 0x8bf   : > { %v2479_v61 = vmul.f32 1.442695, %v2477_v59  ;;  %v2478_v62 = vsub.f32 %v2466_v49, %v2476_v60 }
 0x8c1   : > { %5707 = vpow2.f32 %v2479_v61  ;;  %v2481_v63 = vmul.f32 1.442695, %v2478_v62 }
 0x8c2   : > { %v2544_v0 = vpop.permute.xlu1 %2543 }
 0x8c3   : > { %5709 = vpow2.f32 %v2481_v63  ;;  %v2549_v1 = vsel %vm2055_vm4, %v2544_v0, 0 }
 0x8c4   : > { %5291 = vmatpush3.bf16.msra.mxu0 %v2549_v1 }
 0x8c5   : > { %5302 = vmatprep.subr.bf16.mxu0 %v6410_v4 }
 0x8c6   : > { %v2594_v11 = vpop.permute.xlu1 %2593 }
 0x8ca   : > { %v2644_v16 = vpop.permute.xlu1 %2643 }
 0x8cb   : > { %v5708_v21 = vpop.eup %5707  ;;  %v2649_v18 = vsel %vm1935_vm3, %v2644_v16, 0 }
 0x8cc   : > { %v2483_v26 = vsel %vm1935_vm3, %v5708_v21, 0.0 }
 0x8cd   : > { %v5710_v2 = vpop.eup %5709  ;;  %2484 = vadd.xlane.f32.xlu0 %v2483_v26 }
 0x8ce   : > { %v2486_v36 = vsel %vm1935_vm3, %v5710_v2, 0.0  ;;  %v2642_v20 = vpop.permute.xlu1 %2641 }
 0x8d1   : > { %2487 = vadd.xlane.f32.xlu0 %v2486_v36 }
 0x8e7   : > { %2495 = vrot.lane.b32.xlu0 %v7195_v41, %s6414_s17 }
 0x8eb   : > { %2591 = vrot.lane.b32.xlu0 %v7180_v31, %s6415_s14  ;;  %v2599_v31 = vsel %vm1935_vm3, %v2594_v11, 0 }
 0x95a   : > { %v2485_v3 = vpop.xlane.xlu0 %2484 }
 0x95b   : > { %5711 = vrcp.f32 %v2485_v3  ;;  %v5674_v3 = vld [vmem:[%s7820_s12] sm:$0xff]   ;;  %s7832_s12 = scalar_lea.vmem [#allocation26], %s7045_s21 }
 0x95e   : > { %v2488_v5 = vpop.xlane.xlu0 %2487 }
 0x95f   : > { %5713 = vrcp.f32 %v2488_v5  ;;  %v5675_v5 = vld [vmem:[%s7821_s11 + $0x8] sm:$0xff]  }
 0x962   : > { %v2496_v6 = vpop.permute.xlu0 %2495 }
 0x963   : > { %v2501_v9 = vsel %vm2055_vm4, %v2496_v6, 0 }
 0x964   : > { %5285 = vmatpush3.bf16.msra.mxu1 %v2501_v9 }
 0x965   : > { %v5712_v10 = vpop.eup %5711  ;;  %5296 = vmatprep.subr.bf16.mxu1 %v6410_v4 }
 0x966   : > { %v2491_v12 = vmul.f32 %v5712_v10, %v5708_v21  ;;  %v2592_v19 = vpop.permute.xlu0 %2591 }
 0x968   : > { %v2493_v13 = vpack.c.bf16 %v2491_v12, %v2491_v12 }
 0x969   : > { %v5714_v14 = vpop.eup %5713 }
 0x96a   : > { %v2492_v15 = vmul.f32 %v5714_v14, %v5710_v2  ;;  %5287 = vmatmul.mubr.msk.bf16.vlgmr.msra.gmra.mrb[24].mxu1 %vm1935_vm3, %v2493_v13 }
 0x96b   : > { %5298 = vmatprep.mubr.msk.bf16.mxu1 %vm6411_vm1, %v6410_v4 }
 0x96c   : > { %v2494_v17 = vpack.c.bf16 %v2492_v15, %v2492_v15 }
 0x96d   : > { %5297 = vmatpush3.bf16.xpose.msra.mxu1 %v2599_v31 }
 0x96e   : > { %5293 = vmatmul.mubr.msk.bf16.vlgmr.msra.gmra.mrb[28].mxu0 %vm1935_vm3, %v2494_v17  ;;  %5308 = vmatprep.subr.bf16.mxu1 %v6410_v4 }
 0x96f   : > { %5303 = vmatpush3.bf16.xpose.msra.mxu0 %v2649_v18  ;;  %5304 = vmatprep.mubr.msk.bf16.mxu0 %vm6411_vm1, %v6410_v4 }
 0x970   : > { %5314 = vmatprep.subr.bf16.mxu0 %v6410_v4 }
 0x974   : > { %5299 = vmatmul.mubr.msk.bf16.vlgmr.msra.gmra.mrb[28].mxu1 %vm1935_vm3, %v2592_v19 }
 0x975   : > { %5310 = vmatprep.mubr.msk.bf16.mxu1 %vm6411_vm1, %v6410_v4 }
 0x976   : > { %5305 = vmatmul.mubr.msk.bf16.vlgmr.msra.gmra.mrb[32].mxu0 %vm1935_vm3, %v2642_v20 }
 0x977   : > { %5316 = vmatprep.mubr.msk.bf16.mxu0 %vm6411_vm1, %v6410_v4 }
 0xa3d   : > { %v2537_v22 = vpop.f32.mrb[24].mxu1 }
 0xa3e   : > { %v5288_v23 = vpop.f32.mrb[25].mxu1 }
 0xa3f   : > { %v2540_v24 = vpop.f32.mrb[26].mxu1 }
 0xa40   : > { %v5289_v25 = vpop.f32.mrb[27].mxu1 }
 0xa41   : > { %v2585_v27 = vpop.f32.mrb[28].mxu0 }
 0xa42   : > { %v5641_v28 = vpack.i.bf16 %v2585_v27, %v2537_v22  ;;  %v5294_v30 = vpop.f32.mrb[29].mxu0 }
 0xa43   : > { %v2588_v32 = vpop.f32.mrb[30].mxu0 }
 0xa44   : > { %v5295_v33 = vpop.f32.mrb[31].mxu0 }
 0xa47   : > { %v2635_v38 = vpop.f32.mrb[28].mxu1 }
 0xa48   : > { %v2636_v39 = vadd.f32 %v2635_v38, %v7206_v55  ;;  %v5300_v43 = vpop.f32.mrb[29].mxu1 }
 0xa49   : > { %v2638_v44 = vpop.f32.mrb[30].mxu1  ;;  %v2685_v45 = vpop.f32.mrb[32].mxu0 }
 0xa4a   : > { %v2686_v46 = vadd.f32 %v2685_v45, %v7209_v57  ;;  %v5301_v47 = vpop.f32.mrb[31].mxu1  ;;  %v5306_v48 = vpop.f32.mrb[33].mxu0  ;;  %v2691_v49 = vsel %vm1935_vm3, %v2636_v39, -inf }
 0xa4b   : > { %2692 = vmax.xlane.f32.xlu0 %v2691_v49  ;;  %v2688_v50 = vpop.f32.mrb[34].mxu0 }
 0xa4c   : > { %v5307_v51 = vpop.f32.mrb[35].mxu0  ;;  %v2694_v52 = vsel %vm1935_vm3, %v2686_v46, -inf }
 0xa4d   : > { %2695 = vmax.xlane.f32.xlu1 %v2694_v52 }
 0xa5e   : > { %2763 = vrot.lane.b32.xlu1 %v7197_v42, %s6415_s14 }
 0xa62   : > { %5637 = vrot.lane.b32.xlu1 %v5636_v37, %s6416_s25 }
 0xa66   : > { %5642 = vrot.lane.b32.xlu1 %v5641_v28, %s6417_s29 }
 0xad8   : > { %v2693_v55 = vpop.xlane.xlu0 %2692 }
 0xad9   : > { %v2697_v57 = vsub.f32 %v2636_v39, %v2693_v55 }
 0xada   : > { %v2696_v53 = vpop.xlane.xlu1 %2695 }
 0xadb   : > { %v2699_v54 = vmul.f32 1.442695, %v2697_v57  ;;  %v2698_v56 = vsub.f32 %v2686_v46, %v2696_v53  ;;  %v1705_v53 = vld [vmem:[%s7823_s1] sm:$0xff] }
 0xadd   : > { %5715 = vpow2.f32 %v2699_v54  ;;  %v2701_v58 = vmul.f32 1.442695, %v2698_v56  ;;  %v5676_v54 = vld [vmem:[%s7824_s27] sm:$0xff]   ;;  %v5677_v56 = vld [vmem:[%s7825_s24 + $0x8] sm:$0xff]  }
 0xade   : > { %v2764_v59 = vpop.permute.xlu1 %2763 }
 0xadf   : > { %5717 = vpow2.f32 %v2701_v58  ;;  %v2769_v42 = vsel %vm2055_vm4, %v2764_v59, 0  ;;  %v5678_v58 = vld [vmem:[#allocation6] sm:$0xff]   ;;  %v5679_v59 = vld [vmem:[%s7113_s13] sm:$0xff]  }
 0xae0   : > { %5315 = vmatpush3.bf16.msra.mxu0 %v2769_v42  ;;  %v5680_v42 = vld [vmem:[%s7113_s13 + $0x8] sm:$0xff]   ;;  %s7826_s13 = scalar_lea.vmem [#allocation17], %s7045_s21 }
 0xae1   : > { %5328 = vmatprep.subr.bf16.mxu0 %v6410_v4 }
 0xae2   : > { %v5638_v31 = vpop.permute.xlu1 %5637 }
 0xae3   : > { %v5640_v18 = vunpack.i.h.bf16 %v5638_v31  ;;  %v5639_v19 = vunpack.i.l.bf16 %v5638_v31 }
 0xae5   : > { %v2836_v24 = vsel %vm1935_vm3, %v7241_v40, %v5640_v18  ;;  %v2835_v25 = vsel %vm1935_vm3, %v7239_v35, %v5639_v19  ;;  %v5032_v40 = vld [vmem:[%s7822_s15] ss:$0 sm:$0xff] }
 0xae6   : > { %v5643_v17 = vpop.permute.xlu1 %5642 }
 0xae7   : > { %v5716_v60 = vpop.eup %5715  ;;  %v5645_v20 = vunpack.i.h.bf16 %v5643_v17  ;;  %v5644_v22 = vunpack.i.l.bf16 %v5643_v17 }
 0xae8   : > { %v2703_v29 = vsel %vm1935_vm3, %v5716_v60, 0.0 }
 0xae9   : > { %v5718_v34 = vpop.eup %5717  ;;  %2704 = vadd.xlane.f32.xlu0 %v2703_v29  ;;  %v2838_v30 = vsel %vm2837_vm12, %v2835_v25, %v5644_v22  ;;  %v2839_v32 = vsel %vm2837_vm12, %v2836_v24, %v5645_v20  ;;  %v5681_v22 = vld [vmem:[%s7828_s10] sm:$0xff]   ;;  %v5042_v25 = vld [vmem:[%s7830_s8] ss:$0 sm:$0xff] }
 0xaea   : > { %v2706_v37 = vsel %vm1935_vm3, %v5718_v34, 0.0  ;;  %v5682_v24 = vld [vmem:[%s7829_s3 + $0x8] sm:$0xff]  }
 0xaed   : > { %2707 = vadd.xlane.f32.xlu0 %v2706_v37 }
 0xb03   : > { %2715 = vrot.lane.b32.xlu0 %v7195_v41, %s6415_s14 }
 0xb76   : > { %v2705_v61 = vpop.xlane.xlu0 %2704 }
 0xb77   : > { %5719 = vrcp.f32 %v2705_v61 }
 0xb7a   : > { %v2708_v62 = vpop.xlane.xlu0 %2707 }
 0xb7b   : > { %5721 = vrcp.f32 %v2708_v62 }
 0xb7e   : > { %v2716_v63 = vpop.permute.xlu0 %2715 }
 0xb7f   : > { %v2721_v0 = vsel %vm2055_vm4, %v2716_v63, 0 }
 0xb80   : > { %5309 = vmatpush3.bf16.msra.mxu1 %v2721_v0 }
 0xb81   : > { %v5720_v1 = vpop.eup %5719  ;;  %5320 = vmatprep.subr.bf16.mxu1 %v6410_v4 }
 0xb82   : > { %v2711_v21 = vmul.f32 %v5720_v1, %v5716_v60 }
 0xb84   : > { %v2713_v26 = vpack.c.bf16 %v2711_v21, %v2711_v21 }
 0xb85   : > { %v5722_v2 = vpop.eup %5721 }
 0xb86   : > { %v2712_v36 = vmul.f32 %v5722_v2, %v5718_v34  ;;  %5311 = vmatmul.mubr.msk.bf16.vlgmr.msra.gmra.mrb[32].mxu1 %vm1935_vm3, %v2713_v26 }
 0xb87   : > { %5324 = vmatprep.mubr.msk.bf16.mxu1 %vm6411_vm1, %v6410_v4  ;;  %5321 = vmatpush3.bf16.msra.mxu1 %v5674_v3 }
 0xb88   : > { %v2714_v41 = vpack.c.bf16 %v2712_v36, %v2712_v36  ;;  %5322 = vmatprep.subr.bf16.mxu1 %v6410_v4 }
 0xb8a   : > { %5317 = vmatmul.mubr.msk.bf16.vlgmr.msra.gmra.mrb[36].mxu0 %vm1935_vm3, %v2714_v41 }
 0xb8b   : > { %5332 = vmatprep.mubr.msk.bf16.mxu0 %vm6411_vm1, %v6410_v4  ;;  %5323 = vmatpush3.bf16.msra.mxu1 %v5675_v5 }
 0xb8c   : > { %5336 = vmatprep.subr.bf16.mxu1 %v6410_v4  ;;  %5329 = vmatpush3.bf16.msra.mxu0 %v5679_v59 }
 0xb8d   : > { %5330 = vmatprep.subr.bf16.mxu0 %v6410_v4 }
 0xb90   : > { %5331 = vmatpush3.bf16.msra.mxu0 %v5680_v42 }
 0xb91   : > { %5344 = vmatprep.subr.bf16.mxu0 %v6410_v4 }
 0xc59   : > { %v2757_v6 = vpop.f32.mrb[32].mxu1 }
 0xc5a   : > { %v5312_v9 = vpop.f32.mrb[33].mxu1 }
 0xc5b   : > { %v2760_v10 = vpop.f32.mrb[34].mxu1 }
 0xc5c   : > { %v5313_v11 = vpop.f32.mrb[35].mxu1 }
 0xc5d   : > { %v2805_v12 = vpop.f32.mrb[36].mxu0 }
 0xc5e   : > { %v5646_v13 = vpack.i.bf16 %v2805_v12, %v2757_v6  ;;  %v5318_v14 = vpop.f32.mrb[37].mxu0  ;;  %v5036_v6 = vld [vmem:[%s7826_s13] ss:$0 sm:$0xff] }
 0xc5f   : > { %v2808_v15 = vpop.f32.mrb[38].mxu0 }
 0xc60   : > { %5647 = vrot.lane.b32.xlu0 %v5646_v13, %s6418_s9  ;;  %v5319_v16 = vpop.f32.mrb[39].mxu0  ;;  %v5037_v13 = vld [vmem:[%s7827_s2] ss:$0 sm:$0xff] }
 0xcd2   : > { %v5648_v23 = vpop.permute.xlu0 %5647 }
 0xcd3   : > { %v5650_v27 = vunpack.i.h.bf16 %v5648_v23  ;;  %v5649_v28 = vunpack.i.l.bf16 %v5648_v23 }
 0xcd5   : > { %v2842_v33 = vsel %vm2840_vm13, %v2839_v32, %v5650_v27  ;;  %v2841_v38 = vsel %vm2840_vm13, %v2838_v30, %v5649_v28 }
 0xcd6   : > { %v2843_v39 = vpack.c.bf16 %v2842_v33, %v2841_v38 }
 0xcd8   : > { %5325 = vmatmul.mubr.msk.bf16.vlgmr.msra.gmra.mrb[36].mxu1 %vm1756_vm2, %v2843_v39 }
 0xcd9   : > { %5340 = vmatprep.mubr.msk.bf16.mxu1 %vm6411_vm1, %v6410_v4  ;;  %5337 = vmatpush3.bf16.msra.mxu1 %v5676_v54 }
 0xcda   : > { %5338 = vmatprep.subr.bf16.mxu1 %v6410_v4 }
 0xcdd   : > { %5339 = vmatpush3.bf16.msra.mxu1 %v5677_v56 }
 0xcde   : > { %5352 = vmatprep.subr.bf16.mxu1 %v6410_v4 }
 0xce0   : > { %5341 = vmatmul.mubr.msk.bf16.vlgmr.msra.gmra.mrb[40].mxu1 %vm1756_vm2, %v5678_v58 }
 0xce1   : > { %5354 = vmatprep.mubr.msk.bf16.mxu1 %vm6411_vm1, %v6410_v4 }
 0xdab   : > { %v2904_v43 = vpop.f32.mrb[36].mxu1 }
 0xdac   : > { %v2905_v35 = vadd.f32 %v5032_v40, %v2904_v43  ;;  %v5326_v44 = vpop.f32.mrb[37].mxu1 }
 0xdad   : > { %v2907_v45 = vpop.f32.mrb[38].mxu1  ;;  %v5038_v44 = vld [vmem:[%s7831_s7] ss:$0 sm:$0xff] }
 0xdae   : > { %v2911_v46 = vadd.f32 %v2905_v35, %v7140_v7  ;;  %v2908_v47 = vadd.f32 %v5032_v40, %v2907_v45  ;;  %v5327_v48 = vpop.f32.mrb[39].mxu1 }
 0xdb0   : > { %v2912_v49 = vadd.f32 %v2908_v47, %v7142_v8  ;;  %v2915_v50 = vsel %vm1756_vm2, %v2911_v46, 0.0  ;;  %v2924_v52 = vmul.f32 %v2911_v46, %v2911_v46  ;;  %v1706_v8 = vld [vmem:[%s7823_s1 + $0x8] sm:$0xff] }
 0xdb1   : > { %2916 = vadd.xlane.f32.xlu1 %v2915_v50 }
 0xdb2   : > { %v2918_v51 = vsel %vm1756_vm2, %v2912_v49, 0.0  ;;  %v2926_v55 = vsel %vm1756_vm2, %v2924_v52, 0.0  ;;  %v2925_v57 = vmul.f32 %v2912_v49, %v2912_v49 }
 0xdb3   : > { %2919 = vadd.xlane.f32.xlu0 %v2918_v51  ;;  %v3109_v27 = vpop.f32.mrb[40].mxu1 }
 0xdb4   : > { %v2929_v7 = vsel %vm1756_vm2, %v2925_v57, 0.0  ;;  %v3110_v28 = vadd.f32 %v5042_v25, %v3109_v27  ;;  %v5342_v30 = vpop.f32.mrb[41].mxu1 }
 0xdb5   : > { %v3112_v32 = vpop.f32.mrb[42].mxu1 }
 0xdb6   : > { %v7421_v33 = vpack.c.bf16 %v3110_v28, %v3110_v28  ;;  %v3113_v38 = vadd.f32 %v5042_v25, %v3112_v32  ;;  %v5343_v39 = vpop.f32.mrb[43].mxu1 }
 0xdb7   : > { %2927 = vadd.xlane.f32.xlu0 %v2926_v55 }
 0xdb8   : > { %v7423_v40 = vpack.c.bf16 %v3113_v38, %v3113_v38  ;;  %v3190_v43 = vsel %vm1935_vm3, %v7421_v33, 0 }
 0xdb9   : > { %5353 = vmatpush3.bf16.xpose.msra.mxu1 %v3190_v43 }
 0xdba   : > { %v3236_v35 = vsel %vm1935_vm3, %v7423_v40, 0  ;;  %5364 = vmatprep.subr.bf16.mxu1 %v6410_v4 }
 0xdbb   : > { %2930 = vadd.xlane.f32.xlu0 %v2929_v7 }
 0xdc2   : > { %2964 = vperm.xlu1 %5651, %v1705_v53  }
 0xdd1   : > { %2969 = vperm.xlu0 %5652, %v1706_v8   ;;  %v5047_v8 = vld [vmem:[%s7832_s12] ss:$0 sm:$0xff] }
 0xe3e   : > { %v2917_v60 = vpop.xlane.xlu1 %2916 }
 0xe3f   : > { %v2922_v34 = vmul.f32 0.03125, %v2917_v60 }
 0xe40   : > { %v2920_v29 = vpop.xlane.xlu0 %2919 }
 0xe41   : > { %v2934_v61 = vmul.f32 %v2922_v34, %v2922_v34  ;;  %v2923_v62 = vmul.f32 0.03125, %v2920_v29  ;;  %v2938_v3 = vsub.f32 %v2911_v46, %v2922_v34 }
 0xe42   : > { %v7395_v31 = vpop.permute.xlu1 %2964 }
 0xe43   : > { %v2935_v21 = vmul.f32 %v2923_v62, %v2923_v62  ;;  %v2939_v10 = vsub.f32 %v2912_v49, %v2923_v62 }
 0xe44   : > { %v2928_v37 = vpop.xlane.xlu0 %2927 }
 0xe45   : > { %v2932_v63 = vmul.f32 0.03125, %v2928_v37 }
 0xe47   : > { %v2936_v0 = vsub.f32 %v2932_v63, %v2934_v61 }
 0xe48   : > { %v2931_v1 = vpop.xlane.xlu0 %2930 }
 0xe49   : > { %v2940_v26 = vadd.f32 1e-05, %v2936_v0  ;;  %v2933_v2 = vmul.f32 0.03125, %v2931_v1 }
 0xe4b   : > { %5723 = vrsqrt.f32 %v2940_v26  ;;  %v2937_v36 = vsub.f32 %v2933_v2, %v2935_v21 }
 0xe4d   : > { %v2941_v41 = vadd.f32 1e-05, %v2937_v36 }
 0xe4f   : > { %5725 = vrsqrt.f32 %v2941_v41 }
 0xe50   : > { %v7397_v17 = vpop.permute.xlu0 %2969 }
 0xe55   : > { %v5724_v5 = vpop.eup %5723 }
 0xe56   : > { %v2944_v9 = vmul.f32 %v5724_v5, %v2938_v3 }
 0xe58   : > { %v2952_v11 = vmul.f32 %v5036_v6, %v2944_v9 }
 0xe59   : > { %v5726_v12 = vpop.eup %5725 }
 0xe5a   : > { %v2945_v14 = vmul.f32 %v5726_v12, %v2939_v10  ;;  %v2960_v15 = vadd.f32 %v5037_v13, %v2952_v11 }
 0xe5c   : > { %v2953_v16 = vmul.f32 %v5036_v6, %v2945_v14  ;;  %v7400_v19 = vmul.f32 %v7395_v31, %v2960_v15 }
 0xe5e   : > { %v2961_v18 = vadd.f32 %v5037_v13, %v2953_v16 }
 0xe60   : > { %v7403_v20 = vmul.f32 %v7397_v17, %v2961_v18 }
 0xe62   : > { %v2974_v23 = vpack.c.bf16 %v7403_v20, %v7400_v19 }
 0xe64   : > { %5333 = vmatmul.mubr.msk.bf16.vlgmr.msra.gmra.mrb[40].mxu0 %vm1756_vm2, %v2974_v23 }
 0xe65   : > { %5345 = vmatpush3.bf16.msra.mxu0 %v5681_v22  ;;  %5348 = vmatprep.mubr.msk.bf16.mxu0 %vm6411_vm1, %v6410_v4 }
 0xe66   : > { %5346 = vmatprep.subr.bf16.mxu0 %v6410_v4 }
 0xe69   : > { %5347 = vmatpush3.bf16.msra.mxu0 %v5682_v24 }
 0xe6a   : > { %5358 = vmatprep.subr.bf16.mxu0 %v6410_v4 }
 0xe6c   : > { %5349 = vmatmul.mubr.msk.bf16.vlgmr.msra.gmra.mrb[44].mxu0 %vm1756_vm2, %v5678_v58 }
 0xe6d   : > { %5360 = vmatprep.mubr.msk.bf16.mxu0 %vm6411_vm1, %v6410_v4 }
 0xe72   : > { %5359 = vmatpush3.bf16.xpose.msra.mxu0 %v3236_v35 }
 0xe73   : > { %5370 = vmatprep.subr.bf16.mxu0 %v6410_v4 }
 0xf37   : > { %v3037_v45 = vpop.f32.mrb[40].mxu0 }
 0xf38   : > { %v3038_v46 = vadd.f32 %v5038_v44, %v3037_v45  ;;  %v5334_v47 = vpop.f32.mrb[41].mxu0 }
 0xf39   : > { %v3040_v48 = vpop.f32.mrb[42].mxu0 }
 0xf3a   : > { %v7433_v49 = vpack.c.bf16 %v3038_v46, %v3038_v46  ;;  %v3041_v50 = vadd.f32 %v5038_v44, %v3040_v48  ;;  %v5335_v51 = vpop.f32.mrb[43].mxu0 }
 0xf3c   : > { %v7435_v52 = vpack.c.bf16 %v3041_v50, %v3041_v50  ;;  %5355 = vmatmul.mubr.msk.bf16.vlgmr.msra.gmra.mrb[44].mxu1 %vm1935_vm3, %v7433_v49 }
 0xf3d   : > { %5366 = vmatprep.mubr.msk.bf16.mxu1 %vm6411_vm1, %v6410_v4 }
 0xf3e   : > { %5361 = vmatmul.mubr.msk.bf16.vlgmr.msra.gmra.mrb[48].mxu0 %vm1935_vm3, %v7435_v52 }
 0xf3f   : > { %v3173_v55 = vpop.f32.mrb[44].mxu0  ;;  %5372 = vmatprep.mubr.msk.bf16.mxu0 %vm6411_vm1, %v6410_v4 }
 0xf40   : > { %v5350_v57 = vpop.f32.mrb[45].mxu0  ;;  %v3174_v54 = vadd.f32 %v5047_v8, %v3173_v55 }
 0xf41   : > { %v3176_v7 = vpop.f32.mrb[46].mxu0 }
 0xf42   : > { %v5351_v53 = vpop.f32.mrb[47].mxu0  ;;  %v3177_v56 = vadd.f32 %v5047_v8, %v3176_v7  ;;  %v7447_v58 = vpack.c.bf16 %v3174_v54, %v3174_v54 }
 0xf44   : > { %v7449_v59 = vpack.c.bf16 %v3177_v56, %v3177_v56  ;;  %v3306_v42 = vsel %vm2055_vm4, %v7447_v58, 0 }
 0xf45   : > { %5365 = vmatpush3.bf16.msra.mxu1 %v3306_v42 }
 0xf46   : > { %v3352_v60 = vsel %vm2055_vm4, %v7449_v59, 0  ;;  %5376 = vmatprep.subr.bf16.mxu1 %v6410_v4 }
 0xf47   : > { %5371 = vmatpush3.bf16.msra.mxu0 %v3352_v60 }
 0xf48   : > { %5382 = vmatprep.subr.bf16.mxu0 %v6410_v4 }
0x100f   : > { %v3226_v29 = vpop.f32.mrb[44].mxu1 }
0x1010   : > { %v5356_v34 = vpop.f32.mrb[45].mxu1  ;;  %v3278_v37 = vsel %vm1935_vm3, %v3226_v29, -inf }
0x1011   : > { %3279 = vmax.xlane.f32.xlu1 %v3278_v37  ;;  %v3229_v61 = vpop.f32.mrb[46].mxu1  ;;  %v3272_v62 = vpop.f32.mrb[48].mxu0 }
0x1012   : > { %v5357_v63 = vpop.f32.mrb[47].mxu1  ;;  %v5362_v0 = vpop.f32.mrb[49].mxu0  ;;  %v3281_v1 = vsel %vm1935_vm3, %v3272_v62, -inf }
0x1013   : > { %3282 = vmax.xlane.f32.xlu0 %v3281_v1  ;;  %v3275_v21 = vpop.f32.mrb[50].mxu0 }
0x1014   : > { %v5363_v26 = vpop.f32.mrb[51].mxu0 }
0x1022   : > { %3398 = vrot.lane.b32.xlu1 %v7421_v33, %s6413_s30 }
0x1029   : > { %3395 = vrot.lane.b32.xlu0 %v7433_v49, %s6413_s30 }
0x109e   : > { %v3280_v2 = vpop.xlane.xlu1 %3279 }
0x109f   : > { %v3284_v36 = vsub.f32 %v3226_v29, %v3280_v2 }
0x10a0   : > { %v3283_v41 = vpop.xlane.xlu0 %3282 }
0x10a1   : > { %v3286_v3 = vmul.f32 1.442695, %v3284_v36  ;;  %v3285_v5 = vsub.f32 %v3272_v62, %v3283_v41 }
0x10a2   : > { %v3399_v13 = vpop.permute.xlu1 %3398 }
0x10a3   : > { %5727 = vpow2.f32 %v3286_v3  ;;  %v3288_v6 = vmul.f32 1.442695, %v3285_v5  ;;  %v3404_v24 = vsel %vm1935_vm3, %v3399_v13, 0 }
0x10a4   : > { %v3396_v32 = vpop.permute.xlu0 %3395 }
0x10a5   : > { %5729 = vpow2.f32 %v3288_v6 }
0x10ad   : > { %v5728_v9 = vpop.eup %5727 }
0x10ae   : > { %v3290_v10 = vsel %vm1935_vm3, %v5728_v9, 0.0 }
0x10af   : > { %v5730_v11 = vpop.eup %5729  ;;  %3291 = vadd.xlane.f32.xlu1 %v3290_v10 }
0x10b0   : > { %v3293_v12 = vsel %vm1935_vm3, %v5730_v11, 0.0 }
0x10b3   : > { %3294 = vadd.xlane.f32.xlu1 %v3293_v12 }
0x10c4   : > { %3450 = vrot.lane.b32.xlu1 %v7423_v40, %s6413_s30 }
0x10c8   : > { %3447 = vrot.lane.b32.xlu1 %v7435_v52, %s6413_s30 }
0x113c   : > { %v3292_v14 = vpop.xlane.xlu1 %3291 }
0x113d   : > { %5731 = vrcp.f32 %v3292_v14 }
0x1140   : > { %v3295_v15 = vpop.xlane.xlu1 %3294 }
0x1141   : > { %5733 = vrcp.f32 %v3295_v15 }
0x1144   : > { %v3451_v27 = vpop.permute.xlu1 %3450 }
0x1145   : > { %v3456_v30 = vsel %vm1935_vm3, %v3451_v27, 0 }
0x1147   : > { %v5732_v16 = vpop.eup %5731 }
0x1148   : > { %v3298_v18 = vmul.f32 %v5732_v16, %v5728_v9  ;;  %v3448_v38 = vpop.permute.xlu1 %3447 }
0x114a   : > { %v3300_v22 = vpack.c.bf16 %v3298_v18, %v3298_v18 }
0x114b   : > { %v5734_v23 = vpop.eup %5733 }
0x114c   : > { %v3299_v25 = vmul.f32 %v5734_v23, %v5730_v11  ;;  %5367 = vmatmul.mubr.msk.bf16.vlgmr.msra.gmra.mrb[48].mxu1 %vm1935_vm3, %v3300_v22 }
0x114d   : > { %5377 = vmatpush3.bf16.xpose.msra.mxu1 %v3404_v24  ;;  %5378 = vmatprep.mubr.msk.bf16.mxu1 %vm6411_vm1, %v6410_v4 }
0x114e   : > { %v3301_v28 = vpack.c.bf16 %v3299_v25, %v3299_v25  ;;  %5388 = vmatprep.subr.bf16.mxu1 %v6410_v4 }
0x1150   : > { %5373 = vmatmul.mubr.msk.bf16.vlgmr.msra.gmra.mrb[52].mxu0 %vm1935_vm3, %v3301_v28 }
0x1151   : > { %5383 = vmatpush3.bf16.xpose.msra.mxu0 %v3456_v30  ;;  %5384 = vmatprep.mubr.msk.bf16.mxu0 %vm6411_vm1, %v6410_v4 }
0x1152   : > { %5394 = vmatprep.subr.bf16.mxu0 %v6410_v4 }
0x1154   : > { %5379 = vmatmul.mubr.msk.bf16.vlgmr.msra.gmra.mrb[52].mxu1 %vm1935_vm3, %v3396_v32 }
0x1155   : > { %5390 = vmatprep.mubr.msk.bf16.mxu1 %vm6411_vm1, %v6410_v4 }
0x1158   : > { %5385 = vmatmul.mubr.msk.bf16.vlgmr.msra.gmra.mrb[56].mxu0 %vm1935_vm3, %v3448_v38 }
0x1159   : > { %5396 = vmatprep.mubr.msk.bf16.mxu0 %vm6411_vm1, %v6410_v4 }
0x121f   : > { %v7485_v39 = vpop.f32.mrb[48].mxu1 }
0x1220   : > { %v5368_v43 = vpop.f32.mrb[49].mxu1 }
0x1221   : > { %v3345_v35 = vpop.f32.mrb[50].mxu1 }
0x1222   : > { %v5369_v44 = vpop.f32.mrb[51].mxu1 }
0x1223   : > { %v7487_v45 = vpop.f32.mrb[52].mxu0 }
0x1224   : > { %v5374_v46 = vpop.f32.mrb[53].mxu0 }
0x1225   : > { %v3391_v47 = vpop.f32.mrb[54].mxu0 }
0x1226   : > { %v5375_v48 = vpop.f32.mrb[55].mxu0 }
0x1227   : > { %v3440_v50 = vpop.f32.mrb[52].mxu1 }
0x1228   : > { %v5380_v51 = vpop.f32.mrb[53].mxu1  ;;  %v3498_v55 = vsel %vm1935_vm3, %v3440_v50, -inf }
0x1229   : > { %3499 = vmax.xlane.f32.xlu1 %v3498_v55  ;;  %v3443_v57 = vpop.f32.mrb[54].mxu1 }
0x122a   : > { %v5381_v7 = vpop.f32.mrb[55].mxu1 }
0x122b   : > { %v3492_v53 = vpop.f32.mrb[56].mxu0 }
0x122c   : > { %v5386_v8 = vpop.f32.mrb[57].mxu0  ;;  %v3501_v54 = vsel %vm1935_vm3, %v3492_v53, -inf }
0x122d   : > { %3502 = vmax.xlane.f32.xlu0 %v3501_v54  ;;  %v3495_v56 = vpop.f32.mrb[58].mxu0 }
0x122e   : > { %v5387_v42 = vpop.f32.mrb[59].mxu0 }
0x123a   : > { %3523 = vrot.lane.b32.xlu1 %v7447_v58, %s6413_s30 }
0x123e   : > { %3622 = vrot.lane.b32.xlu1 %v7421_v33, %s6414_s17 }
0x1243   : > { %3572 = vrot.lane.b32.xlu0 %v7449_v59, %s6413_s30  ;;  %s7833_s30 = scalar_lea.vmem [#allocation27], %s7061_s5 }
0x1247   : > { %3620 = vrot.lane.b32.xlu0 %v7433_v49, %s6414_s17 }
0x12b6   : > { %v3500_v60 = vpop.xlane.xlu1 %3499 }
0x12b7   : > { %v3504_v29 = vsub.f32 %v3440_v50, %v3500_v60 }
0x12b9   : > { %v3506_v34 = vmul.f32 1.442695, %v3504_v29 }
0x12ba   : > { %v3524_v37 = vpop.permute.xlu1 %3523  ;;  %v3503_v61 = vpop.xlane.xlu0 %3502 }
0x12bb   : > { %5735 = vpow2.f32 %v3506_v34  ;;  %v3529_v62 = vsel %vm2055_vm4, %v3524_v37, 0  ;;  %v3505_v63 = vsub.f32 %v3492_v53, %v3503_v61 }
0x12bc   : > { %5389 = vmatpush3.bf16.msra.mxu1 %v3529_v62 }
0x12bd   : > { %v3508_v0 = vmul.f32 1.442695, %v3505_v63  ;;  %5400 = vmatprep.subr.bf16.mxu1 %v6410_v4 }
0x12be   : > { %v3573_v1 = vpop.permute.xlu0 %3572  ;;  %v3623_v3 = vpop.permute.xlu1 %3622 }
0x12bf   : > { %5737 = vpow2.f32 %v3508_v0  ;;  %v3578_v21 = vsel %vm2055_vm4, %v3573_v1, 0  ;;  %v3628_v13 = vsel %vm1935_vm3, %v3623_v3, 0 }
0x12c0   : > { %5395 = vmatpush3.bf16.msra.mxu0 %v3578_v21 }
0x12c1   : > { %5406 = vmatprep.subr.bf16.mxu0 %v6410_v4 }
0x12c2   : > { %v3621_v22 = vpop.permute.xlu0 %3620 }
0x12c5   : > { %v5736_v26 = vpop.eup %5735 }
0x12c6   : > { %v3510_v2 = vsel %vm1935_vm3, %v5736_v26, 0.0 }
0x12c7   : > { %3511 = vadd.xlane.f32.xlu1 %v3510_v2 }
0x12c9   : > { %v5738_v36 = vpop.eup %5737 }
0x12ca   : > { %v3513_v41 = vsel %vm1935_vm3, %v5738_v36, 0.0 }
0x12cb   : > { %3514 = vadd.xlane.f32.xlu1 %v3513_v41 }
0x12dc   : > { %3672 = vrot.lane.b32.xlu1 %v7423_v40, %s6414_s17 }
0x12e0   : > { %3670 = vrot.lane.b32.xlu1 %v7435_v52, %s6414_s17 }
0x1354   : > { %v3512_v5 = vpop.xlane.xlu1 %3511 }
0x1355   : > { %5739 = vrcp.f32 %v3512_v5 }
0x1358   : > { %v3515_v6 = vpop.xlane.xlu1 %3514 }
0x1359   : > { %5741 = vrcp.f32 %v3515_v6 }
0x135c   : > { %v3673_v15 = vpop.permute.xlu1 %3672 }
0x135d   : > { %v3678_v18 = vsel %vm1935_vm3, %v3673_v15, 0 }
0x135f   : > { %v5740_v9 = vpop.eup %5739 }
0x1360   : > { %v3518_v10 = vmul.f32 %v5740_v9, %v5736_v26  ;;  %v3671_v23 = vpop.permute.xlu1 %3670 }
0x1362   : > { %v3520_v11 = vpack.c.bf16 %v3518_v10, %v3518_v10 }
0x1363   : > { %v5742_v12 = vpop.eup %5741 }
0x1364   : > { %v3519_v14 = vmul.f32 %v5742_v12, %v5738_v36  ;;  %5391 = vmatmul.mubr.msk.bf16.vlgmr.msra.gmra.mrb[56].mxu1 %vm1935_vm3, %v3520_v11 }
0x1365   : > { %5401 = vmatpush3.bf16.xpose.msra.mxu1 %v3628_v13  ;;  %5402 = vmatprep.mubr.msk.bf16.mxu1 %vm6411_vm1, %v6410_v4 }
0x1366   : > { %v3521_v16 = vpack.c.bf16 %v3519_v14, %v3519_v14  ;;  %5412 = vmatprep.subr.bf16.mxu1 %v6410_v4 }
0x1368   : > { %5397 = vmatmul.mubr.msk.bf16.vlgmr.msra.gmra.mrb[60].mxu0 %vm1935_vm3, %v3521_v16 }
0x1369   : > { %5407 = vmatpush3.bf16.xpose.msra.mxu0 %v3678_v18  ;;  %5408 = vmatprep.mubr.msk.bf16.mxu0 %vm6411_vm1, %v6410_v4 }
0x136a   : > { %5418 = vmatprep.subr.bf16.mxu0 %v6410_v4 }
0x136c   : > { %5403 = vmatmul.mubr.msk.bf16.vlgmr.msra.gmra.mrb[60].mxu1 %vm1935_vm3, %v3621_v22 }
0x136d   : > { %5414 = vmatprep.mubr.msk.bf16.mxu1 %vm6411_vm1, %v6410_v4 }
0x1370   : > { %5409 = vmatmul.mubr.msk.bf16.vlgmr.msra.gmra.mrb[64].mxu0 %vm1935_vm3, %v3671_v23 }
0x1371   : > { %5420 = vmatprep.mubr.msk.bf16.mxu0 %vm6411_vm1, %v6410_v4 }
0x1437   : > { %v7525_v24 = vpop.f32.mrb[56].mxu1 }
0x1438   : > { %v5392_v25 = vpop.f32.mrb[57].mxu1 }
0x1439   : > { %v3568_v27 = vpop.f32.mrb[58].mxu1 }
0x143a   : > { %v5393_v28 = vpop.f32.mrb[59].mxu1 }
0x143b   : > { %v7527_v30 = vpop.f32.mrb[60].mxu0 }
0x143c   : > { %v5653_v32 = vpack.i.bf16 %v7527_v30, %v7525_v24  ;;  %v5398_v38 = vpop.f32.mrb[61].mxu0 }
0x143d   : > { %v3617_v43 = vpop.f32.mrb[62].mxu0 }
0x143e   : > { %v5399_v35 = vpop.f32.mrb[63].mxu0 }
0x143f   : > { %v3664_v44 = vpop.f32.mrb[60].mxu1 }
0x1440   : > { %v5404_v46 = vpop.f32.mrb[61].mxu1  ;;  %v3720_v47 = vsel %vm1935_vm3, %v3664_v44, -inf }
0x1441   : > { %3721 = vmax.xlane.f32.xlu0 %v3720_v47  ;;  %v3667_v48 = vpop.f32.mrb[62].mxu1 }
0x1442   : > { %v5405_v50 = vpop.f32.mrb[63].mxu1 }
0x1443   : > { %v3714_v51 = vpop.f32.mrb[64].mxu0 }
0x1444   : > { %v5410_v55 = vpop.f32.mrb[65].mxu0  ;;  %v3723_v57 = vsel %vm1935_vm3, %v3714_v51, -inf }
0x1445   : > { %3724 = vmax.xlane.f32.xlu1 %v3723_v57  ;;  %v3717_v7 = vpop.f32.mrb[66].mxu0 }
0x1446   : > { %v5411_v53 = vpop.f32.mrb[67].mxu0 }
0x1456   : > { %3744 = vrot.lane.b32.xlu1 %v7447_v58, %s6414_s17 }
0x145a   : > { %3842 = vrot.lane.b32.xlu1 %v7421_v33, %s6415_s14 }
0x145e   : > { %3892 = vrot.lane.b32.xlu1 %v7423_v40, %s6415_s14 }
0x1462   : > { %3890 = vrot.lane.b32.xlu1 %v7435_v52, %s6415_s14 }
0x14ce   : > { %v3722_v8 = vpop.xlane.xlu0 %3721 }
0x14cf   : > { %v3726_v54 = vsub.f32 %v3664_v44, %v3722_v8 }
0x14d1   : > { %v3728_v56 = vmul.f32 1.442695, %v3726_v54 }
0x14d2   : > { %v3725_v42 = vpop.xlane.xlu1 %3724 }
0x14d3   : > { %5743 = vpow2.f32 %v3728_v56  ;;  %v3727_v60 = vsub.f32 %v3714_v51, %v3725_v42 }
0x14d5   : > { %v3730_v29 = vmul.f32 1.442695, %v3727_v60 }
0x14d6   : > { %v3745_v34 = vpop.permute.xlu1 %3744 }
0x14d7   : > { %5745 = vpow2.f32 %v3730_v29  ;;  %v3750_v37 = vsel %vm2055_vm4, %v3745_v34, 0 }
0x14d8   : > { %5413 = vmatpush3.bf16.msra.mxu1 %v3750_v37 }
0x14d9   : > { %5424 = vmatprep.subr.bf16.mxu1 %v6410_v4 }
0x14da   : > { %v3843_v26 = vpop.permute.xlu1 %3842 }
0x14db   : > { %v3848_v3 = vsel %vm1935_vm3, %v3843_v26, 0 }
0x14dd   : > { %v5744_v33 = vpop.eup %5743 }
0x14de   : > { %v3732_v40 = vsel %vm1935_vm3, %v5744_v33, 0.0 }
0x14df   : > { %3733 = vadd.xlane.f32.xlu0 %v3732_v40 }
0x14e1   : > { %v5746_v61 = vpop.eup %5745 }
0x14e2   : > { %v3735_v52 = vsel %vm1935_vm3, %v5746_v61, 0.0 }
0x14e3   : > { %3736 = vadd.xlane.f32.xlu0 %v3735_v52 }
0x14f9   : > { %3792 = vrot.lane.b32.xlu0 %v7449_v59, %s6414_s17  ;;  %s7834_s17 = smov %s7833_s30 }
0x14fd   : > { %3840 = vrot.lane.b32.xlu0 %v7433_v49, %s6415_s14  ;;  %v3893_v49 = vpop.permute.xlu1 %3892 }
0x14fe   : > { %v3898_v9 = vsel %vm1935_vm3, %v3893_v49, 0 }
0x1501   : > { %v3891_v11 = vpop.permute.xlu1 %3890 }
0x156c   : > { %v3734_v62 = vpop.xlane.xlu0 %3733 }
0x156d   : > { %5747 = vrcp.f32 %v3734_v62  ;;  %v5683_v62 = vld [vmem:[%s7833_s30] sm:$0xff]  }
0x1570   : > { %v3737_v63 = vpop.xlane.xlu0 %3736 }
0x1571   : > { %5749 = vrcp.f32 %v3737_v63  ;;  %v5684_v63 = vld [vmem:[%s7834_s17 + $0x8] sm:$0xff]  }
0x1574   : > { %v3793_v0 = vpop.permute.xlu0 %3792 }
0x1575   : > { %v3798_v1 = vsel %vm2055_vm4, %v3793_v0, 0 }
0x1576   : > { %5419 = vmatpush3.bf16.msra.mxu0 %v3798_v1 }
0x1577   : > { %v5748_v21 = vpop.eup %5747  ;;  %5430 = vmatprep.subr.bf16.mxu0 %v6410_v4 }
0x1578   : > { %v3740_v2 = vmul.f32 %v5748_v21, %v5744_v33  ;;  %v3841_v10 = vpop.permute.xlu0 %3840 }
0x157a   : > { %v3742_v36 = vpack.c.bf16 %v3740_v2, %v3740_v2 }
0x157b   : > { %v5750_v41 = vpop.eup %5749 }
0x157c   : > { %v3741_v5 = vmul.f32 %v5750_v41, %v5746_v61  ;;  %5415 = vmatmul.mubr.msk.bf16.vlgmr.msra.gmra.mrb[64].mxu1 %vm1935_vm3, %v3742_v36 }
0x157d   : > { %5425 = vmatpush3.bf16.xpose.msra.mxu1 %v3848_v3  ;;  %5426 = vmatprep.mubr.msk.bf16.mxu1 %vm6411_vm1, %v6410_v4 }
0x157e   : > { %v3743_v6 = vpack.c.bf16 %v3741_v5, %v3741_v5  ;;  %5436 = vmatprep.subr.bf16.mxu1 %v6410_v4 }
0x1580   : > { %5421 = vmatmul.mubr.msk.bf16.vlgmr.msra.gmra.mrb[68].mxu0 %vm1935_vm3, %v3743_v6 }
0x1581   : > { %5431 = vmatpush3.bf16.xpose.msra.mxu0 %v3898_v9  ;;  %5432 = vmatprep.mubr.msk.bf16.mxu0 %vm6411_vm1, %v6410_v4 }
0x1582   : > { %5442 = vmatprep.subr.bf16.mxu0 %v6410_v4 }
0x1584   : > { %5427 = vmatmul.mubr.msk.bf16.vlgmr.msra.gmra.mrb[68].mxu1 %vm1935_vm3, %v3841_v10 }
0x1585   : > { %5438 = vmatprep.mubr.msk.bf16.mxu1 %vm6411_vm1, %v6410_v4 }
0x1588   : > { %5433 = vmatmul.mubr.msk.bf16.vlgmr.msra.gmra.mrb[72].mxu0 %vm1935_vm3, %v3891_v11 }
0x1589   : > { %5444 = vmatprep.mubr.msk.bf16.mxu0 %vm6411_vm1, %v6410_v4 }
0x164f   : > { %v3786_v12 = vpop.f32.mrb[64].mxu1 }
0x1650   : > { %v5416_v13 = vpop.f32.mrb[65].mxu1 }
0x1651   : > { %v3789_v14 = vpop.f32.mrb[66].mxu1 }
0x1652   : > { %v5417_v15 = vpop.f32.mrb[67].mxu1 }
0x1653   : > { %v3834_v16 = vpop.f32.mrb[68].mxu0 }
0x1654   : > { %v5658_v18 = vpack.i.bf16 %v3834_v16, %v3786_v12  ;;  %v5422_v22 = vpop.f32.mrb[69].mxu0 }
0x1655   : > { %v3837_v23 = vpop.f32.mrb[70].mxu0 }
0x1656   : > { %v5423_v25 = vpop.f32.mrb[71].mxu0 }
0x1657   : > { %v3884_v27 = vpop.f32.mrb[68].mxu1 }
0x1658   : > { %v5428_v28 = vpop.f32.mrb[69].mxu1  ;;  %v3940_v38 = vsel %vm1935_vm3, %v3884_v27, -inf }
0x1659   : > { %3941 = vmax.xlane.f32.xlu0 %v3940_v38  ;;  %v3887_v43 = vpop.f32.mrb[70].mxu1 }
0x165a   : > { %v5429_v35 = vpop.f32.mrb[71].mxu1 }
0x165b   : > { %v3934_v44 = vpop.f32.mrb[72].mxu0 }
0x165c   : > { %v5434_v46 = vpop.f32.mrb[73].mxu0  ;;  %v3943_v47 = vsel %vm1935_vm3, %v3934_v44, -inf }
0x165d   : > { %3944 = vmax.xlane.f32.xlu1 %v3943_v47  ;;  %v3937_v48 = vpop.f32.mrb[74].mxu0 }
0x165e   : > { %v5435_v50 = vpop.f32.mrb[75].mxu0 }
0x166e   : > { %3964 = vrot.lane.b32.xlu1 %v7447_v58, %s6415_s14 }
0x1672   : > { %5654 = vrot.lane.b32.xlu1 %v5653_v32, %s6416_s25 }
0x1676   : > { %5659 = vrot.lane.b32.xlu1 %v5658_v18, %s6417_s29 }
0x16e6   : > { %v3942_v51 = vpop.xlane.xlu0 %3941 }
0x16e7   : > { %v3946_v55 = vsub.f32 %v3884_v27, %v3942_v51 }
0x16e9   : > { %v3948_v57 = vmul.f32 1.442695, %v3946_v55 }
0x16ea   : > { %v3945_v7 = vpop.xlane.xlu1 %3944 }
0x16eb   : > { %5751 = vpow2.f32 %v3948_v57  ;;  %v3947_v53 = vsub.f32 %v3934_v44, %v3945_v7 }
0x16ed   : > { %v3950_v8 = vmul.f32 1.442695, %v3947_v53  ;;  %v5685_v53 = vld [vmem:[%s7118_s20] sm:$0xff]  }
0x16ee   : > { %v3965_v54 = vpop.permute.xlu1 %3964 }
0x16ef   : > { %5753 = vpow2.f32 %v3950_v8  ;;  %v3970_v56 = vsel %vm2055_vm4, %v3965_v54, 0  ;;  %v5686_v8 = vld [vmem:[%s7118_s20 + $0x8] sm:$0xff]  }
0x16f0   : > { %5437 = vmatpush3.bf16.msra.mxu1 %v3970_v56  ;;  %v5688_v54 = vld [vmem:[%s7124_s22 + $0x8] sm:$0xff]  }
0x16f1   : > { %5448 = vmatprep.subr.bf16.mxu1 %v6410_v4 }
0x16f2   : > { %v5655_v49 = vpop.permute.xlu1 %5654 }
0x16f3   : > { %v5657_v9 = vunpack.i.h.bf16 %v5655_v49  ;;  %v5656_v10 = vunpack.i.l.bf16 %v5655_v49 }
0x16f5   : > { %v5752_v58 = vpop.eup %5751  ;;  %v4085_v14 = vsel %vm1935_vm3, %v7487_v45, %v5657_v9  ;;  %v4084_v15 = vsel %vm1935_vm3, %v7485_v39, %v5656_v10  ;;  %v5067_v45 = vld [vmem:[%s1453_s26] ss:$0 sm:$0xff]  ;;  %v5689_v10 = vld [vmem:[%s7124_s22 + $0x10] sm:$0xff]  }
0x16f6   : > { %v3952_v24 = vsel %vm1935_vm3, %v5752_v58, 0.0  ;;  %v5660_v6 = vpop.permute.xlu1 %5659 }
0x16f7   : > { %3953 = vadd.xlane.f32.xlu0 %v3952_v24  ;;  %v5662_v11 = vunpack.i.h.bf16 %v5660_v6  ;;  %v5661_v12 = vunpack.i.l.bf16 %v5660_v6 }
0x16f9   : > { %v5754_v30 = vpop.eup %5753  ;;  %v4086_v22 = vsel %vm2837_vm12, %v4084_v15, %v5661_v12  ;;  %v4087_v23 = vsel %vm2837_vm12, %v4085_v14, %v5662_v11  ;;  %v5690_v11 = vld [vmem:[%s7124_s22 + $0x18] sm:$0xff]   ;;  %v5073_v12 = vld [vmem:[%s1675_s28] ss:$0 sm:$0xff] }
0x16fa   : > { %v3955_v32 = vsel %vm1935_vm3, %v5754_v30, 0.0 }
0x16fb   : > { %3956 = vadd.xlane.f32.xlu0 %v3955_v32 }
0x1711   : > { %4012 = vrot.lane.b32.xlu0 %v7449_v59, %s6415_s14 }
0x1784   : > { %v3954_v42 = vpop.xlane.xlu0 %3953 }
0x1785   : > { %5755 = vrcp.f32 %v3954_v42 }
0x1788   : > { %v3957_v60 = vpop.xlane.xlu0 %3956 }
0x1789   : > { %5757 = vrcp.f32 %v3957_v60 }
0x178c   : > { %v4013_v29 = vpop.permute.xlu0 %4012 }
0x178d   : > { %v4018_v34 = vsel %vm2055_vm4, %v4013_v29, 0 }
0x178e   : > { %5443 = vmatpush3.bf16.msra.mxu0 %v4018_v34 }
0x178f   : > { %v5756_v37 = vpop.eup %5755  ;;  %5456 = vmatprep.subr.bf16.mxu0 %v6410_v4 }
0x1790   : > { %v3960_v33 = vmul.f32 %v5756_v37, %v5752_v58 }
0x1792   : > { %v3962_v40 = vpack.c.bf16 %v3960_v33, %v3960_v33 }
0x1793   : > { %v5758_v61 = vpop.eup %5757 }
0x1794   : > { %v3961_v52 = vmul.f32 %v5758_v61, %v5754_v30  ;;  %5439 = vmatmul.mubr.msk.bf16.vlgmr.msra.gmra.mrb[72].mxu1 %vm1935_vm3, %v3962_v40 }
0x1795   : > { %5452 = vmatprep.mubr.msk.bf16.mxu1 %vm6411_vm1, %v6410_v4  ;;  %5449 = vmatpush3.bf16.msra.mxu1 %v5683_v62 }
0x1796   : > { %v3963_v59 = vpack.c.bf16 %v3961_v52, %v3961_v52  ;;  %5450 = vmatprep.subr.bf16.mxu1 %v6410_v4 }
0x1798   : > { %5445 = vmatmul.mubr.msk.bf16.vlgmr.msra.gmra.mrb[76].mxu0 %vm1935_vm3, %v3963_v59 }
0x1799   : > { %5460 = vmatprep.mubr.msk.bf16.mxu0 %vm6411_vm1, %v6410_v4  ;;  %5451 = vmatpush3.bf16.msra.mxu1 %v5684_v63  ;;  %v5071_v63 = vld [vmem:[%s1664_s6] ss:$0 sm:$0xff] }
0x179a   : > { %5464 = vmatprep.subr.bf16.mxu1 %v6410_v4  ;;  %5457 = vmatpush3.bf16.msra.mxu0 %v5685_v53 }
0x179b   : > { %5458 = vmatprep.subr.bf16.mxu0 %v6410_v4 }
0x179e   : > { %5459 = vmatpush3.bf16.msra.mxu0 %v5686_v8 }
0x1867   : > { %v4006_v0 = vpop.f32.mrb[72].mxu1 }
0x1868   : > { %v5440_v1 = vpop.f32.mrb[73].mxu1 }
0x1869   : > { %v4009_v21 = vpop.f32.mrb[74].mxu1 }
0x186a   : > { %v5441_v26 = vpop.f32.mrb[75].mxu1 }
0x186b   : > { %v4054_v2 = vpop.f32.mrb[76].mxu0  ;;  %v5072_v26 = vld [vmem:[%s1667_s19] ss:$0 sm:$0xff] }
0x186c   : > { %v5663_v36 = vpack.i.bf16 %v4054_v2, %v4006_v0  ;;  %v5446_v41 = vpop.f32.mrb[77].mxu0 }
0x186d   : > { %v4057_v3 = vpop.f32.mrb[78].mxu0 }
0x186e   : > { %5664 = vrot.lane.b32.xlu0 %v5663_v36, %s6418_s9  ;;  %v5447_v5 = vpop.f32.mrb[79].mxu0 }
0x18e0   : > { %v5665_v13 = vpop.permute.xlu0 %5664 }
0x18e1   : > { %v5667_v16 = vunpack.i.h.bf16 %v5665_v13  ;;  %v5666_v18 = vunpack.i.l.bf16 %v5665_v13 }
0x18e3   : > { %v4089_v25 = vsel %vm2840_vm13, %v4087_v23, %v5667_v16  ;;  %v4088_v27 = vsel %vm2840_vm13, %v4086_v22, %v5666_v18 }
0x18e4   : > { %v4090_v28 = vpack.c.bf16 %v4089_v25, %v4088_v27 }
0x18e6   : > { %5453 = vmatmul.mubr.msk.bf16.vlgmr.msra.gmra.mrb[76].mxu1 %vm1756_vm2, %v4090_v28  ;;  %v5077_v28 = vld [vmem:[%s1683_s16] ss:$0 sm:$0xff] }
0x18e7   : > { %5472 = vmatprep.mubr.msk.bf16.mxu1 %vm6411_vm1, %v6410_v4 }
0x19b9   : > { %v4151_v38 = vpop.f32.mrb[76].mxu1 }
0x19ba   : > { %v4152_v39 = vadd.f32 %v5067_v45, %v4151_v38  ;;  %v5454_v43 = vpop.f32.mrb[77].mxu1 }
0x19bb   : > { %v4154_v35 = vpop.f32.mrb[78].mxu1 }
0x19bc   : > { %v4158_v44 = vadd.f32 %v4152_v39, %v7400_v19  ;;  %v4155_v46 = vadd.f32 %v5067_v45, %v4154_v35  ;;  %v5455_v47 = vpop.f32.mrb[79].mxu1 }
0x19be   : > { %v4159_v48 = vadd.f32 %v4155_v46, %v7403_v20  ;;  %v4162_v50 = vsel %vm1756_vm2, %v4158_v44, 0.0  ;;  %v4170_v57 = vmul.f32 %v4158_v44, %v4158_v44  ;;  %v5687_v20 = vld [vmem:[%s7124_s22] sm:$0xff]  }
0x19bf   : > { %4163 = vadd.xlane.f32.xlu1 %v4162_v50  ;;  %5465 = vmatpush3.bf16.msra.mxu1 %v5687_v20 }
0x19c0   : > { %v4165_v51 = vsel %vm1756_vm2, %v4159_v48, 0.0  ;;  %v4171_v55 = vmul.f32 %v4159_v48, %v4159_v48  ;;  %v4172_v19 = vsel %vm1756_vm2, %v4170_v57, 0.0  ;;  %5466 = vmatprep.subr.bf16.mxu1 %v6410_v4 }
0x19c1   : > { %4166 = vadd.xlane.f32.xlu0 %v4165_v51 }
0x19c2   : > { %v4175_v7 = vsel %vm1756_vm2, %v4171_v55, 0.0 }
0x19c3   : > { %4176 = vadd.xlane.f32.xlu1 %v4175_v7  ;;  %5467 = vmatpush3.bf16.msra.mxu1 %v5688_v54 }
0x19c4   : > { %5468 = vmatprep.subr.bf16.mxu1 %v6410_v4 }
0x19c5   : > { %4173 = vadd.xlane.f32.xlu0 %v4172_v19 }
0x19c7   : > { %5469 = vmatpush3.bf16.msra.mxu1 %v5689_v10 }
0x19c8   : > { %5470 = vmatprep.subr.bf16.mxu1 %v6410_v4 }
0x19cb   : > { %5471 = vmatpush3.bf16.msra.mxu1 %v5690_v11 }
0x1a4c   : > { %v4164_v56 = vpop.xlane.xlu1 %4163 }
0x1a4d   : > { %v4168_v24 = vmul.f32 0.03125, %v4164_v56 }
0x1a4e   : > { %v4167_v58 = vpop.xlane.xlu0 %4166 }
0x1a4f   : > { %v4169_v30 = vmul.f32 0.03125, %v4167_v58  ;;  %v4180_v34 = vmul.f32 %v4168_v24, %v4168_v24  ;;  %v4184_v0 = vsub.f32 %v4158_v44, %v4168_v24 }
0x1a50   : > { %v4177_v32 = vpop.xlane.xlu1 %4176 }
0x1a51   : > { %v4181_v42 = vmul.f32 %v4169_v30, %v4169_v30  ;;  %v4179_v60 = vmul.f32 0.03125, %v4177_v32  ;;  %v4185_v59 = vsub.f32 %v4159_v48, %v4169_v30 }
0x1a52   : > { %v4174_v29 = vpop.xlane.xlu0 %4173 }
0x1a53   : > { %v4183_v37 = vsub.f32 %v4179_v60, %v4181_v42  ;;  %v4178_v33 = vmul.f32 0.03125, %v4174_v29 }
0x1a55   : > { %v4187_v40 = vadd.f32 1e-05, %v4183_v37  ;;  %v4182_v61 = vsub.f32 %v4178_v33, %v4180_v34  ;;  %v5083_v33 = vld [vmem:[%s1686_s0] ss:$0 sm:$0xff] }
0x1a57   : > { %5759 = vrsqrt.f32 %v4187_v40  ;;  %v4186_v52 = vadd.f32 1e-05, %v4182_v61 }
0x1a59   : > { %5761 = vrsqrt.f32 %v4186_v52 }
0x1a61   : > { %v5760_v62 = vpop.eup %5759 }
0x1a62   : > { %v4191_v1 = vmul.f32 %v5760_v62, %v4185_v59  ;;  %v5084_v59 = vld [vmem:[%s1689_s23] ss:$0 sm:$0xff] }
0x1a63   : > { %v5762_v21 = vpop.eup %5761 }
0x1a64   : > { %v4199_v2 = vmul.f32 %v5071_v63, %v4191_v1  ;;  %v4190_v36 = vmul.f32 %v5762_v21, %v4184_v0 }
0x1a66   : > { %v4198_v41 = vmul.f32 %v5071_v63, %v4190_v36  ;;  %v4207_v3 = vadd.f32 %v5072_v26, %v4199_v2 }
0x1a68   : > { %v4206_v5 = vadd.f32 %v5072_v26, %v4198_v41  ;;  %v4209_v6 = vmul.f32 %v4207_v3, %v7397_v17 }
0x1a6a   : > { %v4208_v49 = vmul.f32 %v4206_v5, %v7395_v31 }
0x1a6c   : > { %v4210_v9 = vpack.c.bf16 %v4209_v6, %v4208_v49 }
0x1a6e   : > { %5461 = vmatmul.mubr.msk.bf16.vlgmr.msra.gmra.mrb[80].mxu0 %vm1756_vm2, %v4210_v9 }
0x1b41   : > { %v4271_v13 = vpop.f32.mrb[80].mxu0 }
0x1b42   : > { %v4272_v14 = vadd.f32 %v5073_v12, %v4271_v13  ;;  %v5462_v15 = vpop.f32.mrb[81].mxu0 }
0x1b43   : > { %v4274_v16 = vpop.f32.mrb[82].mxu0 }
0x1b44   : > { %v4275_v18 = vadd.f32 %v5073_v12, %v4274_v16  ;;  %v5463_v22 = vpop.f32.mrb[83].mxu0  ;;  %v4278_v23 = vmax.f32 %v4272_v14, 0.0 }
0x1b46   : > { %v4279_v25 = vmax.f32 %v4275_v18, 0.0 }
0x1b48   : > { %v4280_v27 = vpack.c.bf16 %v4279_v25, %v4278_v23 }
0x1b4a   : > { %5473 = vmatmul.mubr.msk.bf16.vlgmr.msra.gmra.mrb[80].mxu1 %vm4320_vm14, %v4280_v27 }
0x1c1d   : > { %v4358_v45 = vpop.f32.mrb[80].mxu1 }
0x1c1e   : > { %v4359_v38 = vadd.f32 %v5077_v28, %v4358_v45  ;;  %v5474_v4 = vpop.f32.mrb[81].mxu1 }
0x1c1f   : > { %v4361_v39 = vpop.f32.mrb[82].mxu1 }
0x1c20   : > { %v4365_v43 = vadd.f32 %v4359_v38, %v4208_v49  ;;  %v4362_v35 = vadd.f32 %v5077_v28, %v4361_v39  ;;  %v5475_v44 = vpop.f32.mrb[83].mxu1 }
0x1c22   : > { %v4366_v46 = vadd.f32 %v4362_v35, %v4209_v6  ;;  %v4369_v47 = vsel %vm1756_vm2, %v4365_v43, 0.0  ;;  %v4377_v48 = vmul.f32 %v4365_v43, %v4365_v43 }
0x1c23   : > { %4370 = vadd.xlane.f32.xlu0 %v4369_v47 }
0x1c24   : > { %v4372_v50 = vsel %vm1756_vm2, %v4366_v46, 0.0  ;;  %v4378_v51 = vmul.f32 %v4366_v46, %v4366_v46  ;;  %v4379_v55 = vsel %vm1756_vm2, %v4377_v48, 0.0 }
0x1c25   : > { %4373 = vadd.xlane.f32.xlu1 %v4372_v50 }
0x1c26   : > { %v4382_v57 = vsel %vm1756_vm2, %v4378_v51, 0.0 }
0x1c27   : > { %4380 = vadd.xlane.f32.xlu0 %v4379_v55 }
0x1c29   : > { %4383 = vadd.xlane.f32.xlu1 %v4382_v57 }
0x1cb0   : > { %v4371_v7 = vpop.xlane.xlu0 %4370 }
0x1cb1   : > { %v4375_v19 = vmul.f32 0.03125, %v4371_v7 }
0x1cb2   : > { %v4374_v53 = vpop.xlane.xlu1 %4373 }
0x1cb3   : > { %v4376_v8 = vmul.f32 0.03125, %v4374_v53  ;;  %v4387_v54 = vmul.f32 %v4375_v19, %v4375_v19  ;;  %v4391_v34 = vsub.f32 %v4365_v43, %v4375_v19 }
0x1cb4   : > { %v4381_v20 = vpop.xlane.xlu0 %4380 }
0x1cb5   : > { %v4385_v56 = vmul.f32 0.03125, %v4381_v20  ;;  %v4388_v24 = vmul.f32 %v4376_v8, %v4376_v8  ;;  %v4392_v40 = vsub.f32 %v4366_v46, %v4376_v8 }
0x1cb6   : > { %v4384_v58 = vpop.xlane.xlu1 %4383 }
0x1cb7   : > { %v4389_v30 = vsub.f32 %v4385_v56, %v4387_v54  ;;  %v4386_v32 = vmul.f32 0.03125, %v4384_v58 }
0x1cb9   : > { %v4393_v42 = vadd.f32 1e-05, %v4389_v30  ;;  %v4390_v60 = vsub.f32 %v4386_v32, %v4388_v24 }
0x1cbb   : > { %5763 = vrsqrt.f32 %v4393_v42  ;;  %v4394_v29 = vadd.f32 1e-05, %v4390_v60 }
0x1cbd   : > { %5765 = vrsqrt.f32 %v4394_v29 }
0x1cc5   : > { %v5764_v37 = vpop.eup %5763 }
0x1cc6   : > { %v4397_v61 = vmul.f32 %v5764_v37, %v4391_v34 }
0x1cc7   : > { %v5766_v52 = vpop.eup %5765 }
0x1cc8   : > { %v4405_v62 = vmul.f32 %v5083_v33, %v4397_v61  ;;  %v4398_v63 = vmul.f32 %v5766_v52, %v4392_v40 }
0x1cca   : > { %v4413_v0 = vadd.f32 %v5084_v59, %v4405_v62  ;;  %v4406_v1 = vmul.f32 %v5083_v33, %v4398_v63  ;;  %4422 = sbr.rel (%p5085_p6) target bundleno = 7377 (0x1cd1), region = 216 }
0x1ccc   : > { %v4415_v21 = vmul.f32 %v4413_v0, %v7395_v31  ;;  %v4414_v26 = vadd.f32 %v5084_v59, %v4406_v1 }
0x1cce   : > { %4417 = vst.msk [vmem:[#allocation2] sm:$0xff] %vm1756_vm2, %v4415_v21  ;;  %v4416_v2 = vmul.f32 %v4414_v26, %v7397_v17  ;;  %4423 = vst.msk [vmem:[#allocation30] sm:$0xff] (!%p5085_p6), %vm1756_vm2, %v4415_v21 }
0x1cd0   : > { %4418 = vst.msk [vmem:[#allocation2 + $0x8] sm:$0xff] %vm1756_vm2, %v4416_v2  ;;  %4424 = vst.msk [vmem:[#allocation30 + $0x8] sm:$0xff] (!%p5085_p6), %vm1756_vm2, %v4416_v2 }
0x1cd1 PF: > { %s7841_s0 = sld [smem:[#allocation76_spill]]  ;;  %s6419_s22 = smov [#allocation30]  }
0x1cd2   : > { %s4434_s23 = sshll.u32 %s6419_s22, 4  ;;  %s4435_s23 = int_to_ptr.vmem [resolvable:$true] %s4434_s23 }
0x1cd3   : > { %s6243_s28 = scalar_lea.vmem %s4435_s23, 256  ;;  %p6250_p2 = scmp.lt.s32.totalorder %s4435_s23, %s4435_s23 }
0x1cd4   : > { %p6244_p4 = scmp.ne.s32.totalorder %s4435_s23, %s6243_s28  ;;  %p6251_p1 = scmp.lt.s32.totalorder %s6243_s28, %s6243_s28 }
0x1cd6   : > { %p6252_p5 = por %p6251_p1, %p6250_p2 }
0x1cd7   : > { %p5536_p11 = scmp.eq.s32.totalorder %s7841_s0, 1 }
0x1cd9   : > { %p6245_p13 = pnand %p6244_p4, %p5536_p11 }
0x1cdb   : > { %p6246_p12 = pneg %p6245_p13 }
0x1cdd   : > { %p6253_p8 = pnand %p6252_p5, %p6246_p12 }
0x1cdf   : > { %6256 = shalt.err (!%p6253_p8)
}
0x1ce0   : > { %s7842_s18 = sld [smem:[#allocation71_spill]] }
0x1ce6   : > { %s7843_s4 = smov %s7842_s18  ;;  %s6257_s6 = scalar_lea.hbm %s7842_s18, 256 }
0x1ce7   : > { %p6258_p7 = scmp.ne.s32.totalorder %s7843_s4, %s6257_s6  ;;  %p6263_p10 = scmp.lt.u32.totalorder %s6257_s6, %s7843_s4 }
0x1ce9   : > { %p6259_p3 = pnand %p6258_p7, %p5536_p11 }
0x1ceb   : > { %p6260_p0 = pneg %p6259_p3 }
0x1ced   : > { %p6265_p9 = pnand %p6263_p10, %p6260_p0 }
0x1cef   : > { %6268 = shalt.err (!%p6265_p9)
}
0x1cf0   : > { %s6420_s14 = smov 128  }
0x1cf1   : > { %5517 = dma.vmem_to_hbm [thread:$0]  (%p5536_p11), %s4435_s23, 256, %s7843_s4, [#allocation5], %s6420_s14, %s6420_s14, %s6416_s25  }
0x1cf2   : > { %6330 = dma.done.wait (%p5536_p11), [#allocation5], 256  }
0x1cf3   : > { %6332 = vsyncadd (%p5536_p11), [#allocation5], 4294967040 }
0x1cf4 PF: > { %s7844_s29 = sld [smem:[#allocation75_spill]]  ;;  %s7845_s15 = sld [smem:[#allocation72_spill]] }
0x1cf5   : > { %s7846_s0 = sld [smem:[#allocation73_spill]]  ;;  %s7847_s16 = sld [smem:[#allocation78_spill]] }
0x1cf6   : > { %s7848_s18 = sld [smem:[#allocation74_spill]]  ;;  %s7849_s22 = sld [smem:[#allocation77_spill]] }
0x1cfa   : > { %s95_s23 = sadd.s32 1, %s7844_s29  }
0x1cfb   : > { %p92_p6 = scmp.ge.s32.totalorder %s95_s23, 4  }
0x1cfd   :  { %94 = sbr.rel (!%p92_p6) target bundleno = 86 (0x56), region = 426 }
0x1d04   :  { %4450 = vsyncpa [#allocation4], 1 }
0x1d05   :  { %4452 = vsyncpa [#allocation4 + $0x1], 1 }
0x1d06   :  { %4453 = vsyncpa [#allocation7], 1 }
0x1d07   :  { %4454 = vsyncpa [#allocation10], 1 }
0x1d08   :  { %4456 = vsyncpa [#allocation10 + $0x1], 1 }
0x1d09   :  { %4457 = vsyncpa [#allocation13], 1 }
0x1d0a   :  { %4459 = vsyncpa [#allocation13 + $0x1], 1 }
0x1d0b   :  { %4460 = vsyncpa [#allocation16], 1 }
0x1d0c   :  { %4462 = vsyncpa [#allocation16 + $0x1], 1 }
0x1d0d   :  { %4463 = vsyncpa [#allocation19], 1 }
0x1d0e   :  { %4465 = vsyncpa [#allocation19 + $0x1], 1 }
0x1d0f   :  { %4466 = vsyncpa [#allocation22], 1 }
0x1d10   :  { %4468 = vsyncpa [#allocation22 + $0x1], 1 }
0x1d11   :  { %4469 = vsyncpa [#allocation25], 1 }
0x1d12   :  { %4471 = vsyncpa [#allocation25 + $0x1], 1 }
0x1d13   :  { %4472 = vsyncpa [#allocation28], 1 }
0x1d14   :  { %4474 = vsyncpa [#allocation28 + $0x1], 1 }
0x1d15   :  { %4475 = vsyncpa [#allocation5], 1 }
0x1d16   :  { %4477 = vsyncpa [#allocation5 + $0x1], 1 }

</bundles_post_ra>
